<compile_context>
chip_gen: v5e
topology: v5e:2x2
jax: 0.10.0
libtpu: 0.0.40
codegen_flags: <defaults>
</compile_context>

<pallas_src>
import functools

import jax
import jax.numpy as jnp
from jax.experimental import pallas as pl
from jax.experimental.pallas import tpu as pltpu

_BN_EPS = 1e-5


# ----------------------------------------------------------------------------
# Fused OSA kernel factory
# ----------------------------------------------------------------------------
def _make_osa_kernel(*, n_layers, h, w, th, cin, stage_ch, concat_ch, identity):
    L = n_layers

    def _conv3x3(prev, w3, bias, rows_out, c_in):
        # prev: (rows_out + 2, w + 2, c_in) with zero halo rows / side columns.
        # w3:   (3, 3 * c_in, stage_ch)  (BN scale already folded in).
        # Fold kx into the contraction: 3 matmuls with K = 3 * c_in.
        xc = jnp.concatenate(
            [prev[:, 0:w, :], prev[:, 1:w + 1, :], prev[:, 2:w + 2, :]],
            axis=-1)                                   # (rows_out+2, w, 3*c_in)
        acc = jnp.zeros((rows_out * w, stage_ch), jnp.float32)
        for ky in range(3):
            slab = xc[ky:ky + rows_out].reshape(rows_out * w, 3 * c_in)
            acc = acc + jnp.dot(slab, w3[ky],
                                preferred_element_type=jnp.float32)
        y = jnp.maximum(acc + bias, 0.0)
        return y.reshape(rows_out, w, stage_ch)

    def kernel(x_ref, *refs):
        out_ref = refs[-1]
        wc_ref, bc_ref = refs[-3], refs[-2]
        layer_refs = refs[:2 * L]

        r = pl.program_id(1)
        row0 = pl.multiple_of(r * th, th)               # abs row of tile start

        # Padded input window for this row tile: rows [row0-L, row0+th+L).
        x_tile = x_ref[0, pl.ds(row0, th + 2 * L), :, :].astype(jnp.float32)

        centers = [x_tile[L:L + th, 1:w + 1, :]]        # abs rows [row0, row0+th)
        prev = x_tile
        c_prev = cin
        for i in range(1, L + 1):
            rows_out = th + 2 * (L - i)
            w3 = layer_refs[2 * (i - 1)][...]
            bias = layer_refs[2 * (i - 1) + 1][...]
            y = _conv3x3(prev, w3, bias, rows_out, c_prev)
            if i < L:
                # Zero rows outside the image so they act as the next conv's
                # zero padding, then re-pad the W halo columns.
                a0 = row0 - (L - i)                     # abs row of y's row 0
                ids = jax.lax.broadcasted_iota(jnp.int32, y.shape, 0)
                y = jnp.where((ids >= -a0) & (ids < h - a0), y, 0.0)
                zc = jnp.zeros((rows_out, 1, stage_ch), jnp.float32)
                prev = jnp.concatenate([zc, y, zc], axis=1)
            centers.append(y[(L - i):(L - i) + th, :, :])
            c_prev = stage_ch

        # Channel concat (in VMEM) + 1x1 conv + fused BN + ReLU (+ identity).
        m = th * w
        cat = jnp.concatenate(
            [centers[0].reshape(m, cin)]
            + [c.reshape(m, stage_ch) for c in centers[1:]], axis=-1)
        yc = jnp.dot(cat, wc_ref[...], preferred_element_type=jnp.float32)
        yc = jnp.maximum(yc + bc_ref[...], 0.0)
        if identity:
            yc = yc + centers[0].reshape(m, cin)
        out_ref[...] = yc.reshape(1, th, w, concat_ch).astype(out_ref.dtype)

    return kernel


def _pick_row_tile(h, target):
    t = max(1, min(h, target))
    while h % t:
        t -= 1
    return t


@functools.partial(jax.jit, static_argnames=("identity", "row_tile"))
def osa_module_forward(x, params, *, identity=False, row_tile=8):
    """Fused OSA block forward.  x: (N, H, W, in_ch), NHWC float32."""
    n, h, w, cin = x.shape
    layers = params["layers"]
    L = len(layers)
    stage_ch = layers[0]["w"].shape[-1]
    wc = params["concat"]["w"]
    c_total, concat_ch = wc.shape
    assert c_total == cin + L * stage_ch
    if identity and cin != concat_ch:
        raise ValueError("identity=True requires in_ch == concat_ch")

    th = _pick_row_tile(h, row_tile)
    n_row_tiles = h // th

    # Single zero-pad of the input (L halo rows, 1 halo column) for the whole
    # fused chain -- replaces the per-layer pad of the unfused version.
    x_pad = jnp.pad(x, ((0, 0), (L, L), (1, 1), (0, 0)))

    inputs = [x_pad]
    in_specs = [pl.BlockSpec((1, h + 2 * L, w + 2, cin),
                             lambda b, r: (b, 0, 0, 0))]
    # Fold BN scale into conv weights; reshape 3x3 weights so kx joins the
    # contraction: (3, 3, Ci, S) -> (3, 3*Ci, S).
    for lp in layers:
        wl = lp["w"] * lp["scale"]
        ci = wl.shape[2]
        wl = wl.reshape(3, 3 * ci, stage_ch)
        bl = lp["bias"].reshape(1, stage_ch)
        inputs += [wl, bl]
        in_specs += [
            pl.BlockSpec((3, 3 * ci, stage_ch), lambda b, r: (0, 0, 0)),
            pl.BlockSpec((1, stage_ch), lambda b, r: (0, 0)),
        ]
    wcf = wc * params["concat"]["scale"]
    bcf = params["concat"]["bias"].reshape(1, concat_ch)
    inputs += [wcf, bcf]
    in_specs += [
        pl.BlockSpec((c_total, concat_ch), lambda b, r: (0, 0)),
        pl.BlockSpec((1, concat_ch), lambda b, r: (0, 0)),
    ]

    kernel = _make_osa_kernel(n_layers=L, h=h, w=w, th=th, cin=cin,
                              stage_ch=stage_ch, concat_ch=concat_ch,
                              identity=identity)

    return pl.pallas_call(
        kernel,
        out_shape=jax.ShapeDtypeStruct((n, h, w, concat_ch), x.dtype),
        grid=(n, n_row_tiles),
        in_specs=in_specs,
        out_specs=pl.BlockSpec((1, th, w, concat_ch),
                               lambda b, r: (b, r, 0, 0)),
        compiler_params=pltpu.CompilerParams(
            dimension_semantics=("parallel", "parallel")),
    )(*inputs)


# ----------------------------------------------------------------------------
# Parameter construction (deterministic, synthetic)
# ----------------------------------------------------------------------------
def _fuse_bn(gamma, beta, mean, var):
    scale = gamma / jnp.sqrt(var + _BN_EPS)
    bias = beta - mean * scale
    return scale, bias


def make_osa_params(key, in_ch, stage_ch, concat_ch, layer_per_block):
    params = {"layers": []}
    for i in range(layer_per_block):
        cin = in_ch if i == 0 else stage_ch
        key, kw, kg, kb, km, kv = jax.random.split(key, 6)
        w = jax.random.normal(kw, (3, 3, cin, stage_ch), jnp.float32) * 0.1
        gamma = 1.0 + 0.1 * jax.random.normal(kg, (stage_ch,), jnp.float32)
        beta = 0.1 * jax.random.normal(kb, (stage_ch,), jnp.float32)
        mean = 0.05 * jax.random.normal(km, (stage_ch,), jnp.float32)
        var = jnp.abs(jax.random.normal(kv, (stage_ch,), jnp.float32)) + 0.5
        scale, bias = _fuse_bn(gamma, beta, mean, var)
        params["layers"].append({"w": w, "scale": scale, "bias": bias})

    c_total = in_ch + layer_per_block * stage_ch
    key, kw, kg, kb, km, kv = jax.random.split(key, 6)
    wc = jax.random.normal(kw, (c_total, concat_ch), jnp.float32) * 0.1
    gamma = 1.0 + 0.1 * jax.random.normal(kg, (concat_ch,), jnp.float32)
    beta = 0.1 * jax.random.normal(kb, (concat_ch,), jnp.float32)
    mean = 0.05 * jax.random.normal(km, (concat_ch,), jnp.float32)
    var = jnp.abs(jax.random.normal(kv, (concat_ch,), jnp.float32)) + 0.5
    scale, bias = _fuse_bn(gamma, beta, mean, var)
    params["concat"] = {"w": wc, "scale": scale, "bias": bias}
    return params


# ----------------------------------------------------------------------------
# Pure-JAX reference (for correctness check)
# ----------------------------------------------------------------------------
def _ref_forward(x, params, identity):
    def c3(x, w, s, b):
        y = jax.lax.conv_general_dilated(
            x, w, (1, 1), "SAME", dimension_numbers=("NHWC", "HWIO", "NHWC"))
        return jnp.maximum(y * s.reshape(1, 1, 1, -1) + b.reshape(1, 1, 1, -1), 0.0)

    identity_feat = x
    outs = [x]
    cur = x
    for lp in params["layers"]:
        cur = c3(cur, lp["w"], lp["scale"], lp["bias"])
        outs.append(cur)
    cat = jnp.concatenate(outs, axis=-1)
    cp = params["concat"]
    y = jnp.einsum("nhwc,cd->nhwd", cat, cp["w"])
    y = jnp.maximum(y * cp["scale"].reshape(1, 1, 1, -1)
                    + cp["bias"].reshape(1, 1, 1, -1), 0.0)
    if identity:
        y = y + identity_feat
    return y


if __name__ == "__main__":
    # Small OSA config: in_ch == concat_ch so identity=True is valid.
    N, H, W = 2, 16, 16
    in_ch, stage_ch, concat_ch, layer_per_block = 16, 8, 16, 3

    key = jax.random.PRNGKey(0)
    kx, kp = jax.random.split(key)
    x = jax.random.normal(kx, (N, H, W, in_ch), jnp.float32)
    params = make_osa_params(kp, in_ch, stage_ch, concat_ch, layer_per_block)

    for identity in (True, False):
        out = osa_module_forward(x, params, identity=identity)
        out = jax.block_until_ready(out)
        ref = _ref_forward(x, params, identity)
        assert out.shape == (N, H, W, concat_ch)
        err = float(jnp.max(jnp.abs(out - ref)))
        assert jnp.allclose(out, ref, atol=1e-4, rtol=1e-4), err

    print("KERNEL_OK")
</pallas_src>

<mosaic_0001>
module attributes {stable_mosaic.version = 11 : i64} {
  func.func @kernel(%arg0: i32, %arg1: i32, %arg2: memref<1x22x18x16xf32, #tpu.memory_space<vmem>>, %arg3: memref<3x48x8xf32, #tpu.memory_space<vmem>>, %arg4: memref<1x8xf32, #tpu.memory_space<vmem>>, %arg5: memref<3x24x8xf32, #tpu.memory_space<vmem>>, %arg6: memref<1x8xf32, #tpu.memory_space<vmem>>, %arg7: memref<3x24x8xf32, #tpu.memory_space<vmem>>, %arg8: memref<1x8xf32, #tpu.memory_space<vmem>>, %arg9: memref<40x16xf32, #tpu.memory_space<vmem>>, %arg10: memref<1x16xf32, #tpu.memory_space<vmem>>, %arg11: memref<1x8x16x16xf32, #tpu.memory_space<vmem>>) attributes {dimension_semantics = [#tpu.dimension_semantics<parallel>, #tpu.dimension_semantics<parallel>], iteration_bounds = array<i64: 2, 2>, scalar_prefetch = 0 : i64, scratch_operands = 0 : i64, tpu.core_type = #tpu.core_type<tc>, window_params = [{transform_indices = @transform_0, window_bounds = array<i64: 1, 22, 18, 16>}, {pipeline_mode = #tpu.pipeline_mode<synchronous>, transform_indices = @transform_1, window_bounds = array<i64: 3, 48, 8>}, {pipeline_mode = #tpu.pipeline_mode<synchronous>, transform_indices = @transform_2, window_bounds = array<i64: 1, 8>}, {pipeline_mode = #tpu.pipeline_mode<synchronous>, transform_indices = @transform_3, window_bounds = array<i64: 3, 24, 8>}, {pipeline_mode = #tpu.pipeline_mode<synchronous>, transform_indices = @transform_4, window_bounds = array<i64: 1, 8>}, {pipeline_mode = #tpu.pipeline_mode<synchronous>, transform_indices = @transform_5, window_bounds = array<i64: 3, 24, 8>}, {pipeline_mode = #tpu.pipeline_mode<synchronous>, transform_indices = @transform_6, window_bounds = array<i64: 1, 8>}, {pipeline_mode = #tpu.pipeline_mode<synchronous>, transform_indices = @transform_7, window_bounds = array<i64: 40, 16>}, {pipeline_mode = #tpu.pipeline_mode<synchronous>, transform_indices = @transform_8, window_bounds = array<i64: 1, 16>}, {transform_indices = @transform_9, window_bounds = array<i64: 1, 8, 16, 16>}]} {
    %c8_i32 = arith.constant 8 : i32
    %0 = arith.muli %arg1, %c8_i32 : i32
    %1 = tpu.assume_multiple %0, 8 : i32
    %c0 = arith.constant 0 : index
    %2 = arith.index_cast %1 : i32 to index
    %c0_0 = arith.constant 0 : index
    %c0_1 = arith.constant 0 : index
    %3 = vector.load %arg2[%c0, %2, %c0_0, %c0_1] : memref<1x22x18x16xf32, #tpu.memory_space<vmem>>, vector<1x14x18x16xf32>
    %4 = vector.shape_cast %3 : vector<1x14x18x16xf32> to vector<14x18x16xf32>
    %5 = vector.extract_strided_slice %4 {offsets = [3, 1, 0], sizes = [8, 16, 16], strides = [1, 1, 1]} : vector<14x18x16xf32> to vector<8x16x16xf32>
    %c0_2 = arith.constant 0 : index
    %c0_3 = arith.constant 0 : index
    %c0_4 = arith.constant 0 : index
    %6 = vector.load %arg3[%c0_2, %c0_3, %c0_4] : memref<3x48x8xf32, #tpu.memory_space<vmem>>, vector<3x48x8xf32>
    %c0_5 = arith.constant 0 : index
    %c0_6 = arith.constant 0 : index
    %7 = vector.load %arg4[%c0_5, %c0_6] : memref<1x8xf32, #tpu.memory_space<vmem>>, vector<1x8xf32>
    %8 = vector.extract_strided_slice %4 {offsets = [0, 0, 0], sizes = [14, 16, 16], strides = [1, 1, 1]} : vector<14x18x16xf32> to vector<14x16x16xf32>
    %9 = vector.extract_strided_slice %4 {offsets = [0, 1, 0], sizes = [14, 16, 16], strides = [1, 1, 1]} : vector<14x18x16xf32> to vector<14x16x16xf32>
    %10 = vector.extract_strided_slice %4 {offsets = [0, 2, 0], sizes = [14, 16, 16], strides = [1, 1, 1]} : vector<14x18x16xf32> to vector<14x16x16xf32>
    %11 = tpu.concatenate %8, %9, %10 in 2 : vector<14x16x16xf32>, vector<14x16x16xf32>, vector<14x16x16xf32> -> vector<14x16x48xf32>
    %cst = arith.constant 0.000000e+00 : f32
    %12 = vector.broadcast %cst : f32 to vector<192x8xf32>
    %13 = vector.extract_strided_slice %11 {offsets = [0, 0, 0], sizes = [12, 16, 48], strides = [1, 1, 1]} : vector<14x16x48xf32> to vector<12x16x48xf32>
    %14 = vector.shape_cast %13 : vector<12x16x48xf32> to vector<192x48xf32>
    %15 = vector.extract_strided_slice %6 {offsets = [0, 0, 0], sizes = [1, 48, 8], strides = [1, 1, 1]} : vector<3x48x8xf32> to vector<1x48x8xf32>
    %16 = vector.shape_cast %15 : vector<1x48x8xf32> to vector<48x8xf32>
    %cst_7 = arith.constant dense<0.000000e+00> : vector<192x8xf32>
    %17 = tpu.matmul %14, %16, %cst_7 {dimension_numbers = #tpu.dot_dimension_numbers<[1], [0], [0], [1], [0, 0, 1, 1], [], []>} : vector<192x48xf32>, vector<48x8xf32>, vector<192x8xf32> -> vector<192x8xf32>
    %18 = arith.addf %12, %17 : vector<192x8xf32>
    %19 = vector.extract_strided_slice %11 {offsets = [1, 0, 0], sizes = [12, 16, 48], strides = [1, 1, 1]} : vector<14x16x48xf32> to vector<12x16x48xf32>
    %20 = vector.shape_cast %19 : vector<12x16x48xf32> to vector<192x48xf32>
    %21 = vector.extract_strided_slice %6 {offsets = [1, 0, 0], sizes = [1, 48, 8], strides = [1, 1, 1]} : vector<3x48x8xf32> to vector<1x48x8xf32>
    %22 = vector.shape_cast %21 : vector<1x48x8xf32> to vector<48x8xf32>
    %cst_8 = arith.constant dense<0.000000e+00> : vector<192x8xf32>
    %23 = tpu.matmul %20, %22, %cst_8 {dimension_numbers = #tpu.dot_dimension_numbers<[1], [0], [0], [1], [0, 0, 1, 1], [], []>} : vector<192x48xf32>, vector<48x8xf32>, vector<192x8xf32> -> vector<192x8xf32>
    %24 = arith.addf %18, %23 : vector<192x8xf32>
    %25 = vector.extract_strided_slice %11 {offsets = [2, 0, 0], sizes = [12, 16, 48], strides = [1, 1, 1]} : vector<14x16x48xf32> to vector<12x16x48xf32>
    %26 = vector.shape_cast %25 : vector<12x16x48xf32> to vector<192x48xf32>
    %27 = vector.extract_strided_slice %6 {offsets = [2, 0, 0], sizes = [1, 48, 8], strides = [1, 1, 1]} : vector<3x48x8xf32> to vector<1x48x8xf32>
    %28 = vector.shape_cast %27 : vector<1x48x8xf32> to vector<48x8xf32>
    %cst_9 = arith.constant dense<0.000000e+00> : vector<192x8xf32>
    %29 = tpu.matmul %26, %28, %cst_9 {dimension_numbers = #tpu.dot_dimension_numbers<[1], [0], [0], [1], [0, 0, 1, 1], [], []>} : vector<192x48xf32>, vector<48x8xf32>, vector<192x8xf32> -> vector<192x8xf32>
    %30 = arith.addf %24, %29 : vector<192x8xf32>
    %31 = vector.broadcast %7 : vector<1x8xf32> to vector<192x8xf32>
    %32 = arith.addf %30, %31 : vector<192x8xf32>
    %cst_10 = arith.constant 0.000000e+00 : f32
    %33 = vector.broadcast %cst_10 : f32 to vector<192x8xf32>
    %34 = arith.maximumf %32, %33 : vector<192x8xf32>
    %35 = vector.shape_cast %34 : vector<192x8xf32> to vector<12x16x8xf32>
    %c2_i32 = arith.constant 2 : i32
    %36 = arith.subi %1, %c2_i32 : i32
    %37 = tpu.iota {dimensions = array<i32: 0>} : vector<12x16x8xi32>
    %c0_i32 = arith.constant 0 : i32
    %38 = arith.subi %c0_i32, %36 : i32
    %39 = vector.broadcast %38 : i32 to vector<12x16x8xi32>
    %40 = arith.cmpi sge, %37, %39 : vector<12x16x8xi32>
    %c16_i32 = arith.constant 16 : i32
    %41 = arith.subi %c16_i32, %36 : i32
    %42 = vector.broadcast %41 : i32 to vector<12x16x8xi32>
    %43 = arith.cmpi slt, %37, %42 : vector<12x16x8xi32>
    %44 = arith.andi %40, %43 : vector<12x16x8xi1>
    %cst_11 = arith.constant 0.000000e+00 : f32
    %45 = vector.broadcast %cst_11 : f32 to vector<12x16x8xf32>
    %46 = arith.select %44, %35, %45 : vector<12x16x8xi1>, vector<12x16x8xf32>
    %cst_12 = arith.constant 0.000000e+00 : f32
    %47 = vector.broadcast %cst_12 : f32 to vector<12x1x8xf32>
    %48 = tpu.concatenate %47, %46, %47 in 1 : vector<12x1x8xf32>, vector<12x16x8xf32>, vector<12x1x8xf32> -> vector<12x18x8xf32>
    %49 = vector.extract_strided_slice %46 {offsets = [2, 0, 0], sizes = [8, 16, 8], strides = [1, 1, 1]} : vector<12x16x8xf32> to vector<8x16x8xf32>
    %c0_13 = arith.constant 0 : index
    %c0_14 = arith.constant 0 : index
    %c0_15 = arith.constant 0 : index
    %50 = vector.load %arg5[%c0_13, %c0_14, %c0_15] : memref<3x24x8xf32, #tpu.memory_space<vmem>>, vector<3x24x8xf32>
    %c0_16 = arith.constant 0 : index
    %c0_17 = arith.constant 0 : index
    %51 = vector.load %arg6[%c0_16, %c0_17] : memref<1x8xf32, #tpu.memory_space<vmem>>, vector<1x8xf32>
    %52 = vector.extract_strided_slice %48 {offsets = [0, 0, 0], sizes = [12, 16, 8], strides = [1, 1, 1]} : vector<12x18x8xf32> to vector<12x16x8xf32>
    %53 = vector.extract_strided_slice %48 {offsets = [0, 1, 0], sizes = [12, 16, 8], strides = [1, 1, 1]} : vector<12x18x8xf32> to vector<12x16x8xf32>
    %54 = vector.extract_strided_slice %48 {offsets = [0, 2, 0], sizes = [12, 16, 8], strides = [1, 1, 1]} : vector<12x18x8xf32> to vector<12x16x8xf32>
    %55 = tpu.concatenate %52, %53, %54 in 2 : vector<12x16x8xf32>, vector<12x16x8xf32>, vector<12x16x8xf32> -> vector<12x16x24xf32>
    %cst_18 = arith.constant 0.000000e+00 : f32
    %56 = vector.broadcast %cst_18 : f32 to vector<160x8xf32>
    %57 = vector.extract_strided_slice %55 {offsets = [0, 0, 0], sizes = [10, 16, 24], strides = [1, 1, 1]} : vector<12x16x24xf32> to vector<10x16x24xf32>
    %58 = vector.shape_cast %57 : vector<10x16x24xf32> to vector<160x24xf32>
    %59 = vector.extract_strided_slice %50 {offsets = [0, 0, 0], sizes = [1, 24, 8], strides = [1, 1, 1]} : vector<3x24x8xf32> to vector<1x24x8xf32>
    %60 = vector.shape_cast %59 : vector<1x24x8xf32> to vector<24x8xf32>
    %cst_19 = arith.constant dense<0.000000e+00> : vector<160x8xf32>
    %61 = tpu.matmul %58, %60, %cst_19 {dimension_numbers = #tpu.dot_dimension_numbers<[1], [0], [0], [1], [0, 0, 1, 1], [], []>} : vector<160x24xf32>, vector<24x8xf32>, vector<160x8xf32> -> vector<160x8xf32>
    %62 = arith.addf %56, %61 : vector<160x8xf32>
    %63 = vector.extract_strided_slice %55 {offsets = [1, 0, 0], sizes = [10, 16, 24], strides = [1, 1, 1]} : vector<12x16x24xf32> to vector<10x16x24xf32>
    %64 = vector.shape_cast %63 : vector<10x16x24xf32> to vector<160x24xf32>
    %65 = vector.extract_strided_slice %50 {offsets = [1, 0, 0], sizes = [1, 24, 8], strides = [1, 1, 1]} : vector<3x24x8xf32> to vector<1x24x8xf32>
    %66 = vector.shape_cast %65 : vector<1x24x8xf32> to vector<24x8xf32>
    %cst_20 = arith.constant dense<0.000000e+00> : vector<160x8xf32>
    %67 = tpu.matmul %64, %66, %cst_20 {dimension_numbers = #tpu.dot_dimension_numbers<[1], [0], [0], [1], [0, 0, 1, 1], [], []>} : vector<160x24xf32>, vector<24x8xf32>, vector<160x8xf32> -> vector<160x8xf32>
    %68 = arith.addf %62, %67 : vector<160x8xf32>
    %69 = vector.extract_strided_slice %55 {offsets = [2, 0, 0], sizes = [10, 16, 24], strides = [1, 1, 1]} : vector<12x16x24xf32> to vector<10x16x24xf32>
    %70 = vector.shape_cast %69 : vector<10x16x24xf32> to vector<160x24xf32>
    %71 = vector.extract_strided_slice %50 {offsets = [2, 0, 0], sizes = [1, 24, 8], strides = [1, 1, 1]} : vector<3x24x8xf32> to vector<1x24x8xf32>
    %72 = vector.shape_cast %71 : vector<1x24x8xf32> to vector<24x8xf32>
    %cst_21 = arith.constant dense<0.000000e+00> : vector<160x8xf32>
    %73 = tpu.matmul %70, %72, %cst_21 {dimension_numbers = #tpu.dot_dimension_numbers<[1], [0], [0], [1], [0, 0, 1, 1], [], []>} : vector<160x24xf32>, vector<24x8xf32>, vector<160x8xf32> -> vector<160x8xf32>
    %74 = arith.addf %68, %73 : vector<160x8xf32>
    %75 = vector.broadcast %51 : vector<1x8xf32> to vector<160x8xf32>
    %76 = arith.addf %74, %75 : vector<160x8xf32>
    %cst_22 = arith.constant 0.000000e+00 : f32
    %77 = vector.broadcast %cst_22 : f32 to vector<160x8xf32>
    %78 = arith.maximumf %76, %77 : vector<160x8xf32>
    %79 = vector.shape_cast %78 : vector<160x8xf32> to vector<10x16x8xf32>
    %c1_i32 = arith.constant 1 : i32
    %80 = arith.subi %1, %c1_i32 : i32
    %81 = tpu.iota {dimensions = array<i32: 0>} : vector<10x16x8xi32>
    %c0_i32_23 = arith.constant 0 : i32
    %82 = arith.subi %c0_i32_23, %80 : i32
    %83 = vector.broadcast %82 : i32 to vector<10x16x8xi32>
    %84 = arith.cmpi sge, %81, %83 : vector<10x16x8xi32>
    %c16_i32_24 = arith.constant 16 : i32
    %85 = arith.subi %c16_i32_24, %80 : i32
    %86 = vector.broadcast %85 : i32 to vector<10x16x8xi32>
    %87 = arith.cmpi slt, %81, %86 : vector<10x16x8xi32>
    %88 = arith.andi %84, %87 : vector<10x16x8xi1>
    %cst_25 = arith.constant 0.000000e+00 : f32
    %89 = vector.broadcast %cst_25 : f32 to vector<10x16x8xf32>
    %90 = arith.select %88, %79, %89 : vector<10x16x8xi1>, vector<10x16x8xf32>
    %cst_26 = arith.constant 0.000000e+00 : f32
    %91 = vector.broadcast %cst_26 : f32 to vector<10x1x8xf32>
    %92 = tpu.concatenate %91, %90, %91 in 1 : vector<10x1x8xf32>, vector<10x16x8xf32>, vector<10x1x8xf32> -> vector<10x18x8xf32>
    %93 = vector.extract_strided_slice %90 {offsets = [1, 0, 0], sizes = [8, 16, 8], strides = [1, 1, 1]} : vector<10x16x8xf32> to vector<8x16x8xf32>
    %c0_27 = arith.constant 0 : index
    %c0_28 = arith.constant 0 : index
    %c0_29 = arith.constant 0 : index
    %94 = vector.load %arg7[%c0_27, %c0_28, %c0_29] : memref<3x24x8xf32, #tpu.memory_space<vmem>>, vector<3x24x8xf32>
    %c0_30 = arith.constant 0 : index
    %c0_31 = arith.constant 0 : index
    %95 = vector.load %arg8[%c0_30, %c0_31] : memref<1x8xf32, #tpu.memory_space<vmem>>, vector<1x8xf32>
    %96 = vector.extract_strided_slice %92 {offsets = [0, 0, 0], sizes = [10, 16, 8], strides = [1, 1, 1]} : vector<10x18x8xf32> to vector<10x16x8xf32>
    %97 = vector.extract_strided_slice %92 {offsets = [0, 1, 0], sizes = [10, 16, 8], strides = [1, 1, 1]} : vector<10x18x8xf32> to vector<10x16x8xf32>
    %98 = vector.extract_strided_slice %92 {offsets = [0, 2, 0], sizes = [10, 16, 8], strides = [1, 1, 1]} : vector<10x18x8xf32> to vector<10x16x8xf32>
    %99 = tpu.concatenate %96, %97, %98 in 2 : vector<10x16x8xf32>, vector<10x16x8xf32>, vector<10x16x8xf32> -> vector<10x16x24xf32>
    %cst_32 = arith.constant 0.000000e+00 : f32
    %100 = vector.broadcast %cst_32 : f32 to vector<128x8xf32>
    %101 = vector.extract_strided_slice %99 {offsets = [0, 0, 0], sizes = [8, 16, 24], strides = [1, 1, 1]} : vector<10x16x24xf32> to vector<8x16x24xf32>
    %102 = vector.shape_cast %101 : vector<8x16x24xf32> to vector<128x24xf32>
    %103 = vector.extract_strided_slice %94 {offsets = [0, 0, 0], sizes = [1, 24, 8], strides = [1, 1, 1]} : vector<3x24x8xf32> to vector<1x24x8xf32>
    %104 = vector.shape_cast %103 : vector<1x24x8xf32> to vector<24x8xf32>
    %cst_33 = arith.constant dense<0.000000e+00> : vector<128x8xf32>
    %105 = tpu.matmul %102, %104, %cst_33 {dimension_numbers = #tpu.dot_dimension_numbers<[1], [0], [0], [1], [0, 0, 1, 1], [], []>} : vector<128x24xf32>, vector<24x8xf32>, vector<128x8xf32> -> vector<128x8xf32>
    %106 = arith.addf %100, %105 : vector<128x8xf32>
    %107 = vector.extract_strided_slice %99 {offsets = [1, 0, 0], sizes = [8, 16, 24], strides = [1, 1, 1]} : vector<10x16x24xf32> to vector<8x16x24xf32>
    %108 = vector.shape_cast %107 : vector<8x16x24xf32> to vector<128x24xf32>
    %109 = vector.extract_strided_slice %94 {offsets = [1, 0, 0], sizes = [1, 24, 8], strides = [1, 1, 1]} : vector<3x24x8xf32> to vector<1x24x8xf32>
    %110 = vector.shape_cast %109 : vector<1x24x8xf32> to vector<24x8xf32>
    %cst_34 = arith.constant dense<0.000000e+00> : vector<128x8xf32>
    %111 = tpu.matmul %108, %110, %cst_34 {dimension_numbers = #tpu.dot_dimension_numbers<[1], [0], [0], [1], [0, 0, 1, 1], [], []>} : vector<128x24xf32>, vector<24x8xf32>, vector<128x8xf32> -> vector<128x8xf32>
    %112 = arith.addf %106, %111 : vector<128x8xf32>
    %113 = vector.extract_strided_slice %99 {offsets = [2, 0, 0], sizes = [8, 16, 24], strides = [1, 1, 1]} : vector<10x16x24xf32> to vector<8x16x24xf32>
    %114 = vector.shape_cast %113 : vector<8x16x24xf32> to vector<128x24xf32>
    %115 = vector.extract_strided_slice %94 {offsets = [2, 0, 0], sizes = [1, 24, 8], strides = [1, 1, 1]} : vector<3x24x8xf32> to vector<1x24x8xf32>
    %116 = vector.shape_cast %115 : vector<1x24x8xf32> to vector<24x8xf32>
    %cst_35 = arith.constant dense<0.000000e+00> : vector<128x8xf32>
    %117 = tpu.matmul %114, %116, %cst_35 {dimension_numbers = #tpu.dot_dimension_numbers<[1], [0], [0], [1], [0, 0, 1, 1], [], []>} : vector<128x24xf32>, vector<24x8xf32>, vector<128x8xf32> -> vector<128x8xf32>
    %118 = arith.addf %112, %117 : vector<128x8xf32>
    %119 = vector.broadcast %95 : vector<1x8xf32> to vector<128x8xf32>
    %120 = arith.addf %118, %119 : vector<128x8xf32>
    %cst_36 = arith.constant 0.000000e+00 : f32
    %121 = vector.broadcast %cst_36 : f32 to vector<128x8xf32>
    %122 = arith.maximumf %120, %121 : vector<128x8xf32>
    %123 = vector.shape_cast %122 : vector<128x8xf32> to vector<8x16x8xf32>
    %124 = vector.shape_cast %5 : vector<8x16x16xf32> to vector<128x16xf32>
    %125 = vector.shape_cast %49 : vector<8x16x8xf32> to vector<128x8xf32>
    %126 = vector.shape_cast %93 : vector<8x16x8xf32> to vector<128x8xf32>
    %127 = vector.shape_cast %123 : vector<8x16x8xf32> to vector<128x8xf32>
    %128 = tpu.concatenate %124, %125, %126, %127 in 1 : vector<128x16xf32>, vector<128x8xf32>, vector<128x8xf32>, vector<128x8xf32> -> vector<128x40xf32>
    %c0_37 = arith.constant 0 : index
    %c0_38 = arith.constant 0 : index
    %129 = vector.load %arg9[%c0_37, %c0_38] : memref<40x16xf32, #tpu.memory_space<vmem>>, vector<40x16xf32>
    %cst_39 = arith.constant dense<0.000000e+00> : vector<128x16xf32>
    %130 = tpu.matmul %128, %129, %cst_39 {dimension_numbers = #tpu.dot_dimension_numbers<[1], [0], [0], [1], [0, 0, 1, 1], [], []>} : vector<128x40xf32>, vector<40x16xf32>, vector<128x16xf32> -> vector<128x16xf32>
    %c0_40 = arith.constant 0 : index
    %c0_41 = arith.constant 0 : index
    %131 = vector.load %arg10[%c0_40, %c0_41] : memref<1x16xf32, #tpu.memory_space<vmem>>, vector<1x16xf32>
    %132 = vector.broadcast %131 : vector<1x16xf32> to vector<128x16xf32>
    %133 = arith.addf %130, %132 : vector<128x16xf32>
    %cst_42 = arith.constant 0.000000e+00 : f32
    %134 = vector.broadcast %cst_42 : f32 to vector<128x16xf32>
    %135 = arith.maximumf %133, %134 : vector<128x16xf32>
    %136 = vector.shape_cast %5 : vector<8x16x16xf32> to vector<128x16xf32>
    %137 = arith.addf %135, %136 : vector<128x16xf32>
    %138 = vector.shape_cast %137 : vector<128x16xf32> to vector<1x8x16x16xf32>
    %c0_43 = arith.constant 0 : index
    %c0_44 = arith.constant 0 : index
    %c0_45 = arith.constant 0 : index
    %c0_46 = arith.constant 0 : index
    %139 = vector.load %arg11[%c0_43, %c0_44, %c0_45, %c0_46] : memref<1x8x16x16xf32, #tpu.memory_space<vmem>>, vector<1x8x16x16xf32>
    tpu.vector_store %arg11[%c0_43, %c0_44, %c0_45, %c0_46], %138 {strides = array<i32>} : memref<1x8x16x16xf32, #tpu.memory_space<vmem>>, vector<1x8x16x16xf32>,
    return
  }
  func.func @transform_0(%arg0: i32, %arg1: i32) -> (i32, i32, i32, i32) {
    %c0_i32 = arith.constant 0 : i32
    %c0_i32_0 = arith.constant 0 : i32
    %c0_i32_1 = arith.constant 0 : i32
    %c0_i32_2 = arith.constant 0 : i32
    return %arg0, %c0_i32, %c0_i32_0, %c0_i32_1 : i32, i32, i32, i32
  }
  func.func @transform_1(%arg0: i32, %arg1: i32) -> (i32, i32, i32) {
    %c0_i32 = arith.constant 0 : i32
    %c0_i32_0 = arith.constant 0 : i32
    %c0_i32_1 = arith.constant 0 : i32
    %c0_i32_2 = arith.constant 0 : i32
    return %c0_i32, %c0_i32_0, %c0_i32_1 : i32, i32, i32
  }
  func.func @transform_2(%arg0: i32, %arg1: i32) -> (i32, i32) {
    %c0_i32 = arith.constant 0 : i32
    %c0_i32_0 = arith.constant 0 : i32
    %c0_i32_1 = arith.constant 0 : i32
    return %c0_i32, %c0_i32_0 : i32, i32
  }
  func.func @transform_3(%arg0: i32, %arg1: i32) -> (i32, i32, i32) {
    %c0_i32 = arith.constant 0 : i32
    %c0_i32_0 = arith.constant 0 : i32
    %c0_i32_1 = arith.constant 0 : i32
    %c0_i32_2 = arith.constant 0 : i32
    return %c0_i32, %c0_i32_0, %c0_i32_1 : i32, i32, i32
  }
  func.func @transform_4(%arg0: i32, %arg1: i32) -> (i32, i32) {
    %c0_i32 = arith.constant 0 : i32
    %c0_i32_0 = arith.constant 0 : i32
    %c0_i32_1 = arith.constant 0 : i32
    return %c0_i32, %c0_i32_0 : i32, i32
  }
  func.func @transform_5(%arg0: i32, %arg1: i32) -> (i32, i32, i32) {
    %c0_i32 = arith.constant 0 : i32
    %c0_i32_0 = arith.constant 0 : i32
    %c0_i32_1 = arith.constant 0 : i32
    %c0_i32_2 = arith.constant 0 : i32
    return %c0_i32, %c0_i32_0, %c0_i32_1 : i32, i32, i32
  }
  func.func @transform_6(%arg0: i32, %arg1: i32) -> (i32, i32) {
    %c0_i32 = arith.constant 0 : i32
    %c0_i32_0 = arith.constant 0 : i32
    %c0_i32_1 = arith.constant 0 : i32
    return %c0_i32, %c0_i32_0 : i32, i32
  }
  func.func @transform_7(%arg0: i32, %arg1: i32) -> (i32, i32) {
    %c0_i32 = arith.constant 0 : i32
    %c0_i32_0 = arith.constant 0 : i32
    %c0_i32_1 = arith.constant 0 : i32
    return %c0_i32, %c0_i32_0 : i32, i32
  }
  func.func @transform_8(%arg0: i32, %arg1: i32) -> (i32, i32) {
    %c0_i32 = arith.constant 0 : i32
    %c0_i32_0 = arith.constant 0 : i32
    %c0_i32_1 = arith.constant 0 : i32
    return %c0_i32, %c0_i32_0 : i32, i32
  }
  func.func @transform_9(%arg0: i32, %arg1: i32) -> (i32, i32, i32, i32) {
    %c0_i32 = arith.constant 0 : i32
    %c0_i32_0 = arith.constant 0 : i32
    %c0_i32_1 = arith.constant 0 : i32
    return %arg0, %arg1, %c0_i32, %c0_i32_0 : i32, i32, i32, i32
  }
}

</mosaic_0001>

<bundles_post_ra>
// kernel: osa_module_forward.1
= control target key start
LH: loop header
LB: loop body
LE: loop exit
PB: predicated region body
PF: predicated region fallthrough
CT: control target
= control target key end

     0   :  { %14 = vsyncpa [#allocation3], 0  ;;  %s6126_s0 = inlined_call_operand.vmem [shape: f32[2,22,18,16], index: 0, kind: input, shape index: {}]   ;;  %s6127_s1 = inlined_call_operand.vmem [shape: f32[3,48,8], index: 1, kind: input, shape index: {}]   ;;  %s6128_s2 = inlined_call_operand.vmem [shape: f32[1,8], index: 2, kind: input, shape index: {}]   ;;  %s6129_s3 = inlined_call_operand.vmem [shape: f32[3,24,8], index: 3, kind: input, shape index: {}]   ;;  %s6130_s4 = inlined_call_operand.vmem [shape: f32[1,8], index: 4, kind: input, shape index: {}]   ;;  %s6131_s5 = inlined_call_operand.vmem [shape: f32[3,24,8], index: 5, kind: input, shape index: {}]   ;;  %s6132_s6 = inlined_call_operand.vmem [shape: f32[1,8], index: 6, kind: input, shape index: {}]   ;;  %s6133_s7 = inlined_call_operand.vmem [shape: f32[40,16], index: 7, kind: input, shape index: {}]   ;;  %s6134_s8 = inlined_call_operand.vmem [shape: f32[1,16], index: 8, kind: input, shape index: {}]   ;;  %s6135_s9 = inlined_call_operand.hbm [shape: f32[2,16,16,16], index: 9, kind: output, shape index: {}]  }
   0x1   :  { %16 = vsyncpa [#allocation3 + $0x1], 0  ;;  %s3846_s30 = smov 0   ;;  %s3848_s10 = smov 0  }
   0x2   :  { %s3850_s11 = smov 0   ;;  %s3852_s12 = smov 0  }
   0x3   :  { %s3854_s13 = smov 0   ;;  %s3856_s14 = smov 0  }
   0x4   :  { %s3858_s15 = smov 0   ;;  %s3860_s16 = smov 0  }
   0x5 LB: > { %6179 = sst [smem:[#allocation5_spill]] %s3781_s14  ;;  %s3388_s17 = sadd.s32 4294967295, %s3789_s16   ;;  %s3789_s16 = sphi %s3860_s16, %s22_s16   ;;  %s3785_s15 = sphi %s3858_s15, %s6268_s15   ;;  %s3781_s14 = sphi %s3856_s14, %s6263_s14   ;;  %s3777_s13 = sphi %s3854_s13, %s6267_s13   ;;  %s3773_s12 = sphi %s3852_s12, %s6262_s12   ;;  %s3769_s11 = sphi %s3850_s11, %s6266_s11   ;;  %s3765_s10 = sphi %s3848_s10, %s6265_s10   ;;  %s3761_s30 = sphi %s3846_s30, %s6264_s30  }
   0x6   : > { %s3389_s18 = sadd.s32 4294967294, %s3789_s16   ;;  %s31_s19 = sadd.s32 1, %s3781_s14 }
   0x7   : > { %p32_p0 = scmp.ge.s32.totalorder %s31_s19, 2  ;;  %s34_s20 = sadd.s32 1, %s3785_s15 }
   0x8   : > { %p247_p1 = scmp.ne.s32.totalorder %s3769_s11, %s3765_s10  ;;  %p248_p2 = scmp.eq.s32.totalorder %s3388_s17, 3 }
   0x9   : > { %s6270_s19 = smov (%p32_p0, %s31_s19), 0  ;;  %s6272_s20 = smov (!%p32_p0, %s34_s20), %s3785_s15 }
   0xa   : > { %6180 = sst [smem:[#allocation6_spill]] %s6270_s19  ;;  %s233_s21 = ssub.s32 %s3781_s14, %s6270_s19 }
   0xb   : > { %p3897_p3 = por %p248_p2, %p247_p1  ;;  %p36_p4 = scmp.ge.s32.totalorder %s6272_s20, 2 }
   0xc   : > { %p253_p5 = scmp.ne.s32.totalorder %s3765_s10, %s3761_s30  ;;  %p254_p6 = scmp.eq.s32.totalorder %s3389_s18, 3 }
   0xd   : > { %p3392_p7 = scmp.ge.s32.totalorder %s3789_s16, 1  ;;  %s6274_s20 = smov (%p36_p4, %s6272_s20), 0 }
   0xe   : > { %p3906_p8 = por %p254_p6, %p253_p5  ;;  %p304_p9 = scmp.lt.s32.totalorder %s3789_s16, 5 }
   0xf   : > { %s232_s24 = ssub.s32 %s3785_s15, %s6274_s20  ;;  %s237_s25 = sadd.s32 1, %s3769_s11 }
  0x10   : > { %s6182_s23 = scalar_select %p3906_p8, 1, 0 }
  0x11   : > { %s234_s26 = sor.u32 %s233_s21, %s232_s24  ;;  %p305_p10 = pnand %p3392_p7, %p304_p9 }
  0x12   : > { %6183 = sst [smem:[#allocation7_spill]] %s6182_s23  ;;  %p235_p11 = scmp.eq.s32.totalorder %s234_s26, 0 }
  0x13   : > { %308 = sbr.rel (%p305_p10) target bundleno = 1490 (0x5d2), region = 56 }
  0x14   : > { %s3915_s27 = scalar_select %p235_p11, %s3769_s11, %s237_s25  }
  0x18   : > { %p340_p12 = scmp.lt.s32.totalorder %s3777_s13, 1  ;;  %s3396_s29 = smul.u32 192, %s3773_s12  ;;  %vm452_vm0 = vcmask 1046528   ;;  %vm607_vm1 = vcmask 1045504   ;;  %vm762_vm2 = vcmask 130048   ;;  %vm791_vm3 = vcmask 261120  }
  0x19   : > { %s3792_s19 = smov 32   ;;  %vm820_vm4 = vcmask 392192   ;;  %vm1335_vm8 = vcmask 1040384   ;;  %s3793_s24 = smov 8  }
  0x1a   : > { %s341_s28 = scalar_select %p340_p12, %s3777_s13, 1 }
  0x1b   : > { %s3600_s18 = sshll.u32 %s3773_s12, 4 }
  0x1c   : > { %s3613_s17 = smul.u32 528, %s341_s28  ;;  %s4535_s28 = sshll.u32 %s3773_s12, 3 }
  0x1d   : > { %s2146_s21 = ssub.s32 1, %s4535_s28  ;;  %s2158_s25 = ssub.s32 17, %s4535_s28 }
  0x1e   : > { %s344_s14 = scalar_lea.vmem %s6126_s0, %s3613_s17  ;;  %s1261_s17 = ssub.s32 18, %s4535_s28 }
  0x1f   : > { %s3923_s23 = scalar_lea.vmem %s344_s14, %s3396_s29  ;;  %s3791_s14 = smov 16  }
  0x20   : > { %v3926_v0 = vld [vmem:[%s3923_s23 + $0xd8] sm:$0xff]  ;;  %v3929_v1 = vld [vmem:[%s3923_s23 + $0xe0] sm:$0xff]  ;;  %v3932_v2 = vld [vmem:[%s3923_s23 + $0xc8] sm:$0xff]  ;;  %s1247_s29 = ssub.s32 2, %s4535_s28 }
  0x21   : > { %v498_v3 = vrot.slane %v3926_v0, 1  ;;  %v499_v4 = vrot.slane %v3929_v1, 1  ;;  %v375_v5 = vld [vmem:[%s3923_s23 + $0xd0] sm:$0x3]  ;;  %v494_v6 = vrot.slane %v3932_v2, 1  ;;  %v653_v11 = vrot.slane %v3926_v0, 2 }
  0x22   : > { %v496_v7 = vrot.slane %v375_v5, 1  ;;  %v378_v10 = vld [vmem:[%s3923_s23 + $0xe8] sm:$0x3]  ;;  %v654_v12 = vrot.slane %v3929_v1, 2  ;;  %v649_v13 = vrot.slane %v3932_v2, 2  ;;  %v651_v14 = vrot.slane %v375_v5, 2 }
  0x23   : > { %v3939_v8 = vsel %vm452_vm0, %v498_v3, %v499_v4  ;;  %v501_v15 = vrot.slane %v378_v10, 1  ;;  %v3964_v19 = vld [vmem:[%s3923_s23 + $0xf0] sm:$0xff]  ;;  %v3967_v20 = vld [vmem:[%s3923_s23 + $0xf8] sm:$0xff]  ;;  %v656_v21 = vrot.slane %v378_v10, 2  ;;  %v381_v28 = vld [vmem:[%s3923_s23 + $0x100] sm:$0x3] }
  0x24   : > { %6184 = vst [vmem:[#allocation8_spill] sm:$0xff] %v3939_v8  ;;  %559 = vrot.lane.b32.xlu1 %v3939_v8, %s3791_s14  ;;  %v3946_v9 = vsel %vm452_vm0, %v494_v6, %v496_v7  ;;  %v655_v17 = vsel %vm607_vm1, %v653_v11, %v654_v12  ;;  %v652_v18 = vsel %vm607_vm1, %v649_v13, %v651_v14  ;;  %v658_v22 = vrot.slane %v3964_v19, 2  ;;  %v3983_v30 = vld [vmem:[%s3923_s23 + $0x108] sm:$0xff]  ;;  %v3986_v31 = vld [vmem:[%s3923_s23 + $0x110] sm:$0xff]  ;;  %v384_v39 = vld [vmem:[%s3923_s23 + $0x118] sm:$0x3] }
  0x25   : > { %6185 = vst [vmem:[#allocation9_spill] sm:$0xff] %v3946_v9  ;;  %557 = vrot.lane.b32.xlu0 %v3946_v9, %s3791_s14  ;;  %v3955_v16 = vsel %vm452_vm0, %v499_v4, %v501_v15  ;;  %v659_v23 = vrot.slane %v3967_v20, 2  ;;  %v503_v24 = vrot.slane %v3964_v19, 1  ;;  %v504_v25 = vrot.slane %v3967_v20, 1  ;;  %v4008_v46 = vld [vmem:[%s3923_s23 + $0x30] sm:$0xff]  ;;  %v4011_v47 = vld [vmem:[%s3923_s23 + $0x38] sm:$0xff] }
  0x26   : > { %6186 = vst [vmem:[#allocation10_spill] sm:$0xff] %v3955_v16  ;;  %561 = vrot.lane.b32.xlu2 %v3955_v16, %s3791_s14  ;;  %v657_v26 = vsel %vm607_vm1, %v654_v12, %v656_v21  ;;  %v506_v32 = vrot.slane %v381_v28, 1  ;;  %v508_v33 = vrot.slane %v3983_v30, 1  ;;  %v509_v34 = vrot.slane %v3986_v31, 1  ;;  %v4016_v49 = vld [vmem:[%s3923_s23] sm:$0xff]  ;;  %v4019_v50 = vld [vmem:[%s3923_s23 + $0x8] sm:$0xff] }
  0x27   : > { %v660_v27 = vsel %vm607_vm1, %v658_v22, %v659_v23  ;;  %v3980_v29 = vsel %vm452_vm0, %v503_v24, %v504_v25  ;;  %v661_v35 = vrot.slane %v381_v28, 2  ;;  %v663_v40 = vrot.slane %v3983_v30, 2  ;;  %v4032_v59 = vld [vmem:[%s3923_s23 + $0x18] sm:$0xff]  ;;  %v4035_v60 = vld [vmem:[%s3923_s23 + $0x20] sm:$0xff]  ;;  %v351_v15 = vld [vmem:[%s3923_s23 + $0x10] sm:$0x3] }
  0x28   : > { %6187 = vst [vmem:[#allocation11_spill] sm:$0xff] %v3980_v29  ;;  %v3994_v36 = vsel %vm452_vm0, %v504_v25, %v506_v32  ;;  %v510_v37 = vsel %vm452_vm0, %v508_v33, %v509_v34  ;;  %v664_v41 = vrot.slane %v3986_v31, 2  ;;  %v666_v42 = vrot.slane %v384_v39, 2  ;;  %v357_v12 = vld [vmem:[%s3923_s23 + $0x40] sm:$0x3]  ;;  %v396_v28 = vld [vmem:[%s6127_s1 + $0x28] sm:$0xff] }
  0x29   : > { %6188 = vst [vmem:[#allocation12_spill] sm:$0xff] %v3994_v36  ;;  %v662_v38 = vsel %vm607_vm1, %v659_v23, %v661_v35  ;;  %v511_v43 = vrot.slane %v384_v39, 1  ;;  %v463_v51 = vrot.slane %v4008_v46, 1  ;;  %v464_v52 = vrot.slane %v4011_v47, 1  ;;  %v354_v24 = vld [vmem:[%s3923_s23 + $0x28] sm:$0x3]  ;;  %3601 = vmatpush.msra.mxu2 %v396_v28  ;;  %998 = vmatpush.msra.mxu1 %v396_v28 }
  0x2a   : > { %v665_v44 = vsel %vm607_vm1, %v663_v40, %v664_v41  ;;  %v667_v45 = vsel %vm607_vm1, %v664_v41, %v666_v42  ;;  %v453_v53 = vrot.slane %v4016_v49, 1  ;;  %v454_v54 = vrot.slane %v4019_v50, 1  ;;  %v4068_v35 = vld [vmem:[%s3923_s23 + $0x48] sm:$0xff]  ;;  %v4075_v40 = vld [vmem:[%s3923_s23 + $0x50] sm:$0xff] }
  0x2b   : > { %v512_v48 = vsel %vm452_vm0, %v509_v34, %v511_v43  ;;  %v618_v55 = vrot.slane %v4008_v46, 2  ;;  %v619_v56 = vrot.slane %v4011_v47, 2  ;;  %v465_v57 = vsel %vm452_vm0, %v463_v51, %v464_v52  ;;  %v408_v28 = vld [vmem:[%s6127_s1 + $0x88] sm:$0xff] }
  0x2c   : > { %714 = vrot.lane.b32.xlu1 %v655_v17, %s3792_s19  ;;  %v455_v58 = vsel %vm452_vm0, %v453_v53, %v454_v54  ;;  %v458_v62 = vrot.slane %v4032_v59, 1  ;;  %v459_v63 = vrot.slane %v4035_v60, 1  ;;  %v613_v3 = vrot.slane %v4032_v59, 2  ;;  %v4095_v53 = vld [vmem:[%s3923_s23 + $0x68] sm:$0xff] }
  0x2d   : > { %712 = vrot.lane.b32.xlu0 %v652_v18, %s3792_s19  ;;  %v620_v61 = vsel %vm607_vm1, %v618_v55, %v619_v56  ;;  %v614_v4 = vrot.slane %v4035_v60, 2  ;;  %v608_v5 = vrot.slane %v4016_v49, 2  ;;  %v609_v7 = vrot.slane %v4019_v50, 2 }
  0x2e   : > { %716 = vrot.lane.b32.xlu2 %v657_v26, %s3792_s19  ;;  %v460_v10 = vsel %vm452_vm0, %v458_v62, %v459_v63  ;;  %v466_v17 = vrot.slane %v357_v12, 1  ;;  %v456_v18 = vrot.slane %v351_v15, 1  ;;  %v621_v21 = vrot.slane %v357_v12, 2  ;;  %v395_v12 = vld [vmem:[%s6127_s1 + $0x20] sm:$0xff] }
  0x2f   : > { %v615_v11 = vsel %vm607_vm1, %v613_v3, %v614_v4  ;;  %v610_v14 = vsel %vm607_vm1, %v608_v5, %v609_v7  ;;  %v461_v26 = vrot.slane %v354_v24, 1  ;;  %v611_v32 = vrot.slane %v351_v15, 2  ;;  %v4111_v3 = vld [vmem:[%s3923_s23 + $0x78] sm:$0xff]  ;;  %v363_v5 = vld [vmem:[%s3923_s23 + $0x70] sm:$0x3]  ;;  %3602 = vmatpush.msra.mxu2 %v395_v12  ;;  %999 = vmatpush.msra.mxu1 %v395_v12 }
  0x30   : > { %v467_v22 = vsel %vm452_vm0, %v464_v52, %v466_v17  ;;  %v457_v23 = vsel %vm452_vm0, %v454_v54, %v456_v18  ;;  %v622_v25 = vsel %vm607_vm1, %v619_v56, %v621_v21  ;;  %v468_v39 = vrot.slane %v4068_v35, 1  ;;  %v4092_v52 = vld [vmem:[%s3923_s23 + $0x60] sm:$0xff]  ;;  %v393_v17 = vld [vmem:[%s6127_s1 + $0x10] sm:$0xff]  ;;  %v366_v21 = vld [vmem:[%s3923_s23 + $0x88] sm:$0x3] }
  0x31   : > { %v462_v33 = vsel %vm452_vm0, %v459_v63, %v461_v26  ;;  %v469_v41 = vrot.slane %v4075_v40, 1  ;;  %v623_v43 = vrot.slane %v4068_v35, 2  ;;  %v628_v55 = vrot.slane %v4092_v52, 2  ;;  %v391_v26 = vld [vmem:[%s6127_s1] sm:$0xff] }
  0x32   : > { %v629_v56 = vrot.slane %v4095_v53, 2 }
  0x34   : > { %718 = vrot.lane.b32.xlu1 %v660_v27, %s3792_s19  ;;  %v616_v27 = vrot.slane %v354_v24, 2  ;;  %v630_v62 = vsel %vm607_vm1, %v628_v55, %v629_v56  ;;  %v636_v24 = vrot.slane %v366_v21, 2 }
  0x35   : > { %563 = vrot.lane.b32.xlu0 %v3980_v29, %s3791_s14 }
  0x36   : > { %565 = vrot.lane.b32.xlu2 %v3994_v36, %s3791_s14  ;;  %v617_v34 = vsel %vm607_vm1, %v614_v4, %v616_v27  ;;  %v4114_v4 = vld [vmem:[%s3923_s23 + $0x80] sm:$0xff] }
  0x3c   : > { %567 = vrot.lane.b32.xlu1 %v510_v37, %s3791_s14  ;;  %v612_v37 = vsel %vm607_vm1, %v609_v7, %v611_v32  ;;  %v478_v7 = vrot.slane %v4111_v3, 1  ;;  %v476_v32 = vrot.slane %v363_v5, 1 }
  0x3d   : > { %720 = vrot.lane.b32.xlu0 %v662_v38, %s3792_s19  ;;  %v360_v38 = vld [vmem:[%s3923_s23 + $0x58] sm:$0x3] }
  0x3e   : > { %722 = vrot.lane.b32.xlu2 %v665_v44, %s3792_s19  ;;  %v471_v42 = vrot.slane %v360_v38, 1  ;;  %v624_v44 = vrot.slane %v4075_v40, 2  ;;  %v626_v54 = vrot.slane %v360_v38, 2  ;;  %v4160_v38 = vld [vmem:[%s3923_s23 + $0x98] sm:$0xff] }
  0x40   : > { %v625_v51 = vsel %vm607_vm1, %v623_v43, %v624_v44  ;;  %v407_v43 = vld [vmem:[%s6127_s1 + $0x80] sm:$0xff] }
  0x44   : > { %724 = vrot.lane.b32.xlu1 %v667_v45, %s3792_s19  ;;  %v4083_v45 = vsel %vm452_vm0, %v468_v39, %v469_v41 }
  0x45   : > { %569 = vrot.lane.b32.xlu0 %v512_v48, %s3791_s14  ;;  %6189 = vst [vmem:[#allocation13_spill] sm:$0xff] %v4083_v45  ;;  %v4086_v48 = vsel %vm452_vm0, %v469_v41, %v471_v42  ;;  %v639_v41 = vrot.slane %v4160_v38, 2  ;;  %v369_v42 = vld [vmem:[%s3923_s23 + $0xa0] sm:$0x3] }
  0x46   : > { %531 = vrot.lane.b32.xlu2 %v465_v57, %s3791_s14  ;;  %6190 = vst [vmem:[#allocation14_spill] sm:$0xff] %v4086_v48  ;;  %v473_v57 = vrot.slane %v4092_v52, 1 }
  0x4c   : > { %523 = vrot.lane.b32.xlu1 %v455_v58, %s3791_s14  ;;  %v474_v58 = vrot.slane %v4095_v53, 1 }
  0x4d   : > { %686 = vrot.lane.b32.xlu0 %v620_v61, %s3792_s19  ;;  %v627_v61 = vsel %vm607_vm1, %v624_v44, %v626_v54  ;;  %v484_v44 = vrot.slane %v4160_v38, 1  ;;  %v633_v54 = vrot.slane %v4111_v3, 2 }
  0x4e   : > { %527 = vrot.lane.b32.xlu2 %v460_v10, %s3791_s14  ;;  %v4108_v63 = vsel %vm452_vm0, %v473_v57, %v474_v58  ;;  %v479_v10 = vrot.slane %v4114_v4, 1 }
  0x4f   : > { %6191 = vst [vmem:[#allocation15_spill] sm:$0xff] %v4108_v63 }
  0x50   : > { %v4129_v15 = vsel %vm452_vm0, %v478_v7, %v479_v10 }
  0x51   : > { %6192 = vst [vmem:[#allocation16_spill] sm:$0xff] %v4129_v15 }
  0x54   : > { %682 = vrot.lane.b32.xlu1 %v615_v11, %s3792_s19  ;;  %v631_v11 = vrot.slane %v363_v5, 2  ;;  %v406_v5 = vld [vmem:[%s6127_s1 + $0x78] sm:$0xff] }
  0x55   : > { %678 = vrot.lane.b32.xlu0 %v610_v14, %s3792_s19  ;;  %v394_v14 = vld [vmem:[%s6127_s1 + $0x18] sm:$0xff] }
  0x56   : > { %533 = vrot.lane.b32.xlu2 %v467_v22, %s3791_s14  ;;  %v632_v18 = vsel %vm607_vm1, %v629_v56, %v631_v11  ;;  %3603 = vmatpush.msra.mxu2 %v394_v14  ;;  %v392_v22 = vld [vmem:[%s6127_s1 + $0x8] sm:$0xff] }
  0x57   : > { %1000 = vmatpush.msra.mxu1 %v394_v14 }
  0x58   : > { %3604 = vmatpush.msra.mxu2 %v393_v17 }
  0x59   : > { %1001 = vmatpush.msra.mxu1 %v393_v17 }
  0x5a   : > { %3605 = vmatpush.msra.mxu2 %v392_v22 }
  0x5b   : > { %1002 = vmatpush.msra.mxu1 %v392_v22 }
  0x5c   : > { %525 = vrot.lane.b32.xlu1 %v457_v23, %s3791_s14  ;;  %v634_v23 = vrot.slane %v4114_v4, 2  ;;  %3606 = vmatpush.msra.mxu2 %v391_v26 }
  0x5d   : > { %688 = vrot.lane.b32.xlu0 %v622_v25, %s3792_s19  ;;  %v481_v25 = vrot.slane %v366_v21, 1  ;;  %1003 = vmatpush.msra.mxu1 %v391_v26 }
  0x5e   : > { %529 = vrot.lane.b32.xlu2 %v462_v33, %s3791_s14  ;;  %v637_v27 = vsel %vm607_vm1, %v634_v23, %v636_v24  ;;  %1093 = vmatpush.msrb.mxu2 %v408_v28  ;;  %v405_v24 = vld [vmem:[%s6127_s1 + $0x70] sm:$0xff] }
  0x5f   : > { %v4151_v33 = vsel %vm452_vm0, %v479_v10, %v481_v25  ;;  %v372_v25 = vld [vmem:[%s3923_s23 + $0xb8] sm:$0x3] }
  0x60   : > { %6193 = vst [vmem:[#allocation17_spill] sm:$0xff] %v4151_v33  ;;  %1094 = vmatpush.msrb.mxu2 %v407_v43  ;;  %v646_v26 = vrot.slane %v372_v25, 2 }
  0x62   : > { %1095 = vmatpush.msrb.mxu2 %v406_v5  ;;  %v401_v5 = vld [vmem:[%s6127_s1 + $0x50] sm:$0xff] }
  0x64   : > { %684 = vrot.lane.b32.xlu1 %v617_v34, %s3792_s19  ;;  %v4154_v34 = vsel %vm452_vm0, %v474_v58, %v476_v32  ;;  %v635_v58 = vsel %vm607_vm1, %v633_v54, %v634_v23  ;;  %1096 = vmatpush.msrb.mxu2 %v405_v24 }
  0x65   : > { %680 = vrot.lane.b32.xlu0 %v612_v37, %s3792_s19  ;;  %6194 = vst [vmem:[#allocation18_spill] sm:$0xff] %v4154_v34  ;;  %v4157_v37 = vld [vmem:[%s3923_s23 + $0x90] sm:$0xff] }
  0x66   : > { %535 = vrot.lane.b32.xlu2 %v4083_v45, %s3791_s14  ;;  %v638_v39 = vrot.slane %v4157_v37, 2  ;;  %v483_v23 = vrot.slane %v4157_v37, 1 }
  0x68   : > { %v640_v55 = vsel %vm607_vm1, %v638_v39, %v639_v41 }
  0x6c   : > { %537 = vrot.lane.b32.xlu1 %v4086_v48, %s3791_s14 }
  0x6d   : > { %690 = vrot.lane.b32.xlu0 %v625_v51, %s3792_s19  ;;  %v486_v51 = vrot.slane %v369_v42, 1 }
  0x6e   : > { %692 = vrot.lane.b32.xlu2 %v627_v61, %s3792_s19  ;;  %v4187_v61 = vld [vmem:[%s3923_s23 + $0xa8] sm:$0xff] }
  0x6f   : > { %v4179_v57 = vsel %vm452_vm0, %v484_v44, %v486_v51  ;;  %v488_v7 = vrot.slane %v4187_v61, 1  ;;  %v643_v11 = vrot.slane %v4187_v61, 2 }
  0x70   : > { %6195 = vst [vmem:[#allocation19_spill] sm:$0xff] %v4179_v57 }
  0x74   : > { %694 = vrot.lane.b32.xlu1 %v630_v62, %s3792_s19  ;;  %v4190_v62 = vld [vmem:[%s3923_s23 + $0xb0] sm:$0xff] }
  0x75   : > { %539 = vrot.lane.b32.xlu0 %v4108_v63, %s3791_s14  ;;  %v489_v10 = vrot.slane %v4190_v62, 1  ;;  %v644_v12 = vrot.slane %v4190_v62, 2 }
  0x76   : > { %541 = vrot.lane.b32.xlu2 %v4154_v34, %s3791_s14 }
  0x77   : > { %v4202_v14 = vsel %vm452_vm0, %v488_v7, %v489_v10  ;;  %v645_v17 = vsel %vm607_vm1, %v643_v11, %v644_v12  ;;  %v647_v28 = vsel %vm607_vm1, %v644_v12, %v646_v26  ;;  %v641_v7 = vrot.slane %v369_v42, 2  ;;  %v404_v11 = vld [vmem:[%s6127_s1 + $0x68] sm:$0xff] }
  0x78   : > { %6196 = vst [vmem:[#allocation20_spill] sm:$0xff] %v4202_v14  ;;  %1097 = vmatpush.msrb.mxu2 %v404_v11 }
  0x7c   : > { %543 = vrot.lane.b32.xlu1 %v4129_v15, %s3791_s14 }
  0x7d   : > { %696 = vrot.lane.b32.xlu0 %v632_v18, %s3792_s19 }
  0x7e   : > { %698 = vrot.lane.b32.xlu2 %v635_v58, %s3792_s19 }
  0x80   : > { %v4176_v56 = vpop.permute.xlu2 %561 }
  0x84   : > { %700 = vrot.lane.b32.xlu1 %v637_v27, %s3792_s19  ;;  %v4214_v27 = vsel %vm452_vm0, %v483_v23, %v484_v44  ;;  %v4226_v44 = vld [vmem:[%s3923_s23 + $0xc0] sm:$0xff] }
  0x85   : > { %545 = vrot.lane.b32.xlu0 %v4151_v33, %s3791_s14  ;;  %6197 = vst [vmem:[#allocation21_spill] sm:$0xff] %v4214_v27  ;;  %v493_v58 = vrot.slane %v4226_v44, 1 }
  0x86   : > { %547 = vrot.lane.b32.xlu2 %v4214_v27, %s3791_s14 }
  0x87   : > { %v4243_v12 = vsel %vm452_vm0, %v493_v58, %v494_v6  ;;  %v491_v58 = vrot.slane %v372_v25, 1  ;;  %v648_v25 = vrot.slane %v4226_v44, 2 }
  0x88   : > { %v717_v18 = vpop.permute.xlu2 %716  ;;  %6198 = vst [vmem:[#allocation22_spill] sm:$0xff] %v4243_v12 }
  0x8c   : > { %549 = vrot.lane.b32.xlu1 %v4179_v57, %s3791_s14 }
  0x8d   : > { %702 = vrot.lane.b32.xlu0 %v640_v55, %s3792_s19  ;;  %v402_v55 = vld [vmem:[%s6127_s1 + $0x58] sm:$0xff] }
  0x8e   : > { %903 = vmatpush.msra.mxu0 %v402_v55 }
  0x90   : > { %v566_v51 = vpop.permute.xlu2 %565  ;;  %904 = vmatpush.msra.mxu0 %v401_v5 }
  0x94   : > { %706 = vrot.lane.b32.xlu1 %v645_v17, %s3792_s19  ;;  %v642_v17 = vsel %vm607_vm1, %v639_v41, %v641_v7  ;;  %v399_v41 = vld [vmem:[%s6127_s1 + $0x40] sm:$0xff]  ;;  %v4282_v7 = vsel %vm452_vm0, %v489_v10, %v491_v58  ;;  %v650_v10 = vsel %vm607_vm1, %v648_v25, %v649_v13 }
  0x95   : > { %551 = vrot.lane.b32.xlu0 %v4202_v14, %s3791_s14  ;;  %704 = vrot.lane.b32.xlu2 %v642_v17, %s3792_s19  ;;  %6199 = vst [vmem:[#allocation23_spill] sm:$0xff] %v4282_v7  ;;  %v784_v17 = vsel %vm762_vm2, %v3967_v20, %v566_v51 }
  0x96   : > { %v560_v21 = vpop.permute.xlu1 %559 }
  0x97   : > { %v558_v22 = vpop.permute.xlu0 %557  ;;  %v781_v42 = vsel %vm762_vm2, %v3926_v0, %v560_v21  ;;  %v398_v0 = vld [vmem:[%s6127_s1 + $0x38] sm:$0xff]  ;;  %v397_v21 = vld [vmem:[%s6127_s1 + $0x30] sm:$0xff] }
  0x98   : > { %v780_v39 = vsel %vm762_vm2, %v3932_v2, %v558_v22  ;;  %v400_v22 = vld [vmem:[%s6127_s1 + $0x48] sm:$0xff]  ;;  %v723_v26 = vpop.permute.xlu2 %722 }
  0x99   : > { %905 = vmatpush.msra.mxu0 %v400_v22 }
  0x9b   : > { %906 = vmatpush.msra.mxu0 %v399_v41 }
  0x9c   : > { %555 = vrot.lane.b32.xlu1 %v4243_v12, %s3791_s14 }
  0x9d   : > { %708 = vrot.lane.b32.xlu0 %v647_v28, %s3792_s19  ;;  %907 = vmatpush.msra.mxu0 %v398_v0  ;;  %v782_v28 = vsel %vm762_vm2, %v3929_v1, %v4176_v56 }
  0x9e   : > { %v715_v32 = vpop.permute.xlu1 %714  ;;  %v4275_v55 = vsel %vm791_vm3, %v782_v28, %v717_v18  ;;  %553 = vrot.lane.b32.xlu2 %v4282_v7, %s3791_s14 }
  0x9f   : > { %v713_v43 = vpop.permute.xlu0 %712  ;;  %v4258_v24 = vsel %vm791_vm3, %v781_v42, %v715_v32  ;;  %908 = vmatpush.msra.mxu0 %v397_v21 }
  0xa0   : > { %v4223_v54 = vsel %vm791_vm3, %v780_v39, %v713_v43  ;;  %v403_v43 = vld [vmem:[%s6127_s1 + $0x60] sm:$0xff]  ;;  %v532_v5 = vpop.permute.xlu2 %531 }
  0xa1   : > { %3438 = vmatmul.msk.f32.vlgmr.msra.gmra.mxu2 %vm820_vm4, %v4223_v54 }
  0xa2   : > { %1098 = vmatpush.msrb.mxu2 %v403_v43  ;;  %v767_v43 = vsel %vm762_vm2, %v4008_v46, %v532_v5  ;;  %v4344_v5 = vld [vmem:[%s3923_s23 + $0x120] sm:$0xff] }
  0xa6   : > { %v719_v23 = vpop.permute.xlu1 %718  ;;  %710 = vrot.lane.b32.xlu2 %v650_v10, %s3792_s19  ;;  %v4347_v10 = vld [vmem:[%s3923_s23 + $0x128] sm:$0xff] }
  0xa7   : > { %v564_v6 = vpop.permute.xlu0 %563 }
  0xa8   : > { %v783_v1 = vsel %vm762_vm2, %v3964_v19, %v564_v6  ;;  %v528_v19 = vpop.permute.xlu2 %527 }
  0xa9   : > { %3439 = vmatmul.msk.f32.gmra.mxu2 %vm820_vm4, %v4258_v24  ;;  %v4289_v11 = vsel %vm791_vm3, %v783_v1, %v719_v23  ;;  %v765_v6 = vsel %vm762_vm2, %v4032_v59, %v528_v19  ;;  %v514_v19 = vrot.slane %v4347_v10, 1 }
  0xae   : > { %v568_v32 = vpop.permute.xlu1 %567 }
  0xaf   : > { %v721_v39 = vpop.permute.xlu0 %720  ;;  %v785_v2 = vsel %vm762_vm2, %v3983_v30, %v568_v32 }
  0xb0   : > { %v4301_v23 = vsel %vm791_vm3, %v784_v17, %v721_v39  ;;  %v534_v51 = vpop.permute.xlu2 %533  ;;  %v4313_v21 = vsel %vm791_vm3, %v785_v2, %v723_v26  ;;  %v513_v17 = vrot.slane %v4344_v5, 1 }
  0xb1   : > { %3440 = vmatmul.msk.f32.gmra.mxu2 %vm820_vm4, %v4275_v55  ;;  %v768_v46 = vsel %vm762_vm2, %v4011_v47, %v534_v51  ;;  %v668_v47 = vrot.slane %v4344_v5, 2  ;;  %v387_v51 = vld [vmem:[%s3923_s23 + $0x130] sm:$0x3] }
  0xb2   : > { %v515_v2 = vsel %vm452_vm0, %v513_v17, %v514_v19 }
  0xb3   : > { %571 = vrot.lane.b32.xlu0 %v515_v2, %s3791_s14 }
  0xb6   : > { %v725_v56 = vpop.permute.xlu1 %724 }
  0xb7   : > { %v570_v18 = vpop.permute.xlu0 %569 }
  0xb8   : > { %v786_v30 = vsel %vm762_vm2, %v3986_v31, %v570_v18  ;;  %v530_v26 = vpop.permute.xlu2 %529 }
  0xb9   : > { %3441 = vmatmul.msk.f32.gmra.mxu2 %vm820_vm4, %v4289_v11  ;;  %v4323_v32 = vsel %vm791_vm3, %v786_v30, %v725_v56  ;;  %v766_v39 = vsel %vm762_vm2, %v4035_v60, %v530_v26 }
  0xbe   : > { %v524_v22 = vpop.permute.xlu1 %523 }
  0xbf   : > { %v687_v42 = vpop.permute.xlu0 %686  ;;  %v763_v13 = vsel %vm762_vm2, %v4016_v49, %v524_v22  ;;  %v669_v22 = vrot.slane %v4347_v10, 2 }
  0xc0   : > { %v796_v18 = vsel %vm791_vm3, %v767_v43, %v687_v42  ;;  %v536_v60 = vpop.permute.xlu2 %535 }
  0xc1   : > { %3442 = vmatmul.msk.f32.gmra.mxu2 %vm820_vm4, %v4301_v23  ;;  %v769_v42 = vsel %vm762_vm2, %v4068_v35, %v536_v60  ;;  %v671_v35 = vrot.slane %v387_v51, 2 }
  0xc3   : > { %v672_v30 = vsel %vm607_vm1, %v669_v22, %v671_v35 }
  0xc4   : > { %728 = vrot.lane.b32.xlu0 %v672_v30, %s3792_s19 }
  0xc6   : > { %v683_v41 = vpop.permute.xlu1 %682 }
  0xc7   : > { %v679_v20 = vpop.permute.xlu0 %678  ;;  %v794_v0 = vsel %vm791_vm3, %v765_v6, %v683_v41 }
  0xc8   : > { %3397 = vmatmul.msk.f32.vlgmr.msra.gmra.mxu0 %vm820_vm4, %v794_v0  ;;  %v792_v28 = vsel %vm791_vm3, %v763_v13, %v679_v20  ;;  %v670_v13 = vsel %vm607_vm1, %v668_v47, %v669_v22 }
  0xc9   : > { %3443 = vmatmul.msk.f32.gmra.mxu2 %vm820_vm4, %v4313_v21  ;;  %3421 = vmatmul.msk.f32.vlgmr.msra.gmra.mxu1 %vm820_vm4, %v792_v28  ;;  %v693_v28 = vpop.permute.xlu2 %692 }
  0xca   : > { %726 = vrot.lane.b32.xlu1 %v670_v13, %s3792_s19 }
  0xce   : > { %v526_v49 = vpop.permute.xlu1 %525 }
  0xcf   : > { %v689_v59 = vpop.permute.xlu0 %688  ;;  %v764_v31 = vsel %vm762_vm2, %v4019_v50, %v526_v49 }
  0xd0   : > { %v797_v50 = vsel %vm791_vm3, %v768_v46, %v689_v59 }
  0xd1   : > { %3444 = vmatmul.msk.f32.gmra.mxu2 %vm820_vm4, %v4323_v32  ;;  %v542_v43 = vpop.permute.xlu2 %541 }
  0xd6   : > { %v685_v58 = vpop.permute.xlu1 %684 }
  0xd7   : > { %v681_v1 = vpop.permute.xlu0 %680  ;;  %v795_v56 = vsel %vm791_vm3, %v766_v39, %v685_v58 }
  0xd8   : > { %3398 = vmatmul.msk.f32.gmra.mxu0 %vm820_vm4, %v795_v56  ;;  %v793_v25 = vsel %vm791_vm3, %v764_v31, %v681_v1  ;;  %v772_v31 = vsel %vm762_vm2, %v4095_v53, %v542_v43 }
  0xd9   : > { %3422 = vmatmul.msk.f32.gmra.mxu1 %vm820_vm4, %v793_v25  ;;  %3445 = vmatmul.msk.f32.vlgmr.msrb.gmra.mxu2 %vm820_vm4, %v796_v18  ;;  %v699_v25 = vpop.permute.xlu2 %698 }
  0xde   : > { %v538_v20 = vpop.permute.xlu1 %537 }
  0xdf   : > { %v691_v6 = vpop.permute.xlu0 %690 }
  0xe0   : > { %3399 = vmatmul.msk.f32.gmra.mxu0 %vm820_vm4, %v796_v18  ;;  %v798_v41 = vsel %vm791_vm3, %v769_v42, %v691_v6 }
  0xe1   : > { %3423 = vmatmul.msk.f32.gmra.mxu1 %vm820_vm4, %v794_v0  ;;  %3446 = vmatmul.msk.f32.gmra.mxu2 %vm820_vm4, %v797_v50  ;;  %v770_v0 = vsel %vm762_vm2, %v4075_v40, %v538_v20 }
  0xe2   : > { %v799_v49 = vsel %vm791_vm3, %v770_v0, %v693_v28 }
  0xe6   : > { %v695_v39 = vpop.permute.xlu1 %694 }
  0xe7   : > { %v540_v59 = vpop.permute.xlu0 %539 }
  0xe8   : > { %3400 = vmatmul.msk.f32.gmra.mxu0 %vm820_vm4, %v797_v50  ;;  %v771_v26 = vsel %vm762_vm2, %v4092_v52, %v540_v59  ;;  %v516_v52 = vrot.slane %v387_v51, 1 }
  0xe9   : > { %3424 = vmatmul.msk.f32.gmra.mxu1 %vm820_vm4, %v795_v56  ;;  %3447 = vmatmul.msk.f32.gmra.mxu2 %vm820_vm4, %v798_v41  ;;  %v800_v40 = vsel %vm791_vm3, %v771_v26, %v695_v39 }
  0xea   : > { %v517_v46 = vsel %vm452_vm0, %v514_v19, %v516_v52  ;;  %v548_v19 = vpop.permute.xlu2 %547 }
  0xeb   : > { %573 = vrot.lane.b32.xlu2 %v517_v46, %s3791_s14  ;;  %v775_v47 = vsel %vm762_vm2, %v4157_v37, %v548_v19 }
  0xee   : > { %v544_v56 = vpop.permute.xlu1 %543 }
  0xef   : > { %v697_v58 = vpop.permute.xlu0 %696 }
  0xf0   : > { %3401 = vmatmul.msk.f32.gmra.mxu0 %vm820_vm4, %v798_v41  ;;  %v801_v1 = vsel %vm791_vm3, %v772_v31, %v697_v58 }
  0xf1   : > { %3425 = vmatmul.msk.f32.gmra.mxu1 %vm820_vm4, %v796_v18  ;;  %3448 = vmatmul.msk.f32.gmra.mxu2 %vm820_vm4, %v799_v49  ;;  %v773_v18 = vsel %vm762_vm2, %v4111_v3, %v544_v56 }
  0xf2   : > { %v802_v53 = vsel %vm791_vm3, %v773_v18, %v699_v25  ;;  %v705_v2 = vpop.permute.xlu2 %704 }
  0xf6   : > { %v701_v17 = vpop.permute.xlu1 %700 }
  0xf8   : > { %3402 = vmatmul.msk.f32.gmra.mxu0 %vm820_vm4, %v799_v49 }
  0xf9   : > { %3426 = vmatmul.msk.f32.gmra.mxu1 %vm820_vm4, %v797_v50  ;;  %3449 = vmatmul.msk.f32.gmra.mxu2 %vm820_vm4, %v800_v40  ;;  %v546_v50 = vpop.permute.xlu0 %545 }
  0xfa   : > { %v774_v60 = vsel %vm762_vm2, %v4114_v4, %v546_v50 }
  0xfb   : > { %v803_v3 = vsel %vm791_vm3, %v774_v60, %v701_v17 }
  0xfe   : > { %v550_v6 = vpop.permute.xlu1 %549 }
  0xff   : > { %v776_v4 = vsel %vm762_vm2, %v4160_v38, %v550_v6  ;;  %v554_v38 = vpop.permute.xlu2 %553 }
 0x100   : > { %3403 = vmatmul.msk.f32.gmra.mxu0 %vm820_vm4, %v800_v40  ;;  %v805_v13 = vsel %vm791_vm3, %v776_v4, %v705_v2  ;;  %v778_v0 = vsel %vm762_vm2, %v4190_v62, %v554_v38 }
 0x101   : > { %3427 = vmatmul.msk.f32.gmra.mxu1 %vm820_vm4, %v798_v41  ;;  %3450 = vmatmul.msk.f32.gmra.mxu2 %vm820_vm4, %v801_v1  ;;  %v703_v22 = vpop.permute.xlu0 %702 }
 0x102   : > { %v804_v42 = vsel %vm791_vm3, %v775_v47, %v703_v22 }
 0x106   : > { %v707_v20 = vpop.permute.xlu1 %706 }
 0x107   : > { %v711_v26 = vpop.permute.xlu2 %710 }
 0x108   : > { %3404 = vmatmul.msk.f32.gmra.mxu0 %vm820_vm4, %v801_v1 }
 0x109   : > { %3428 = vmatmul.msk.f32.gmra.mxu1 %vm820_vm4, %v799_v49  ;;  %3451 = vmatmul.msk.f32.gmra.mxu2 %vm820_vm4, %v802_v53  ;;  %v552_v41 = vpop.permute.xlu0 %551 }
 0x10a   : > { %v777_v37 = vsel %vm762_vm2, %v4187_v61, %v552_v41 }
 0x10b   : > { %v806_v35 = vsel %vm791_vm3, %v777_v37, %v707_v20 }
 0x10e   : > { %v556_v49 = vpop.permute.xlu1 %555 }
 0x10f   : > { %v779_v59 = vsel %vm762_vm2, %v4226_v44, %v556_v49 }
 0x110   : > { %3405 = vmatmul.msk.f32.gmra.mxu0 %vm820_vm4, %v802_v53  ;;  %v808_v62 = vsel %vm791_vm3, %v779_v59, %v711_v26  ;;  %v4542_v59 = vld [vmem:[%s6128_s2] ss:$0 sm:$0xff]  ;;  %v4544_v26 = vstv %s1247_s29 }
 0x111   : > { %3429 = vmatmul.msk.f32.gmra.mxu1 %vm820_vm4, %v800_v40  ;;  %3452 = vmatmul.msk.f32.gmra.mxu2 %vm820_vm4, %v803_v3  ;;  %v709_v28 = vpop.permute.xlu0 %708  ;;  %vm1253_vm5 = vcmp.le.s32.totalorder %v4544_v26, 4  ;;  %vm1254_vm9 = vcmp.le.s32.totalorder %v4544_v26, 5  ;;  %vm1255_vm12 = vcmp.le.s32.totalorder %v4544_v26, 6  ;;  %vm1256_vm15 = vcmp.le.s32.totalorder %v4544_v26, 7 }
 0x112   : > { %v807_v61 = vsel %vm791_vm3, %v778_v0, %v709_v28 }
 0x118   : > { %3406 = vmatmul.msk.f32.gmra.mxu0 %vm820_vm4, %v803_v3 }
 0x119   : > { %3430 = vmatmul.msk.f32.gmra.mxu1 %vm820_vm4, %v801_v1  ;;  %3453 = vmatmul.msk.f32.gmra.mxu2 %vm820_vm4, %v804_v42 }
 0x120   : > { %3407 = vmatmul.msk.f32.gmra.mxu0 %vm820_vm4, %v804_v42 }
 0x121   : > { %3431 = vmatmul.msk.f32.gmra.mxu1 %vm820_vm4, %v802_v53  ;;  %3454 = vmatmul.msk.f32.gmra.mxu2 %vm820_vm4, %v805_v13 }
 0x124   : > { %v4414_v51 = vpop.f32.mrf.mxu2 }
 0x125   : > { %v572_v60 = vpop.permute.xlu0 %571 }
 0x126   : > { %v787_v17 = vsel %vm762_vm2, %v4344_v5, %v572_v60 }
 0x128   : > { %3408 = vmatmul.msk.f32.gmra.mxu0 %vm820_vm4, %v805_v13 }
 0x129   : > { %3432 = vmatmul.msk.f32.gmra.mxu1 %vm820_vm4, %v803_v3  ;;  %3455 = vmatmul.msk.f32.gmra.mxu2 %vm820_vm4, %v806_v35 }
 0x12c   : > { %v4422_v30 = vpop.f32.mrf.mxu2 }
 0x130   : > { %3409 = vmatmul.msk.f32.gmra.mxu0 %vm820_vm4, %v806_v35 }
 0x131   : > { %3433 = vmatmul.msk.f32.gmra.mxu1 %vm820_vm4, %v804_v42  ;;  %3456 = vmatmul.msk.f32.gmra.mxu2 %vm820_vm4, %v807_v61 }
 0x134   : > { %v4430_v39 = vpop.f32.mrf.mxu2 }
 0x136   : > { %v729_v6 = vpop.permute.xlu0 %728 }
 0x138   : > { %3410 = vmatmul.msk.f32.gmra.mxu0 %vm820_vm4, %v807_v61 }
 0x139   : > { %3434 = vmatmul.msk.f32.gmra.mxu1 %vm820_vm4, %v805_v13  ;;  %3457 = vmatmul.msk.f32.gmra.mxu2 %vm820_vm4, %v808_v62 }
 0x13c   : > { %v4436_v40 = vpop.f32.mrf.mxu2 }
 0x140   : > { %3411 = vmatmul.msk.f32.gmra.mxu0 %vm820_vm4, %v808_v62 }
 0x141   : > { %3435 = vmatmul.msk.f32.gmra.mxu1 %vm820_vm4, %v806_v35  ;;  %3458 = vmatmul.msk.f32.gmra.mxu2 %vm820_vm4, %v4223_v54 }
 0x144   : > { %v4442_v44 = vpop.f32.mrf.mxu2 }
 0x145   : > { %v4451_v31 = vpop.f32.mrf.mxu0 }
 0x146   : > { %v4453_v58 = vpop.f32.mrf.mxu1 }
 0x148   : > { %3412 = vmatmul.msk.f32.gmra.mxu0 %vm820_vm4, %v4223_v54 }
 0x149   : > { %3436 = vmatmul.msk.f32.gmra.mxu1 %vm820_vm4, %v807_v61  ;;  %3459 = vmatmul.msk.f32.gmra.mxu2 %vm820_vm4, %v4258_v24 }
 0x14c   : > { %v4449_v43 = vpop.f32.mrf.mxu2 }
 0x150   : > { %3413 = vmatmul.msk.f32.gmra.mxu0 %vm820_vm4, %v4258_v24 }
 0x151   : > { %3437 = vmatmul.msk.f32.gmra.mxu1 %vm820_vm4, %v808_v62  ;;  %3460 = vmatmul.msk.f32.gmra.mxu2 %vm820_vm4, %v4275_v55  ;;  %v4546_v62 = vstv %s1261_s17  ;;  %s3794_s17 = smov 24  }
 0x152   : > { %vm1267_vm6 = vcmp.gt.s32.totalorder %v4546_v62, 4  ;;  %vm1268_vm10 = vcmp.gt.s32.totalorder %v4546_v62, 5  ;;  %vm1269_vm13 = vcmp.gt.s32.totalorder %v4546_v62, 6 }
 0x153   : > { %vm1279_vm7 = vmand %vm1253_vm5, %vm1267_vm6  ;;  %vm1270_vm5 = vcmp.gt.s32.totalorder %v4546_v62, 7 }
 0x154   : > { %v4460_v54 = vpop.f32.mrf.mxu2  ;;  %vm4572_vm11 = vmand %vm1254_vm9, %vm1268_vm10  ;;  %vm1264_vm9 = vcmp.gt.s32.totalorder %v4546_v62, 1 }
 0x155   : > { %v4462_v1 = vpop.f32.mrf.mxu0  ;;  %vm4620_vm14 = vmand %vm1255_vm12, %vm1269_vm13  ;;  %vm1271_vm12 = vcmp.gt.s32.totalorder %v4546_v62, 8 }
 0x156   : > { %v4464_v56 = vpop.f32.mrf.mxu1  ;;  %vm4676_vm6 = vmand %vm1256_vm15, %vm1270_vm5  ;;  %vm1272_vm15 = vcmp.gt.s32.totalorder %v4546_v62, 9 }
 0x158   : > { %3414 = vmatmul.msk.f32.gmra.mxu0 %vm820_vm4, %v4275_v55 }
 0x159   : > { %3461 = vmatmul.msk.f32.gmra.mxu2 %vm820_vm4, %v4289_v11 }
 0x15c   : > { %v4470_v52 = vpop.f32.mrf.mxu2 }
 0x15d   : > { %v4472_v24 = vpop.f32.mrf.mxu0 }
 0x15e   : > { %v4474_v18 = vpop.f32.mrf.mxu1 }
 0x160   : > { %3415 = vmatmul.msk.f32.gmra.mxu0 %vm820_vm4, %v4289_v11 }
 0x161   : > { %3462 = vmatmul.msk.f32.gmra.mxu2 %vm820_vm4, %v4301_v23 }
 0x164   : > { %v4480_v25 = vpop.f32.mrf.mxu2 }
 0x165   : > { %v4482_v46 = vpop.f32.mrf.mxu0 }
 0x166   : > { %v4484_v55 = vpop.f32.mrf.mxu1 }
 0x167   : > { %v1015_v45 = vadd.f32 %v4484_v55, %v4482_v46 }
 0x168   : > { %3416 = vmatmul.msk.f32.gmra.mxu0 %vm820_vm4, %v4301_v23  ;;  %v727_v23 = vpop.permute.xlu1 %726 }
 0x169   : > { %3463 = vmatmul.msk.f32.gmra.mxu2 %vm820_vm4, %v4313_v21  ;;  %v816_v22 = vsel %vm791_vm3, %v787_v17, %v727_v23 }
 0x16c   : > { %v4490_v53 = vpop.f32.mrf.mxu2 }
 0x16d   : > { %v4492_v50 = vpop.f32.mrf.mxu0 }
 0x16e   : > { %v4494_v11 = vpop.f32.mrf.mxu1 }
 0x170   : > { %3417 = vmatmul.msk.f32.gmra.mxu0 %vm820_vm4, %v4313_v21  ;;  %v574_v21 = vpop.permute.xlu2 %573 }
 0x171   : > { %3464 = vmatmul.msk.f32.gmra.mxu2 %vm820_vm4, %v4323_v32  ;;  %v788_v42 = vsel %vm762_vm2, %v4347_v10, %v574_v21 }
 0x172   : > { %v817_v13 = vsel %vm791_vm3, %v788_v42, %v729_v6 }
 0x174   : > { %v4502_v3 = vpop.f32.mrf.mxu2 }
 0x175   : > { %v4504_v19 = vpop.f32.mrf.mxu0 }
 0x176   : > { %v4506_v47 = vpop.f32.mrf.mxu1 }
 0x178   : > { %3418 = vmatmul.msk.f32.gmra.mxu0 %vm820_vm4, %v4323_v32 }
 0x179   : > { %3465 = vmatmul.msk.f32.gmra.mxu2 %vm820_vm4, %v816_v22 }
 0x17c   : > { %v4514_v5 = vpop.f32.mrf.mxu2 }
 0x17d   : > { %v4516_v4 = vpop.f32.mrf.mxu0 }
 0x17e   : > { %v4518_v2 = vpop.f32.mrf.mxu1 }
 0x180   : > { %3419 = vmatmul.msk.f32.gmra.mxu0 %vm820_vm4, %v816_v22 }
 0x181   : > { %3466 = vmatmul.msk.f32.gmra.mxu2 %vm820_vm4, %v817_v13 }
 0x184   : > { %v4523_v32 = vpop.f32.mrf.mxu2 }
 0x185   : > { %v4525_v41 = vpop.f32.mrf.mxu0 }
 0x186   : > { %v4527_v37 = vpop.f32.mrf.mxu1 }
 0x188   : > { %3420 = vmatmul.msk.f32.gmra.mxu0 %vm820_vm4, %v817_v13 }
 0x18c   : > { %v4530_v10 = vpop.f32.mrf.mxu2 }
 0x18d   : > { %v934_v20 = vpop.f32.mrf.mxu0 }
 0x18e   : > { %v1029_v35 = vpop.f32.mrf.mxu1 }
 0x18f   : > { %v1030_v61 = vadd.f32 %v1029_v35, %v934_v20 }
 0x194   : > { %v4532_v38 = vpop.f32.mrf.mxu2 }
 0x195   : > { %v937_v0 = vpop.f32.mrf.mxu0 }
 0x196   : > { %v1032_v28 = vpop.f32.mrf.mxu1 }
 0x197   : > { %v1033_v42 = vadd.f32 %v1032_v28, %v937_v0 }
 0x19c   : > { %v1124_v49 = vpop.f32.mrf.mxu2 }
 0x19d   : > { %v1180_v60 = vadd.f32 %v1124_v49, %v1030_v61  ;;  %v940_v17 = vpop.f32.mrf.mxu0 }
 0x19e   : > { %v1035_v23 = vpop.f32.mrf.mxu1 }
 0x19f   : > { %v1207_v22 = vadd.f32 %v4542_v59, %v1180_v60  ;;  %v1036_v16 = vadd.f32 %v1035_v23, %v940_v17 }
 0x1a1   : > { %v1231_v21 = vmax.f32 %v1207_v22, 0.0 }
 0x1a3   : > { %v4551_v6 = vsel %vm1279_vm7, %v1231_v21, 0.0 }
 0x1a4   : > { %v1127_v13 = vpop.f32.mrf.mxu2  ;;  %v1348_v29 = vrot.slane %v4551_v6, 7 }
 0x1a5   : > { %v1181_v20 = vadd.f32 %v1127_v13, %v1033_v42  ;;  %v943_v35 = vpop.f32.mrf.mxu0 }
 0x1a6   : > { %v1038_v36 = vpop.f32.mrf.mxu1  ;;  %v4558_v60 = vsel %vm1335_vm8, 0.0, %v1348_v29 }
 0x1a7   : > { %v1208_v61 = vadd.f32 %v4542_v59, %v1181_v20  ;;  %v1618_v13 = vrot.slane %v4558_v60, 2 }
 0x1a9   : > { %v1232_v49 = vmax.f32 %v1208_v61, 0.0 }
 0x1ab   : > { %v4555_v8 = vsel %vm1279_vm7, %v1232_v49, 0.0  ;;  %vm1250_vm7 = vcmp.le.s32.totalorder %v4544_v26, 1 }
 0x1ac   : > { %v1349_v0 = vrot.slane %v4555_v8, 7  ;;  %v1130_v28 = vpop.f32.mrf.mxu2  ;;  %vm1276_vm10 = vmand %vm1250_vm7, %vm1264_vm9  ;;  %vm1265_vm7 = vcmp.gt.s32.totalorder %v4546_v62, 2 }
 0x1ad   : > { %v1182_v22 = vadd.f32 %v1130_v28, %v1036_v16  ;;  %v946_v21 = vpop.f32.mrf.mxu0  ;;  %v1486_v16 = vrot.slane %v4558_v60, 1 }
 0x1ae   : > { %v4564_v42 = vsel %vm1335_vm8, %v1348_v29, %v1349_v0  ;;  %v1424_v17 = vsel %vm1335_vm8, %v1349_v0, 0.0  ;;  %v1041_v49 = vpop.f32.mrf.mxu1 }
 0x1af   : > { %v1209_v23 = vadd.f32 %v4542_v59, %v1182_v22  ;;  %v1619_v20 = vrot.slane %v4564_v42, 2  ;;  %v1487_v61 = vrot.slane %v4564_v42, 1  ;;  %v1489_v28 = vrot.slane %v1424_v17, 1 }
 0x1b0   : > { %v1039_v22 = vadd.f32 %v1038_v36, %v943_v35  ;;  %v1042_v36 = vadd.f32 %v1041_v49, %v946_v21 }
 0x1b1   : > { %v1233_v9 = vmax.f32 %v1209_v23, 0.0  ;;  %v1620_v29 = vsel %vm607_vm1, %v1618_v13, %v1619_v20  ;;  %v1488_v7 = vsel %vm452_vm0, %v1486_v16, %v1487_v61  ;;  %v1490_v0 = vsel %vm452_vm0, %v1487_v61, %v1489_v28 }
 0x1b2   : > { %1674 = vrot.lane.b32.xlu2 %v1620_v29, %s3791_s14  ;;  %1542 = vrot.lane.b32.xlu1 %v1488_v7, %s3793_s24  ;;  %v1621_v13 = vrot.slane %v1424_v17, 2 }
 0x1b3   : > { %1544 = vrot.lane.b32.xlu0 %v1490_v0, %s3793_s24  ;;  %v4584_v23 = vsel %vm4572_vm11, %v1233_v9, 0.0 }
 0x1b4   : > { %v1133_v14 = vpop.f32.mrf.mxu2  ;;  %v1351_v16 = vrot.slane %v4584_v23, 7  ;;  %v1622_v61 = vsel %vm607_vm1, %v1619_v20, %v1621_v13 }
 0x1b5   : > { %v1183_v57 = vadd.f32 %v1133_v14, %v1039_v22  ;;  %v949_v27 = vpop.f32.mrf.mxu0 }
 0x1b6   : > { %v1044_v28 = vpop.f32.mrf.mxu1  ;;  %v4595_v9 = vsel %vm1335_vm8, 0.0, %v1351_v16 }
 0x1b7   : > { %v1210_v29 = vadd.f32 %v4542_v59, %v1183_v57  ;;  %v1437_v57 = vld [vmem:[%s6129_s3 + $0x28] sm:$0xff]  ;;  %v1623_v12 = vrot.slane %v4595_v9, 2  ;;  %v1491_v13 = vrot.slane %v4595_v9, 1  ;;  %v1045_v15 = vadd.f32 %v1044_v28, %v949_v27 }
 0x1b8   : > { %1853 = vmatpush.msrb.mxu0 %v1437_v57  ;;  %3607 = vmatpush.msra.mxu2 %v1437_v57 }
 0x1b9   : > { %v1234_v33 = vmax.f32 %v1210_v29, 0.0  ;;  %3608 = vmatpush.msra.mxu3 %v1437_v57 }
 0x1ba   : > { %1676 = vrot.lane.b32.xlu1 %v1622_v61, %s3791_s14  ;;  %v4613_v61 = vld [vmem:[%s3923_s23 + $0x138] sm:$0xff] }
 0x1bb   : > { %v4592_v7 = vsel %vm4572_vm11, %v1234_v33, 0.0  ;;  %vm1257_vm11 = vcmp.le.s32.totalorder %v4544_v26, 8 }
 0x1bc   : > { %6202 = vst [vmem:[#allocation24_spill] sm:$0xff] %v4592_v7  ;;  %v1352_v14 = vrot.slane %v4592_v7, 7  ;;  %v1136_v35 = vpop.f32.mrf.mxu2  ;;  %vm4724_vm13 = vmand %vm1257_vm11, %vm1271_vm12  ;;  %vm1273_vm11 = vcmp.gt.s32.totalorder %v4546_v62, 10 }
 0x1bd   : > { %v1184_v17 = vadd.f32 %v1136_v35, %v1042_v36  ;;  %v952_v21 = vpop.f32.mrf.mxu0  ;;  %v4616_v36 = vld [vmem:[%s3923_s23 + $0x140] sm:$0xff] }
 0x1be   : > { %v4604_v33 = vsel %vm1335_vm8, %v1351_v16, %v1352_v14  ;;  %v1425_v20 = vsel %vm1335_vm8, %v1352_v14, 0.0  ;;  %v674_v34 = vrot.slane %v4616_v36, 2 }
 0x1bf   : > { %v1211_v49 = vadd.f32 %v4542_v59, %v1184_v17  ;;  %v1624_v0 = vrot.slane %v4604_v33, 2  ;;  %v1492_v22 = vrot.slane %v4604_v33, 1  ;;  %v1494_v29 = vrot.slane %v1425_v20, 1 }
 0x1c0   : > { %v1626_v55 = vrot.slane %v1425_v20, 2 }
 0x1c1   : > { %v1235_v16 = vmax.f32 %v1211_v49, 0.0  ;;  %v1625_v14 = vsel %vm607_vm1, %v1623_v12, %v1624_v0  ;;  %v1493_v57 = vsel %vm452_vm0, %v1491_v13, %v1492_v22  ;;  %v1495_v17 = vsel %vm452_vm0, %v1492_v22, %v1494_v29  ;;  %v1047_v12 = vpop.f32.mrf.mxu1 }
 0x1c2   : > { %1678 = vrot.lane.b32.xlu0 %v1625_v14, %s3791_s14  ;;  %1546 = vrot.lane.b32.xlu2 %v1493_v57, %s3793_s24  ;;  %v673_v49 = vrot.slane %v4613_v61, 2  ;;  %v518_v13 = vrot.slane %v4613_v61, 1  ;;  %v6172_v14 = vrot.slane %v4616_v36, 1  ;;  %v1048_v7 = vadd.f32 %v1047_v12, %v952_v21 }
 0x1c3   : > { %1548 = vrot.lane.b32.xlu1 %v1495_v17, %s3793_s24  ;;  %v4634_v63 = vsel %vm4620_vm14, %v1235_v16, 0.0  ;;  %v1627_v20 = vsel %vm607_vm1, %v1624_v0, %v1626_v55 }
 0x1c4   : > { %v1139_v48 = vpop.f32.mrf.mxu2  ;;  %v1354_v27 = vrot.slane %v4634_v63, 7  ;;  %v675_v57 = vsel %vm607_vm1, %v673_v49, %v674_v34  ;;  %v520_v17 = vsel %vm452_vm0, %v518_v13, %v6172_v14  ;;  %v1012_v13 = vadd.f32 %v4474_v18, %v4472_v24 }
 0x1c5   : > { %v1185_v22 = vadd.f32 %v1139_v48, %v1045_v15  ;;  %v955_v29 = vpop.f32.mrf.mxu0 }
 0x1c6   : > { %v4653_v15 = vsel %vm1335_vm8, 0.0, %v1354_v27  ;;  %v1174_v18 = vadd.f32 %v4490_v53, %v1012_v13 }
 0x1c7   : > { %v1212_v28 = vadd.f32 %v4542_v59, %v1185_v22  ;;  %v1496_v24 = vrot.slane %v4653_v15, 1 }
 0x1c9   : > { %v1236_v16 = vmax.f32 %v1212_v28, 0.0  ;;  %v1175_v28 = vadd.f32 %v4502_v3, %v1015_v45  ;;  %v1050_v21 = vpop.f32.mrf.mxu1  ;;  %v390_v3 = vld [vmem:[%s3923_s23 + $0x148] sm:$0x3]  ;;  %s337_s23 = sand.u32 1, %s3765_s10  }
 0x1ca   : > { %730 = vrot.lane.b32.xlu2 %v675_v57, %s3792_s19  ;;  %v1628_v57 = vrot.slane %v4653_v15, 2  ;;  %v676_v0 = vrot.slane %v390_v3, 2  ;;  %s3393_s28 = sshll.u32 %s337_s23, 7 }
 0x1cb   : > { %v4649_v48 = vsel %vm4620_vm14, %v1236_v16, 0.0  ;;  %575 = vrot.lane.b32.xlu1 %v520_v17, %s3791_s14  ;;  %v1202_v13 = vadd.f32 %v4542_v59, %v1175_v28  ;;  %vm1258_vm14 = vcmp.le.s32.totalorder %v4544_v26, 9  ;;  %s6005_s29 = scalar_lea.vmem [#allocation2], %s3393_s28  ;;  %s3292_s28 = scalar_lea.sflag [#allocation3], %s337_s23 }
 0x1cc   : > { %6205 = vst [vmem:[#allocation25_spill] sm:$0xff] %v4649_v48  ;;  %v1355_v49 = vrot.slane %v4649_v48, 7  ;;  %v1142_v22 = vpop.f32.mrf.mxu2  ;;  %vm4786_vm5 = vmand %vm1258_vm14, %vm1272_vm15  ;;  %vm1263_vm14 = vcmp.gt.s32.totalorder %v4546_v62, 0  ;;  %s3307_s12 = sshll.u32 %s6005_s29, 4  ;;  %s3308_s12 = int_to_ptr.vmem [resolvable:$true] %s3307_s12 }
 0x1cd   : > { %v1186_v46 = vadd.f32 %v1142_v22, %v1048_v7  ;;  %v958_v35 = vpop.f32.mrf.mxu0 }
 0x1ce   : > { %v4662_v12 = vsel %vm1335_vm8, %v1354_v27, %v1355_v49  ;;  %v1426_v53 = vsel %vm1335_vm8, %v1355_v49, 0.0  ;;  %v1226_v49 = vmax.f32 %v1202_v13, 0.0 }
 0x1cf   : > { %v1213_v17 = vadd.f32 %v4542_v59, %v1186_v46  ;;  %v1629_v16 = vrot.slane %v4662_v12, 2  ;;  %v1497_v45 = vrot.slane %v4662_v12, 1  ;;  %v1499_v48 = vrot.slane %v1426_v53, 1 }
 0x1d1   : > { %v1237_v7 = vmax.f32 %v1213_v17, 0.0  ;;  %v1630_v22 = vsel %vm607_vm1, %v1628_v57, %v1629_v16  ;;  %v1498_v27 = vsel %vm452_vm0, %v1496_v24, %v1497_v45  ;;  %v1051_v17 = vadd.f32 %v1050_v21, %v955_v29 }
 0x1d2   : > { %1680 = vrot.lane.b32.xlu2 %v1627_v20, %s3791_s14  ;;  %1550 = vrot.lane.b32.xlu0 %v1498_v27, %s3793_s24  ;;  %v1201_v57 = vadd.f32 %v4542_v59, %v1174_v18  ;;  %v677_v29 = vsel %vm607_vm1, %v674_v34, %v676_v0  ;;  %v1053_v20 = vpop.f32.mrf.mxu1 }
 0x1d3   : > { %1682 = vrot.lane.b32.xlu1 %v1630_v22, %s3791_s14  ;;  %v4688_v24 = vsel %vm4676_vm6, %v1237_v7, 0.0  ;;  %v1500_v7 = vsel %vm452_vm0, %v1497_v45, %v1499_v48  ;;  %v1054_v13 = vadd.f32 %v1053_v20, %v958_v35 }
 0x1d4   : > { %v1145_v55 = vpop.f32.mrf.mxu2  ;;  %v1357_v21 = vrot.slane %v4688_v24, 7  ;;  %v1225_v18 = vmax.f32 %v1201_v57, 0.0 }
 0x1d5   : > { %v1187_v14 = vadd.f32 %v1145_v55, %v1051_v17  ;;  %v961_v22 = vpop.f32.mrf.mxu0  ;;  %v521_v17 = vrot.slane %v390_v3, 1  ;;  %v4698_v55 = vsel %vm1276_vm10, %v1226_v49, 0.0  ;;  %v6208_v3 = vrot.slane %v4616_v36, 1 }
 0x1d6   : > { %v4706_v57 = vsel %vm1335_vm8, 0.0, %v1357_v21  ;;  %v1289_v48 = vsel %vm1276_vm10, %v1225_v18, 0.0  ;;  %vm1259_vm10 = vcmp.le.s32.totalorder %v4544_v26, 10 }
 0x1d7   : > { %v1214_v28 = vadd.f32 %v4542_v59, %v1187_v14  ;;  %v522_v49 = vsel %vm452_vm0, %v6208_v3, %v521_v17  ;;  %vm4849_vm12 = vmand %vm1259_vm10, %vm1273_vm11  ;;  %vm1779_vm10 = vcmask 195584   ;;  %vm1274_vm11 = vcmp.gt.s32.totalorder %v4546_v62, 11 }
 0x1d9   : > { %v1238_v27 = vmax.f32 %v1214_v28, 0.0  ;;  %v1631_v28 = vrot.slane %v1426_v53, 2  ;;  %v1339_v53 = vrot.slane %v1289_v48, 7  ;;  %v1057_v48 = vadd.f32 %v4414_v51, %v961_v22 }
 0x1da   : > { %1552 = vrot.lane.b32.xlu2 %v1500_v7, %s3793_s24  ;;  %732 = vrot.lane.b32.xlu0 %v677_v29, %s3792_s19  ;;  %v6174_v7 = vrot.slane %v4698_v55, 7  ;;  %v1501_v29 = vrot.slane %v4706_v57, 1  ;;  %v1633_v22 = vrot.slane %v4706_v57, 2 }
 0x1db   : > { %v4702_v34 = vsel %vm4676_vm6, %v1238_v27, 0.0  ;;  %v1632_v27 = vsel %vm607_vm1, %v1629_v16, %v1631_v28  ;;  %vm1251_vm6 = vcmp.le.s32.totalorder %v4544_v26, 2 }
 0x1dc   : > { %v1358_v14 = vrot.slane %v4702_v34, 7  ;;  %v1148_v0 = vpop.f32.mrf.mxu2  ;;  %vm1277_vm9 = vmand %vm1251_vm6, %vm1265_vm7  ;;  %vm1266_vm6 = vcmp.gt.s32.totalorder %v4546_v62, 3 }
 0x1dd   : > { %v1188_v45 = vadd.f32 %v1148_v0, %v1054_v13  ;;  %v964_v17 = vpop.f32.mrf.mxu0  ;;  %v4731_v0 = vsel %vm1335_vm8, %v1339_v53, %v6174_v7 }
 0x1de   : > { %v4713_v35 = vsel %vm1335_vm8, %v1357_v21, %v1358_v14  ;;  %v1427_v7 = vsel %vm1335_vm8, %v1358_v14, 0.0  ;;  %v1018_v14 = vadd.f32 %v4494_v11, %v4492_v50 }
 0x1df   : > { %v1215_v46 = vadd.f32 %v4542_v59, %v1188_v45  ;;  %v1502_v20 = vrot.slane %v4713_v35, 1  ;;  %v4736_v45 = vsel %vm1335_vm8, 0.0, %v1339_v53 }
 0x1e0   : > { %v1603_v51 = vrot.slane %v4736_v45, 2  ;;  %v1176_v50 = vadd.f32 %v4514_v5, %v1018_v14  ;;  %v1436_v14 = vld [vmem:[%s6129_s3 + $0x20] sm:$0xff] }
 0x1e1   : > { %v1239_v18 = vmax.f32 %v1215_v46, 0.0  ;;  %v1503_v13 = vsel %vm452_vm0, %v1501_v29, %v1502_v20  ;;  %v1634_v46 = vrot.slane %v4713_v35, 2  ;;  %v1472_v29 = vrot.slane %v4731_v0, 1  ;;  %1854 = vmatpush.msrb.mxu0 %v1436_v14  ;;  %3610 = vmatpush.msra.mxu3 %v1436_v14 }
 0x1e2   : > { %577 = vrot.lane.b32.xlu2 %v522_v49, %s3791_s14  ;;  %1684 = vrot.lane.b32.xlu0 %v1632_v27, %s3791_s14  ;;  %v6176_v49 = vrot.slane %v4731_v0, 2 }
 0x1e3   : > { %1554 = vrot.lane.b32.xlu1 %v1503_v13, %s3793_s24  ;;  %v4740_v3 = vsel %vm4724_vm13, %v1239_v18, 0.0  ;;  %v1471_v13 = vrot.slane %v4736_v45, 1  ;;  %3609 = vmatpush.msra.mxu2 %v1436_v14 }
 0x1e4   : > { %v1151_v16 = vpop.f32.mrf.mxu2  ;;  %6211 = vst [vmem:[#allocation26_spill] sm:$0xff] %v4740_v3  ;;  %v1360_v53 = vrot.slane %v4740_v3, 7  ;;  %v1605_v18 = vsel %vm607_vm1, %v1603_v51, %v6176_v49  ;;  %v1060_v3 = vadd.f32 %v4422_v30, %v964_v17  ;;  %v1021_v51 = vadd.f32 %v4506_v47, %v4504_v19 }
 0x1e5   : > { %v1189_v28 = vadd.f32 %v1151_v16, %v1057_v48  ;;  %v1635_v16 = vsel %vm607_vm1, %v1633_v22, %v1634_v46  ;;  %v1504_v17 = vrot.slane %v1427_v7, 1 }
 0x1e6   : > { %v4770_v49 = vsel %vm1335_vm8, 0.0, %v1360_v53  ;;  %v1177_v21 = vadd.f32 %v4523_v32, %v1021_v51  ;;  %v6214_v51 = vrot.slane %v4698_v55, 7 }
 0x1e7   : > { %v1216_v27 = vadd.f32 %v4542_v59, %v1189_v28  ;;  %v1473_v28 = vsel %vm452_vm0, %v1471_v13, %v1472_v29  ;;  %v1636_v13 = vrot.slane %v1427_v7, 2  ;;  %v1506_v47 = vrot.slane %v4770_v49, 1 }
 0x1e8   : > { %v1204_v5 = vadd.f32 %v4542_v59, %v1177_v21 }
 0x1e9   : > { %v1240_v48 = vmax.f32 %v1216_v27, 0.0 }
 0x1ea   : > { %1662 = vrot.lane.b32.xlu0 %v1605_v18, %s3791_s14  ;;  %1686 = vrot.lane.b32.xlu2 %v1635_v16, %s3791_s14  ;;  %v967_v18 = vpop.f32.mrf.mxu0 }
 0x1eb   : > { %v4763_v27 = vsel %vm4724_vm13, %v1240_v48, 0.0  ;;  %1530 = vrot.lane.b32.xlu1 %v1473_v28, %s3793_s24  ;;  %vm1249_vm13 = vcmp.le.s32.totalorder %v4544_v26, 0 }
 0x1ec   : > { %v1361_v22 = vrot.slane %v4763_v27, 7  ;;  %v1154_v16 = vpop.f32.mrf.mxu2  ;;  %vm1275_vm15 = vmand %vm1249_vm13, %vm1263_vm14 }
 0x1ed   : > { %v1190_v30 = vadd.f32 %v1154_v16, %v1060_v3  ;;  %v1505_v3 = vsel %vm452_vm0, %v1502_v20, %v1504_v17  ;;  %v1421_v16 = vsel %vm1335_vm8, %v6214_v51, 0.0  ;;  %v1063_v20 = vadd.f32 %v4430_v39, %v967_v18 }
 0x1ee   : > { %v4777_v48 = vsel %vm1335_vm8, %v1360_v53, %v1361_v22  ;;  %v1637_v53 = vsel %vm607_vm1, %v1634_v46, %v1636_v13  ;;  %v1474_v13 = vrot.slane %v1421_v16, 1  ;;  %v1606_v18 = vrot.slane %v1421_v16, 2 }
 0x1ef   : > { %v1217_v19 = vadd.f32 %v4542_v59, %v1190_v30  ;;  %v1507_v28 = vrot.slane %v4777_v48, 1  ;;  %v1203_v30 = vadd.f32 %v4542_v59, %v1176_v50  ;;  %v1639_v21 = vrot.slane %v4777_v48, 2 }
 0x1f0   : > { %v1638_v50 = vrot.slane %v4770_v49, 2  ;;  %v1475_v51 = vsel %vm452_vm0, %v1472_v29, %v1474_v13  ;;  %v6216_v16 = vrot.slane %v4731_v0, 2 }
 0x1f1   : > { %v1241_v11 = vmax.f32 %v1217_v19, 0.0  ;;  %v1508_v32 = vsel %vm452_vm0, %v1506_v47, %v1507_v28  ;;  %v1228_v19 = vmax.f32 %v1204_v5, 0.0  ;;  %v1428_v5 = vsel %vm1335_vm8, %v1361_v22, 0.0 }
 0x1f2   : > { %1556 = vrot.lane.b32.xlu0 %v1505_v3, %s3793_s24  ;;  %1558 = vrot.lane.b32.xlu2 %v1508_v32, %s3793_s24  ;;  %v970_v39 = vpop.f32.mrf.mxu0  ;;  %v1509_v22 = vrot.slane %v1428_v5, 1 }
 0x1f3   : > { %1688 = vrot.lane.b32.xlu1 %v1637_v53, %s3791_s14  ;;  %v4805_v55 = vsel %vm4786_vm5, %v1241_v11, 0.0  ;;  %v1227_v11 = vmax.f32 %v1203_v30, 0.0  ;;  %v1640_v53 = vsel %vm607_vm1, %v1638_v50, %v1639_v21  ;;  %v4823_v14 = vsel %vm1277_vm9, %v1228_v19, 0.0 }
 0x1f4   : > { %v1157_v17 = vpop.f32.mrf.mxu2  ;;  %6215 = vst [vmem:[#allocation27_spill] sm:$0xff] %v4805_v55  ;;  %v1363_v3 = vrot.slane %v4805_v55, 7  ;;  %v1066_v30 = vadd.f32 %v4436_v40, %v970_v39  ;;  %v1343_v19 = vrot.slane %v4823_v14, 7  ;;  %v1641_v40 = vrot.slane %v1428_v5, 2 }
 0x1f5   : > { %v1191_v46 = vadd.f32 %v1157_v17, %v1063_v20  ;;  %v1607_v20 = vsel %vm607_vm1, %v6216_v16, %v1606_v18  ;;  %v4835_v18 = vsel %vm1277_vm9, %v1227_v11, 0.0  ;;  %v1510_v16 = vsel %vm452_vm0, %v1507_v28, %v1509_v22 }
 0x1f6   : > { %v4832_v29 = vsel %vm1335_vm8, 0.0, %v1363_v3  ;;  %v1342_v11 = vrot.slane %v4835_v18, 7  ;;  %v1009_v28 = vadd.f32 %v4464_v56, %v4462_v1  ;;  %v1435_v1 = vld [vmem:[%s6129_s3 + $0x18] sm:$0xff]  ;;  %vm1730_vm9 = vcmask 64512  }
 0x1f7   : > { %v1218_v47 = vadd.f32 %v4542_v59, %v1191_v46  ;;  %v1511_v50 = vrot.slane %v4832_v29, 1  ;;  %3612 = vmatpush.msra.mxu3 %v1435_v1  ;;  %1855 = vmatpush.msrb.mxu0 %v1435_v1 }
 0x1f8   : > { %v4866_v22 = vsel %vm1335_vm8, 0.0, %v1342_v11  ;;  %3611 = vmatpush.msra.mxu2 %v1435_v1 }
 0x1f9   : > { %v1242_v32 = vmax.f32 %v1218_v47, 0.0 }
 0x1fa   : > { %1690 = vrot.lane.b32.xlu0 %v1640_v53, %s3791_s14  ;;  %1532 = vrot.lane.b32.xlu2 %v1475_v51, %s3793_s24  ;;  %v973_v53 = vpop.f32.mrf.mxu0 }
 0x1fb   : > { %v4828_v17 = vsel %vm4786_vm5, %v1242_v32, 0.0  ;;  %1664 = vrot.lane.b32.xlu1 %v1607_v20, %s3791_s14  ;;  %vm1252_vm5 = vcmp.le.s32.totalorder %v4544_v26, 3 }
 0x1fc   : > { %6217 = vst [vmem:[#allocation28_spill] sm:$0xff] %v4828_v17  ;;  %v1364_v46 = vrot.slane %v4828_v17, 7  ;;  %v1160_v13 = vpop.f32.mrf.mxu2  ;;  %vm1278_vm7 = vmand %vm1252_vm5, %vm1266_vm6 }
 0x1fd   : > { %v1192_v47 = vadd.f32 %v1160_v13, %v1066_v30  ;;  %v4859_v30 = vsel %vm1335_vm8, %v1342_v11, %v1343_v19  ;;  %v1069_v13 = vadd.f32 %v4442_v44, %v973_v53  ;;  %v1006_v44 = vadd.f32 %v4453_v58, %v4451_v31 }
 0x1fe   : > { %v4840_v7 = vsel %vm1335_vm8, %v1363_v3, %v1364_v46  ;;  %v1642_v3 = vsel %vm607_vm1, %v1639_v21, %v1641_v40  ;;  %v1173_v53 = vadd.f32 %v4480_v25, %v1009_v28  ;;  %v1476_v11 = vrot.slane %v4866_v22, 1 }
 0x1ff   : > { %v1219_v39 = vadd.f32 %v4542_v59, %v1192_v47  ;;  %v1512_v32 = vrot.slane %v4840_v7, 1  ;;  %v1643_v31 = vrot.slane %v4832_v29, 2 }
 0x200   : > { %v1200_v28 = vadd.f32 %v4542_v59, %v1173_v53  ;;  %v1027_v53 = vadd.f32 %v4527_v37, %v4525_v41 }
 0x201   : > { %v1243_v51 = vmax.f32 %v1219_v39, 0.0  ;;  %v1513_v20 = vsel %vm452_vm0, %v1511_v50, %v1512_v32  ;;  %v1477_v39 = vrot.slane %v4859_v30, 1  ;;  %v1609_v50 = vrot.slane %v4859_v30, 2 }
 0x202   : > { %1560 = vrot.lane.b32.xlu0 %v1510_v16, %s3793_s24  ;;  %1562 = vrot.lane.b32.xlu2 %v1513_v20, %s3793_s24  ;;  %v1644_v16 = vrot.slane %v4840_v7, 2  ;;  %v1172_v20 = vadd.f32 %v4470_v52, %v1006_v44  ;;  %v1429_v52 = vsel %vm1335_vm8, %v1364_v46, 0.0  ;;  %v1224_v46 = vmax.f32 %v1200_v28, 0.0 }
 0x203   : > { %1692 = vrot.lane.b32.xlu1 %v1642_v3, %s3791_s14  ;;  %v1307_v21 = vsel %vm4849_vm12, %v1243_v51, 0.0  ;;  %v1608_v51 = vrot.slane %v4866_v22, 2  ;;  %v1478_v25 = vsel %vm452_vm0, %v1476_v11, %v1477_v39  ;;  %v1646_v11 = vrot.slane %v1429_v52, 2 }
 0x204   : > { %v1163_v47 = vpop.f32.mrf.mxu2  ;;  %v1366_v3 = vrot.slane %v1307_v21, 7 }
 0x205   : > { %v1193_v40 = vadd.f32 %v1163_v47, %v1069_v13  ;;  %v1610_v13 = vsel %vm607_vm1, %v1608_v51, %v1609_v50  ;;  %v1645_v47 = vsel %vm607_vm1, %v1643_v31, %v1644_v16  ;;  %v1024_v51 = vadd.f32 %v4518_v2, %v4516_v4 }
 0x206   : > { %v4900_v44 = vsel %vm1335_vm8, 0.0, %v1366_v3  ;;  %v4921_v2 = vsel %vm1275_vm15, %v1224_v46, 0.0 }
 0x207   : > { %v1220_v56 = vadd.f32 %v4542_v59, %v1193_v40  ;;  %v1199_v40 = vadd.f32 %v4542_v59, %v1172_v20  ;;  %v1179_v20 = vadd.f32 %v4532_v38, %v1027_v53  ;;  %v1516_v31 = vrot.slane %v4900_v44, 1 }
 0x208   : > { %v1178_v37 = vadd.f32 %v4530_v10, %v1024_v51  ;;  %v1422_v10 = vsel %vm1335_vm8, %v1343_v19, 0.0  ;;  %v1648_v53 = vrot.slane %v4900_v44, 2 }
 0x209   : > { %v1244_v58 = vmax.f32 %v1220_v56, 0.0  ;;  %v1514_v56 = vrot.slane %v1429_v52, 1  ;;  %v1223_v41 = vmax.f32 %v1199_v40, 0.0  ;;  %v1206_v38 = vadd.f32 %v4542_v59, %v1179_v20 }
 0x20a   : > { %1534 = vrot.lane.b32.xlu0 %v1478_v25, %s3793_s24  ;;  %1666 = vrot.lane.b32.xlu2 %v1610_v13, %s3791_s14  ;;  %v1647_v13 = vsel %vm607_vm1, %v1644_v16, %v1646_v11  ;;  %v1479_v40 = vrot.slane %v1422_v10, 1 }
 0x20b   : > { %v1308_v21 = vsel %vm4849_vm12, %v1244_v58, 0.0  ;;  %1694 = vrot.lane.b32.xlu1 %v1645_v47, %s3791_s14  ;;  %v1515_v25 = vsel %vm452_vm0, %v1512_v32, %v1514_v56  ;;  %v1287_v16 = vsel %vm1275_vm15, %v1223_v41, 0.0 }
 0x20c   : > { %v1367_v1 = vrot.slane %v1308_v21, 7  ;;  %v1675_v32 = vpop.permute.xlu2 %1674  ;;  %v1337_v21 = vrot.slane %v4921_v2, 7  ;;  %v1336_v56 = vrot.slane %v1287_v16, 7 }
 0x20e   : > { %v4907_v5 = vsel %vm1335_vm8, %v1366_v3, %v1367_v1  ;;  %v1430_v4 = vsel %vm1335_vm8, %v1367_v1, 0.0  ;;  %v1205_v3 = vadd.f32 %v4542_v59, %v1178_v37  ;;  %v1230_v1 = vmax.f32 %v1206_v38, 0.0 }
 0x20f   : > { %v1517_v58 = vrot.slane %v4907_v5, 1  ;;  %v1649_v47 = vrot.slane %v4907_v5, 2  ;;  %v1519_v52 = vrot.slane %v1430_v4, 1  ;;  %v1480_v59 = vsel %vm452_vm0, %v1477_v39, %v1479_v40 }
 0x210   : > { %v1229_v11 = vmax.f32 %v1205_v3, 0.0  ;;  %v4942_v51 = vsel %vm1335_vm8, %v1336_v56, %v1337_v21  ;;  %v4944_v20 = vsel %vm1278_vm7, %v1230_v1, 0.0  ;;  %v4948_v41 = vsel %vm1335_vm8, 0.0, %v1336_v56 }
 0x211   : > { %v1518_v28 = vsel %vm452_vm0, %v1516_v31, %v1517_v58  ;;  %v1650_v19 = vsel %vm607_vm1, %v1648_v53, %v1649_v47  ;;  %v1520_v46 = vsel %vm452_vm0, %v1517_v58, %v1519_v52  ;;  %v1611_v37 = vrot.slane %v1422_v10, 2 }
 0x212   : > { %1564 = vrot.lane.b32.xlu0 %v1515_v25, %s3793_s24  ;;  %1696 = vrot.lane.b32.xlu2 %v1647_v13, %s3791_s14  ;;  %v4950_v58 = vsel %vm1278_vm7, %v1229_v11, 0.0  ;;  %v1467_v25 = vrot.slane %v4942_v51, 1  ;;  %v1346_v13 = vrot.slane %v4944_v20, 7  ;;  %v1466_v39 = vrot.slane %v4948_v41, 1 }
 0x213   : > { %1566 = vrot.lane.b32.xlu1 %v1518_v28, %s3793_s24  ;;  %v1651_v28 = vrot.slane %v1430_v4, 2  ;;  %v1345_v2 = vrot.slane %v4950_v58, 7  ;;  %v1612_v38 = vsel %vm607_vm1, %v1609_v50, %v1611_v37  ;;  %v1599_v56 = vrot.slane %v4942_v51, 2 }
 0x214   : > { %v1468_v16 = vsel %vm452_vm0, %v1466_v39, %v1467_v25  ;;  %v1420_v39 = vsel %vm1335_vm8, %v1337_v21, 0.0 }
 0x215   : > { %v1652_v10 = vsel %vm607_vm1, %v1649_v47, %v1651_v28  ;;  %v4964_v3 = vsel %vm1335_vm8, %v1345_v2, %v1346_v13  ;;  %v4968_v52 = vsel %vm1335_vm8, 0.0, %v1345_v2  ;;  %v1423_v2 = vsel %vm1335_vm8, %v1346_v13, 0.0 }
 0x216   : > { %v1482_v1 = vrot.slane %v4964_v3, 1  ;;  %v1614_v53 = vrot.slane %v4964_v3, 2  ;;  %v1481_v11 = vrot.slane %v4968_v52, 1 }
 0x21a   : > { %1698 = vrot.lane.b32.xlu0 %v1650_v19, %s3791_s14  ;;  %1568 = vrot.lane.b32.xlu2 %v1520_v46, %s3793_s24  ;;  %v1613_v19 = vrot.slane %v4968_v52, 2  ;;  %v1598_v46 = vrot.slane %v4948_v41, 2 }
 0x21b   : > { %1536 = vrot.lane.b32.xlu1 %v1480_v59, %s3793_s24 }
 0x21c   : > { %v1547_v31 = vpop.permute.xlu2 %1546  ;;  %v1615_v37 = vsel %vm607_vm1, %v1613_v19, %v1614_v53  ;;  %v1600_v28 = vsel %vm607_vm1, %v1598_v46, %v1599_v56 }
 0x222   : > { %1668 = vrot.lane.b32.xlu0 %v1612_v38, %s3791_s14  ;;  %1526 = vrot.lane.b32.xlu2 %v1468_v16, %s3793_s24 }
 0x223   : > { %1700 = vrot.lane.b32.xlu1 %v1652_v10, %s3791_s14 }
 0x224   : > { %v1543_v4 = vpop.permute.xlu1 %1542  ;;  %v731_v50 = vpop.permute.xlu2 %730 }
 0x225   : > { %v1739_v40 = vsel %vm1730_vm9, %v4558_v60, %v1543_v4  ;;  %v1434_v60 = vld [vmem:[%s6129_s3 + $0x10] sm:$0xff]  ;;  %v1545_v59 = vpop.permute.xlu0 %1544  ;;  %v1469_v4 = vrot.slane %v1420_v39, 1 }
 0x226   : > { %v4975_v47 = vsel %vm762_vm2, %v1739_v40, %v1675_v32  ;;  %1936 = vmatpush.msrb.mxu3 %v1434_v60  ;;  %v1483_v32 = vsel %vm452_vm0, %v1481_v11, %v1482_v1  ;;  %v1740_v38 = vsel %vm1730_vm9, %v4564_v42, %v1545_v59  ;;  %v1484_v40 = vrot.slane %v1423_v2, 1 }
 0x227   : > { %3475 = vmatmul.msk.f32.vlgmr.msra.gmra.mxu3 %vm1779_vm10, %v4975_v47  ;;  %v1601_v11 = vrot.slane %v1420_v39, 2  ;;  %v1470_v21 = vsel %vm452_vm0, %v1467_v25, %v1469_v4  ;;  %v1741_v60 = vsel %vm1730_vm9, %v4595_v9, %v1547_v31 }
 0x228   : > { %v1485_v13 = vsel %vm452_vm0, %v1482_v1, %v1484_v40 }
 0x229   : > { %v1602_v42 = vsel %vm607_vm1, %v1599_v56, %v1601_v11 }
 0x22a   : > { %1538 = vrot.lane.b32.xlu0 %v1483_v32, %s3793_s24  ;;  %1670 = vrot.lane.b32.xlu2 %v1615_v37, %s3791_s14  ;;  %v1616_v37 = vrot.slane %v1423_v2, 2 }
 0x22b   : > { %1658 = vrot.lane.b32.xlu1 %v1600_v28, %s3791_s14 }
 0x22c   : > { %v1677_v16 = vpop.permute.xlu1 %1676  ;;  %v1681_v19 = vpop.permute.xlu2 %1680  ;;  %v1617_v1 = vsel %vm607_vm1, %v1614_v53, %v1616_v37 }
 0x22d   : > { %v4997_v10 = vsel %vm762_vm2, %v1740_v38, %v1677_v16 }
 0x22f   : > { %3476 = vmatmul.msk.f32.gmra.mxu3 %vm1779_vm10, %v4997_v10 }
 0x232   : > { %1528 = vrot.lane.b32.xlu0 %v1470_v21, %s3793_s24  ;;  %1540 = vrot.lane.b32.xlu2 %v1485_v13, %s3793_s24 }
 0x233   : > { %1660 = vrot.lane.b32.xlu1 %v1602_v42, %s3791_s14 }
 0x234   : > { %v1679_v46 = vpop.permute.xlu0 %1678  ;;  %v1553_v25 = vpop.permute.xlu2 %1552 }
 0x235   : > { %v1549_v59 = vpop.permute.xlu1 %1548  ;;  %v5010_v32 = vsel %vm762_vm2, %v1741_v60, %v1679_v46  ;;  %v1744_v11 = vsel %vm1730_vm9, %v4662_v12, %v1553_v25 }
 0x236   : > { %v1742_v56 = vsel %vm1730_vm9, %v4604_v33, %v1549_v59 }
 0x237   : > { %3477 = vmatmul.msk.f32.gmra.mxu3 %vm1779_vm10, %v5010_v32  ;;  %v5021_v31 = vsel %vm762_vm2, %v1742_v56, %v1681_v19 }
 0x23a   : > { %1672 = vrot.lane.b32.xlu0 %v1617_v1, %s3791_s14 }
 0x23c   : > { %v578_v53 = vpop.permute.xlu2 %577 }
 0x23d   : > { %v576_v28 = vpop.permute.xlu1 %575 }
 0x23e   : > { %v789_v9 = vsel %vm762_vm2, %v4613_v61, %v576_v28  ;;  %v790_v61 = vsel %vm762_vm2, %v4616_v36, %v578_v53 }
 0x23f   : > { %v818_v39 = vsel %vm791_vm3, %v789_v9, %v731_v50  ;;  %3478 = vmatmul.msk.f32.gmra.mxu3 %vm1779_vm10, %v5021_v31 }
 0x240   : > { %3467 = vmatmul.msk.f32.gmra.mxu2 %vm820_vm4, %v818_v39 }
 0x244   : > { %v1551_v2 = vpop.permute.xlu0 %1550  ;;  %v1687_v4 = vpop.permute.xlu2 %1686 }
 0x245   : > { %v1743_v38 = vsel %vm1730_vm9, %v4653_v15, %v1551_v2  ;;  %v1683_v33 = vpop.permute.xlu1 %1682  ;;  %v1433_v15 = vld [vmem:[%s6129_s3 + $0x8] sm:$0xff] }
 0x246   : > { %v5030_v16 = vsel %vm762_vm2, %v1743_v38, %v1683_v33  ;;  %1937 = vmatpush.msrb.mxu3 %v1433_v15 }
 0x247   : > { %3479 = vmatmul.msk.f32.gmra.mxu3 %vm1779_vm10, %v5030_v16 }
 0x24c   : > { %v733_v50 = vpop.permute.xlu0 %732  ;;  %v1559_v36 = vpop.permute.xlu2 %1558 }
 0x24d   : > { %v819_v40 = vsel %vm791_vm3, %v790_v61, %v733_v50  ;;  %v1747_v9 = vsel %vm1730_vm9, %v4770_v49, %v1559_v36  ;;  %v1432_v49 = vld [vmem:[%s6129_s3] sm:$0xff] }
 0x24e   : > { %3468 = vmatmul.msk.f32.gmra.mxu2 %vm820_vm4, %v819_v40  ;;  %1938 = vmatpush.msrb.mxu3 %v1432_v49  ;;  %v1440_v40 = vld [vmem:[%s6129_s3 + $0x40] sm:$0xff]  ;;  %vm1260_vm4 = vcmp.le.s32.totalorder %v4544_v26, 11 }
 0x24f   : > { %2019 = vmatpush.msra.mxu0 %v1440_v40  ;;  %vm1286_vm12 = vmand %vm1260_vm4, %vm1274_vm11 }
 0x254   : > { %v1685_v19 = vpop.permute.xlu0 %1684  ;;  %v1533_v25 = vpop.permute.xlu2 %1532 }
 0x255   : > { %v1555_v21 = vpop.permute.xlu1 %1554  ;;  %v5044_v13 = vsel %vm762_vm2, %v1744_v11, %v1685_v19  ;;  %v1734_v53 = vsel %vm1730_vm9, %v4731_v0, %v1533_v25 }
 0x256   : > { %3480 = vmatmul.msk.f32.gmra.mxu3 %vm1779_vm10, %v5044_v13  ;;  %v1745_v42 = vsel %vm1730_vm9, %v4706_v57, %v1555_v21 }
 0x257   : > { %v5051_v59 = vsel %vm762_vm2, %v1745_v42, %v1687_v4 }
 0x25c   : > { %v1663_v60 = vpop.permute.xlu0 %1662 }
 0x25d   : > { %v1531_v46 = vpop.permute.xlu1 %1530 }
 0x25e   : > { %v1733_v12 = vsel %vm1730_vm9, %v4736_v45, %v1531_v46  ;;  %3481 = vmatmul.msk.f32.gmra.mxu3 %vm1779_vm10, %v5051_v59  ;;  %v1563_v45 = vpop.permute.xlu2 %1562 }
 0x25f   : > { %v5058_v37 = vsel %vm762_vm2, %v1733_v12, %v1663_v60  ;;  %v1749_v11 = vsel %vm1730_vm9, %v4832_v29, %v1563_v45  ;;  %v1439_v60 = vld [vmem:[%s6129_s3 + $0x38] sm:$0xff]  ;;  %v1438_v12 = vld [vmem:[%s6129_s3 + $0x30] sm:$0xff] }
 0x260   : > { %3469 = vmatmul.msk.f32.vlgmr.msrb.gmra.mxu0 %vm1779_vm10, %v5058_v37 }
 0x261   : > { %2020 = vmatpush.msra.mxu0 %v1439_v60 }
 0x263   : > { %2021 = vmatpush.msra.mxu0 %v1438_v12 }
 0x264   : > { %v1557_v1 = vpop.permute.xlu0 %1556 }
 0x265   : > { %v1746_v57 = vsel %vm1730_vm9, %v4713_v35, %v1557_v1  ;;  %v1689_v56 = vpop.permute.xlu1 %1688 }
 0x266   : > { %v5065_v28 = vsel %vm762_vm2, %v1746_v57, %v1689_v56  ;;  %v1667_v0 = vpop.permute.xlu2 %1666 }
 0x267   : > { %3482 = vmatmul.msk.f32.gmra.mxu3 %vm1779_vm10, %v5065_v28 }
 0x26c   : > { %v1691_v39 = vpop.permute.xlu0 %1690 }
 0x26d   : > { %v1665_v2 = vpop.permute.xlu1 %1664  ;;  %v5074_v38 = vsel %vm762_vm2, %v1747_v9, %v1691_v39 }
 0x26e   : > { %v5077_v35 = vsel %vm762_vm2, %v1734_v53, %v1665_v2  ;;  %v1697_v42 = vpop.permute.xlu2 %1696 }
 0x26f   : > { %3470 = vmatmul.msk.f32.gmra.mxu0 %vm1779_vm10, %v5077_v35  ;;  %3483 = vmatmul.msk.f32.gmra.mxu3 %vm1779_vm10, %v5074_v38 }
 0x274   : > { %v1561_v33 = vpop.permute.xlu0 %1560 }
 0x275   : > { %v1748_v61 = vsel %vm1730_vm9, %v4777_v48, %v1561_v33  ;;  %v1693_v50 = vpop.permute.xlu1 %1692 }
 0x276   : > { %v5089_v4 = vsel %vm762_vm2, %v1748_v61, %v1693_v50  ;;  %v1569_v1 = vpop.permute.xlu2 %1568 }
 0x277   : > { %3484 = vmatmul.msk.f32.gmra.mxu3 %vm1779_vm10, %v5089_v4  ;;  %v1752_v2 = vsel %vm1730_vm9, %v4907_v5, %v1569_v1 }
 0x27c   : > { %v1535_v15 = vpop.permute.xlu0 %1534 }
 0x27d   : > { %v1735_v19 = vsel %vm1730_vm9, %v4866_v22, %v1535_v15  ;;  %v1695_v48 = vpop.permute.xlu1 %1694 }
 0x27e   : > { %v1759_v21 = vsel %vm762_vm2, %v1735_v19, %v1667_v0  ;;  %v5102_v36 = vsel %vm762_vm2, %v1749_v11, %v1695_v48  ;;  %v1527_v9 = vpop.permute.xlu2 %1526 }
 0x27f   : > { %3471 = vmatmul.msk.f32.gmra.mxu0 %vm1779_vm10, %v1759_v21  ;;  %3485 = vmatmul.msk.f32.gmra.mxu3 %vm1779_vm10, %v5102_v36  ;;  %v1731_v61 = vsel %vm1730_vm9, %v4948_v41, %v1527_v9 }
 0x284   : > { %v1565_v29 = vpop.permute.xlu0 %1564 }
 0x285   : > { %v1750_v22 = vsel %vm1730_vm9, %v4840_v7, %v1565_v29  ;;  %v1567_v46 = vpop.permute.xlu1 %1566 }
 0x286   : > { %v5116_v25 = vsel %vm762_vm2, %v1750_v22, %v1697_v42  ;;  %v1751_v57 = vsel %vm1730_vm9, %v4900_v44, %v1567_v46 }
 0x287   : > { %3486 = vmatmul.msk.f32.gmra.mxu3 %vm1779_vm10, %v5116_v25 }
 0x28c   : > { %v1699_v56 = vpop.permute.xlu0 %1698 }
 0x28d   : > { %v1537_v45 = vpop.permute.xlu1 %1536  ;;  %v5123_v7 = vsel %vm762_vm2, %v1751_v57, %v1699_v56 }
 0x28e   : > { %v1736_v39 = vsel %vm1730_vm9, %v4859_v30, %v1537_v45  ;;  %v1671_v30 = vpop.permute.xlu2 %1670 }
 0x28f   : > { %3487 = vmatmul.msk.f32.gmra.mxu3 %vm1779_vm10, %v5123_v7 }
 0x294   : > { %v1669_v53 = vpop.permute.xlu0 %1668 }
 0x295   : > { %v1760_v49 = vsel %vm762_vm2, %v1736_v39, %v1669_v53  ;;  %v1701_v33 = vpop.permute.xlu1 %1700 }
 0x296   : > { %3472 = vmatmul.msk.f32.gmra.mxu0 %vm1779_vm10, %v1760_v49  ;;  %v5134_v44 = vsel %vm762_vm2, %v1752_v2, %v1701_v33 }
 0x297   : > { %3488 = vmatmul.msk.f32.gmra.mxu3 %vm1779_vm10, %v5134_v44 }
 0x29c   : > { %v1539_v0 = vpop.permute.xlu0 %1538 }
 0x29d   : > { %v1737_v50 = vsel %vm1730_vm9, %v4968_v52, %v1539_v0  ;;  %v1659_v5 = vpop.permute.xlu1 %1658  ;;  %v1541_v52 = vpop.permute.xlu2 %1540 }
 0x29e   : > { %v1755_v40 = vsel %vm762_vm2, %v1731_v61, %v1659_v5  ;;  %v1761_v15 = vsel %vm762_vm2, %v1737_v50, %v1671_v30  ;;  %v1738_v60 = vsel %vm1730_vm9, %v4964_v3, %v1541_v52  ;;  %v976_v3 = vpop.f32.mrf.mxu0 }
 0x29f   : > { %3473 = vmatmul.msk.f32.gmra.mxu0 %vm1779_vm10, %v1761_v15  ;;  %3489 = vmatmul.msk.f32.vlgmr.msrb.gmra.mxu3 %vm1779_vm10, %v1755_v40  ;;  %v1072_v12 = vadd.f32 %v4449_v43, %v976_v3 }
 0x2a4   : > { %v1529_v11 = vpop.permute.xlu0 %1528 }
 0x2a5   : > { %v1732_v19 = vsel %vm1730_vm9, %v4942_v51, %v1529_v11  ;;  %v1661_v48 = vpop.permute.xlu1 %1660 }
 0x2a6   : > { %v1756_v41 = vsel %vm762_vm2, %v1732_v19, %v1661_v48 }
 0x2a7   : > { %3490 = vmatmul.msk.f32.gmra.mxu3 %vm1779_vm10, %v1756_v41  ;;  %3509 = vmatmul.msk.f32.vlgmr.msra.gmra.mxu0 %vm1779_vm10, %v1759_v21 }
 0x2aa   : > { %v5151_v42 = vpop.f32.mrf.mxu3 }
 0x2ac   : > { %v1673_v29 = vpop.permute.xlu0 %1672 }
 0x2ad   : > { %v1762_v22 = vsel %vm762_vm2, %v1738_v60, %v1673_v29 }
 0x2ae   : > { %3474 = vmatmul.msk.f32.vlgmr.msra.gmra.mxu2 %vm1779_vm10, %v1762_v22 }
 0x2af   : > { %3491 = vmatmul.msk.f32.gmra.mxu3 %vm1779_vm10, %v5058_v37  ;;  %3510 = vmatmul.msk.f32.gmra.mxu0 %vm1779_vm10, %v1760_v49 }
 0x2b2   : > { %v5160_v51 = vpop.f32.mrf.mxu3 }
 0x2b7   : > { %3492 = vmatmul.msk.f32.gmra.mxu3 %vm1779_vm10, %v5077_v35  ;;  %3511 = vmatmul.msk.f32.gmra.mxu0 %vm1779_vm10, %v1761_v15  ;;  %v3694_v35 = vld [vmem:[%s6128_s2] ss:$0 sm:$0xff] }
 0x2ba   : > { %v5165_v46 = vpop.f32.mrf.mxu3 }
 0x2bf   : > { %3493 = vmatmul.msk.f32.gmra.mxu3 %vm1779_vm10, %v1759_v21  ;;  %3512 = vmatmul.msk.f32.gmra.mxu0 %vm1779_vm10, %v1762_v22  ;;  %v979_v21 = vpop.f32.mrf.mxu0 }
 0x2c0   : > { %v1075_v45 = vadd.f32 %v4460_v54, %v979_v21 }
 0x2c2   : > { %v5170_v57 = vpop.f32.mrf.mxu3 }
 0x2c3   : > { %v1166_v1 = vpop.f32.mrf.mxu2 }
 0x2c4   : > { %v1194_v37 = vadd.f32 %v1166_v1, %v1072_v12 }
 0x2c6   : > { %v1221_v56 = vadd.f32 %v3694_v35, %v1194_v37 }
 0x2c7   : > { %3494 = vmatmul.msk.f32.gmra.mxu3 %vm1779_vm10, %v1760_v49  ;;  %3513 = vmatmul.msk.f32.gmra.mxu0 %vm1779_vm10, %v4975_v47 }
 0x2c8   : > { %v1245_v43 = vmax.f32 %v1221_v56, 0.0 }
 0x2ca   : > { %v1309_v9 = vsel %vm1286_vm12, %v1245_v43, 0.0  ;;  %v5184_v39 = vpop.f32.mrf.mxu3  ;;  %v5271_v43 = vstv %s2146_s21 }
 0x2cb   : > { %v1369_v49 = vrot.slane %v1309_v9, 7  ;;  %vm2148_vm13 = vcmp.le.s32.totalorder %v5271_v43, 0  ;;  %vm2149_vm5 = vcmp.le.s32.totalorder %v5271_v43, 1  ;;  %vm2150_vm4 = vcmp.le.s32.totalorder %v5271_v43, 2 }
 0x2cd   : > { %v5190_v62 = vsel %vm1335_vm8, 0.0, %v1369_v49 }
 0x2ce   : > { %v1653_v50 = vrot.slane %v5190_v62, 2  ;;  %v1521_v19 = vrot.slane %v5190_v62, 1 }
 0x2cf   : > { %3495 = vmatmul.msk.f32.gmra.mxu3 %vm1779_vm10, %v1761_v15  ;;  %3514 = vmatmul.msk.f32.gmra.mxu0 %vm1779_vm10, %v4997_v10 }
 0x2d1   : > { %v1169_v53 = vpop.f32.mrf.mxu2 }
 0x2d2   : > { %v1195_v2 = vadd.f32 %v1169_v53, %v1075_v45  ;;  %v5273_v45 = vstv %s2158_s25  ;;  %s3715_s25 = scalar_lea.hbm %s6135_s9, 512 }
 0x2d3   : > { %vm2160_vm14 = vcmp.gt.s32.totalorder %v5273_v45, 0  ;;  %vm2161_vm6 = vcmp.gt.s32.totalorder %v5273_v45, 1  ;;  %vm2162_vm11 = vcmp.gt.s32.totalorder %v5273_v45, 2 }
 0x2d4   : > { %v1222_v33 = vadd.f32 %v3694_v35, %v1195_v2  ;;  %vm5280_vm15 = vmand %vm2148_vm13, %vm2160_vm14  ;;  %vm2151_vm13 = vcmp.le.s32.totalorder %v5271_v43, 3  ;;  %vm2163_vm14 = vcmp.gt.s32.totalorder %v5273_v45, 3 }
 0x2d5   : > { %vm5313_vm7 = vmand %vm2149_vm5, %vm2161_vm6  ;;  %vm2152_vm5 = vcmp.le.s32.totalorder %v5271_v43, 4  ;;  %vm2164_vm6 = vcmp.gt.s32.totalorder %v5273_v45, 4 }
 0x2d6   : > { %v1246_v26 = vmax.f32 %v1222_v33, 0.0 }
 0x2d7   : > { %3496 = vmatmul.msk.f32.gmra.mxu3 %vm1779_vm10, %v1762_v22  ;;  %3515 = vmatmul.msk.f32.gmra.mxu0 %vm1779_vm10, %v5010_v32 }
 0x2d8   : > { %v1310_v0 = vsel %vm1286_vm12, %v1246_v26, 0.0  ;;  %vm5351_vm12 = vmand %vm2150_vm4, %vm2162_vm11  ;;  %vm2153_vm4 = vcmp.le.s32.totalorder %v5271_v43, 5  ;;  %vm2165_vm11 = vcmp.gt.s32.totalorder %v5273_v45, 5 }
 0x2d9   : > { %v1370_v61 = vrot.slane %v1310_v0, 7  ;;  %v5192_v30 = vpop.f32.mrf.mxu3 }
 0x2db   : > { %v5195_v54 = vsel %vm1335_vm8, %v1369_v49, %v1370_v61  ;;  %v1431_v5 = vsel %vm1335_vm8, %v1370_v61, 0.0 }
 0x2dc   : > { %v1654_v40 = vrot.slane %v5195_v54, 2  ;;  %v1522_v15 = vrot.slane %v5195_v54, 1  ;;  %v1524_v11 = vrot.slane %v1431_v5, 1  ;;  %v1656_v29 = vrot.slane %v1431_v5, 2  ;;  %v2308_v5 = vld [vmem:[%s6131_s5 + $0x40] sm:$0xff] }
 0x2dd   : > { %v1857_v12 = vpop.f32.mrf.mxu0  ;;  %2793 = vmatpush.msra.mxu3 %v2308_v5 }
 0x2de   : > { %v1655_v48 = vsel %vm607_vm1, %v1653_v50, %v1654_v40  ;;  %v1525_v41 = vsel %vm452_vm0, %v1522_v15, %v1524_v11  ;;  %v1523_v52 = vsel %vm452_vm0, %v1521_v19, %v1522_v15  ;;  %v1657_v22 = vsel %vm607_vm1, %v1654_v40, %v1656_v29 }
 0x2df   : > { %1702 = vrot.lane.b32.xlu2 %v1655_v48, %s3791_s14  ;;  %1572 = vrot.lane.b32.xlu0 %v1525_v41, %s3793_s24 }
 0x2e0   : > { %1570 = vrot.lane.b32.xlu1 %v1523_v52, %s3793_s24  ;;  %3497 = vmatmul.msk.f32.gmra.mxu3 %vm1779_vm10, %v4975_v47 }
 0x2e1   : > { %3516 = vmatmul.msk.f32.gmra.mxu0 %vm1779_vm10, %v5021_v31  ;;  %v5212_v60 = vpop.f32.mrf.mxu3 }
 0x2e8   : > { %1704 = vrot.lane.b32.xlu1 %v1657_v22, %s3791_s14  ;;  %3498 = vmatmul.msk.f32.gmra.mxu3 %vm1779_vm10, %v4997_v10 }
 0x2e9   : > { %3517 = vmatmul.msk.f32.gmra.mxu0 %vm1779_vm10, %v5030_v16 }
 0x2ea   : > { %v5220_v3 = vpop.f32.mrf.mxu3 }
 0x2ec   : > { %v1860_v1 = vpop.f32.mrf.mxu0 }
 0x2f0   : > { %3499 = vmatmul.msk.f32.gmra.mxu3 %vm1779_vm10, %v5010_v32 }
 0x2f1   : > { %3518 = vmatmul.msk.f32.gmra.mxu0 %vm1779_vm10, %v5044_v13 }
 0x2f2   : > { %v5226_v47 = vpop.f32.mrf.mxu3 }
 0x2f8   : > { %3500 = vmatmul.msk.f32.gmra.mxu3 %vm1779_vm10, %v5021_v31 }
 0x2f9   : > { %3519 = vmatmul.msk.f32.gmra.mxu0 %vm1779_vm10, %v5051_v59 }
 0x2fa   : > { %v5232_v10 = vpop.f32.mrf.mxu3 }
 0x2fc   : > { %v1863_v37 = vpop.f32.mrf.mxu0 }
 0x300   : > { %3501 = vmatmul.msk.f32.gmra.mxu3 %vm1779_vm10, %v5030_v16 }
 0x301   : > { %3520 = vmatmul.msk.f32.gmra.mxu0 %vm1779_vm10, %v5065_v28 }
 0x302   : > { %v5238_v32 = vpop.f32.mrf.mxu3 }
 0x308   : > { %3502 = vmatmul.msk.f32.gmra.mxu3 %vm1779_vm10, %v5044_v13 }
 0x309   : > { %3521 = vmatmul.msk.f32.gmra.mxu0 %vm1779_vm10, %v5074_v38 }
 0x30a   : > { %v5244_v31 = vpop.f32.mrf.mxu3 }
 0x310   : > { %3503 = vmatmul.msk.f32.gmra.mxu3 %vm1779_vm10, %v5051_v59 }
 0x311   : > { %3522 = vmatmul.msk.f32.gmra.mxu0 %vm1779_vm10, %v5089_v4 }
 0x312   : > { %v5250_v16 = vpop.f32.mrf.mxu3 }
 0x313   : > { %v1866_v35 = vpop.f32.mrf.mxu0 }
 0x318   : > { %3504 = vmatmul.msk.f32.gmra.mxu3 %vm1779_vm10, %v5065_v28  ;;  %v5269_v28 = vld [vmem:[%s6130_s4] ss:$0 sm:$0xff] }
 0x319   : > { %3523 = vmatmul.msk.f32.gmra.mxu0 %vm1779_vm10, %v5102_v36 }
 0x31a   : > { %v5256_v13 = vpop.f32.mrf.mxu3 }
 0x31c   : > { %v5258_v56 = vpop.f32.mrf.mxu0 }
 0x320   : > { %3505 = vmatmul.msk.f32.gmra.mxu3 %vm1779_vm10, %v5074_v38 }
 0x321   : > { %3524 = vmatmul.msk.f32.gmra.mxu0 %vm1779_vm10, %v5116_v25 }
 0x322   : > { %v1940_v59 = vpop.f32.mrf.mxu3 }
 0x323   : > { %v1941_v21 = vadd.f32 %v1940_v59, %v1857_v12 }
 0x324   : > { %v2023_v9 = vpop.f32.mrf.mxu0 }
 0x325   : > { %v2083_v53 = vadd.f32 %v2023_v9, %v1941_v21 }
 0x327   : > { %v2106_v38 = vadd.f32 %v5269_v28, %v2083_v53 }
 0x328   : > { %3506 = vmatmul.msk.f32.gmra.mxu3 %vm1779_vm10, %v5089_v4 }
 0x329   : > { %v2126_v2 = vmax.f32 %v2106_v38, 0.0  ;;  %3525 = vmatmul.msk.f32.gmra.mxu0 %vm1779_vm10, %v5123_v7 }
 0x32a   : > { %v1943_v33 = vpop.f32.mrf.mxu3 }
 0x32b   : > { %v1944_v26 = vadd.f32 %v1943_v33, %v1860_v1  ;;  %v2180_v0 = vsel %vm5280_vm15, %v2126_v2, 0.0 }
 0x32c   : > { %v2026_v61 = vpop.f32.mrf.mxu0  ;;  %v2220_v4 = vrot.slane %v2180_v0, 7 }
 0x32d   : > { %v2084_v50 = vadd.f32 %v2026_v61, %v1944_v26 }
 0x32e   : > { %v5297_v11 = vsel %vm1335_vm8, 0.0, %v2220_v4 }
 0x32f   : > { %v2107_v40 = vadd.f32 %v5269_v28, %v2084_v50  ;;  %v2330_v1 = vrot.slane %v5297_v11, 1 }
 0x330   : > { %3507 = vmatmul.msk.f32.gmra.mxu3 %vm1779_vm10, %v5102_v36 }
 0x331   : > { %v2127_v15 = vmax.f32 %v2107_v40, 0.0  ;;  %3526 = vmatmul.msk.f32.gmra.mxu0 %vm1779_vm10, %v5134_v44  ;;  %v2440_v44 = vrot.slane %v5297_v11, 2 }
 0x332   : > { %v1946_v7 = vpop.f32.mrf.mxu3 }
 0x333   : > { %v2181_v19 = vsel %vm5280_vm15, %v2127_v15, 0.0  ;;  %v1947_v48 = vadd.f32 %v1946_v7, %v1863_v37  ;;  %vm5406_vm15 = vmand %vm2151_vm13, %vm2163_vm14  ;;  %vm2154_vm13 = vcmp.le.s32.totalorder %v5271_v43, 6  ;;  %vm2166_vm14 = vcmp.gt.s32.totalorder %v5273_v45, 6 }
 0x334   : > { %v2221_v41 = vrot.slane %v2181_v19, 7  ;;  %v2029_v52 = vpop.f32.mrf.mxu0 }
 0x335   : > { %v2085_v29 = vadd.f32 %v2029_v52, %v1947_v48 }
 0x336   : > { %v5304_v36 = vsel %vm1335_vm8, %v2220_v4, %v2221_v41  ;;  %v2290_v2 = vsel %vm1335_vm8, %v2221_v41, 0.0 }
 0x337   : > { %v2108_v22 = vadd.f32 %v5269_v28, %v2085_v29  ;;  %v2441_v12 = vrot.slane %v5304_v36, 2  ;;  %v2331_v37 = vrot.slane %v5304_v36, 1  ;;  %v2443_v0 = vrot.slane %v2290_v2, 2 }
 0x338   : > { %3508 = vmatmul.msk.f32.gmra.mxu3 %vm1779_vm10, %v5116_v25  ;;  %v2333_v61 = vrot.slane %v2290_v2, 1 }
 0x339   : > { %v2128_v59 = vmax.f32 %v2108_v22, 0.0  ;;  %v2442_v9 = vsel %vm607_vm1, %v2440_v44, %v2441_v12  ;;  %v2332_v53 = vsel %vm452_vm0, %v2330_v1, %v2331_v37  ;;  %v2444_v40 = vsel %vm607_vm1, %v2441_v12, %v2443_v0 }
 0x33a   : > { %v1949_v38 = vpop.f32.mrf.mxu3  ;;  %2490 = vrot.lane.b32.xlu0 %v2442_v9, %s3791_s14  ;;  %2380 = vrot.lane.b32.xlu2 %v2332_v53, %s3793_s24  ;;  %v2334_v15 = vsel %vm452_vm0, %v2331_v37, %v2333_v61 }
 0x33b   : > { %v1950_v49 = vadd.f32 %v1949_v38, %v1866_v35  ;;  %v5324_v25 = vsel %vm5313_vm7, %v2128_v59, 0.0  ;;  %v1872_v38 = vpop.f32.mrf.mxu2 }
 0x33c   : > { %v2032_v33 = vpop.f32.mrf.mxu0  ;;  %v2223_v50 = vrot.slane %v5324_v25, 7 }
 0x33d   : > { %v2086_v26 = vadd.f32 %v2032_v33, %v1950_v49 }
 0x33e   : > { %v5333_v35 = vsel %vm1335_vm8, 0.0, %v2223_v50 }
 0x33f   : > { %v2109_v5 = vadd.f32 %v5269_v28, %v2086_v26  ;;  %v2445_v22 = vrot.slane %v5333_v35, 2  ;;  %v2335_v37 = vrot.slane %v5333_v35, 1 }
 0x341   : > { %v2129_v4 = vmax.f32 %v2109_v5, 0.0 }
 0x342   : > { %v1952_v7 = vpop.f32.mrf.mxu3  ;;  %2492 = vrot.lane.b32.xlu0 %v2444_v40, %s3791_s14  ;;  %2382 = vrot.lane.b32.xlu2 %v2334_v15, %s3793_s24  ;;  %v2305_v40 = vld [vmem:[%s6131_s5 + $0x28] sm:$0xff] }
 0x343   : > { %v5337_v19 = vsel %vm5313_vm7, %v2129_v4, 0.0  ;;  %v1953_v48 = vadd.f32 %v1952_v7, %v5258_v56  ;;  %2651 = vmatpush.msrb.mxu1 %v2305_v40  ;;  %vm5451_vm7 = vmand %vm2152_vm5, %vm2164_vm6  ;;  %vm2155_vm5 = vcmp.le.s32.totalorder %v5271_v43, 7  ;;  %vm2167_vm6 = vcmp.gt.s32.totalorder %v5273_v45, 7 }
 0x344   : > { %v2224_v41 = vrot.slane %v5337_v19, 7  ;;  %v2035_v52 = vpop.f32.mrf.mxu0 }
 0x345   : > { %v2087_v29 = vadd.f32 %v2035_v52, %v1953_v48  ;;  %v1703_v52 = vpop.permute.xlu2 %1702 }
 0x346   : > { %v5344_v44 = vsel %vm1335_vm8, %v2223_v50, %v2224_v41  ;;  %v5362_v49 = vsel %vm1335_vm8, %v2224_v41, 0.0 }
 0x347   : > { %v2110_v12 = vadd.f32 %v5269_v28, %v2087_v29  ;;  %v2446_v1 = vrot.slane %v5344_v44, 2  ;;  %v2336_v56 = vrot.slane %v5344_v44, 1  ;;  %v2338_v50 = vrot.slane %v5362_v49, 1 }
 0x349   : > { %v2130_v59 = vmax.f32 %v2110_v12, 0.0  ;;  %v2447_v9 = vsel %vm607_vm1, %v2445_v22, %v2446_v1  ;;  %v2337_v53 = vsel %vm452_vm0, %v2335_v37, %v2336_v56  ;;  %v2339_v7 = vsel %vm452_vm0, %v2336_v56, %v2338_v50 }
 0x34a   : > { %v1955_v2 = vpop.f32.mrf.mxu3  ;;  %2494 = vrot.lane.b32.xlu1 %v2447_v9, %s3791_s14  ;;  %2384 = vrot.lane.b32.xlu0 %v2337_v53, %s3793_s24 }
 0x34b   : > { %v1956_v33 = vadd.f32 %v1955_v2, %v1872_v38  ;;  %v5366_v26 = vsel %vm5351_vm12, %v2130_v59, 0.0 }
 0x34c   : > { %v2038_v0 = vpop.f32.mrf.mxu0  ;;  %v2226_v5 = vrot.slane %v5366_v26, 7 }
 0x34d   : > { %v2088_v61 = vadd.f32 %v2038_v0, %v1956_v33 }
 0x34e   : > { %v5377_v29 = vsel %vm1335_vm8, 0.0, %v2226_v5 }
 0x34f   : > { %v2111_v4 = vadd.f32 %v5269_v28, %v2088_v61  ;;  %v2340_v21 = vrot.slane %v5377_v29, 1 }
 0x351   : > { %v2131_v15 = vmax.f32 %v2111_v4, 0.0  ;;  %v1573_v2 = vpop.permute.xlu0 %1572 }
 0x352   : > { %v1571_v48 = vpop.permute.xlu1 %1570  ;;  %v1958_v41 = vpop.f32.mrf.mxu3  ;;  %2386 = vrot.lane.b32.xlu0 %v2339_v7, %s3793_s24 }
 0x353   : > { %v5381_v22 = vsel %vm5351_vm12, %v2131_v15, 0.0  ;;  %v1753_v12 = vsel %vm1730_vm9, %v5190_v62, %v1571_v48  ;;  %v1959_v37 = vadd.f32 %v1958_v41, %v5151_v42  ;;  %v2450_v42 = vrot.slane %v5377_v29, 2  ;;  %vm5490_vm12 = vmand %vm2153_vm4, %vm2165_vm11 }
 0x354   : > { %v2227_v56 = vrot.slane %v5381_v22, 7  ;;  %v2041_v59 = vpop.f32.mrf.mxu0  ;;  %v1777_v9 = vsel %vm762_vm2, %v1753_v12, %v1703_v52  ;;  %vm2156_vm4 = vcmp.le.s32.totalorder %v5271_v43, 8  ;;  %vm2168_vm11 = vcmp.gt.s32.totalorder %v5273_v45, 8 }
 0x355   : > { %v2089_v53 = vadd.f32 %v2041_v59, %v1959_v37  ;;  %3527 = vmatmul.msk.f32.gmra.mxu0 %vm1779_vm10, %v1777_v9 }
 0x356   : > { %v5390_v38 = vsel %vm1335_vm8, %v2226_v5, %v2227_v56  ;;  %v1754_v5 = vsel %vm1730_vm9, %v5195_v54, %v1573_v2  ;;  %v2292_v7 = vsel %vm1335_vm8, %v2227_v56, 0.0 }
 0x357   : > { %v2112_v33 = vadd.f32 %v5269_v28, %v2089_v53  ;;  %v2341_v62 = vrot.slane %v5390_v38, 1  ;;  %v2451_v0 = vrot.slane %v5390_v38, 2  ;;  %v2343_v54 = vrot.slane %v2292_v7, 1 }
 0x358   : > { %v2453_v12 = vrot.slane %v2292_v7, 2 }
 0x359   : > { %v2342_v61 = vsel %vm452_vm0, %v2340_v21, %v2341_v62  ;;  %v2452_v50 = vsel %vm607_vm1, %v2450_v42, %v2451_v0  ;;  %v2132_v4 = vmax.f32 %v2112_v33, 0.0  ;;  %v2344_v21 = vsel %vm452_vm0, %v2341_v62, %v2343_v54 }
 0x35a   : > { %v1705_v40 = vpop.permute.xlu1 %1704  ;;  %v1961_v15 = vpop.f32.mrf.mxu3  ;;  %2388 = vrot.lane.b32.xlu1 %v2342_v61, %s3793_s24  ;;  %2498 = vrot.lane.b32.xlu2 %v2452_v50, %s3791_s14  ;;  %v2454_v2 = vsel %vm607_vm1, %v2451_v0, %v2453_v12  ;;  %v2448_v42 = vrot.slane %v5362_v49, 2 }
 0x35b   : > { %v1778_v41 = vsel %vm762_vm2, %v1754_v5, %v1705_v40  ;;  %v1962_v52 = vadd.f32 %v1961_v15, %v5160_v51  ;;  %v5415_v37 = vsel %vm5406_vm15, %v2132_v4, 0.0  ;;  %v2307_v4 = vld [vmem:[%s6131_s5 + $0x38] sm:$0xff] }
 0x35c   : > { %v2229_v56 = vrot.slane %v5415_v37, 7  ;;  %v2449_v49 = vsel %vm607_vm1, %v2446_v1, %v2448_v42  ;;  %2794 = vmatpush.msra.mxu3 %v2307_v4 }
 0x35d   : > { %3528 = vmatmul.msk.f32.gmra.mxu0 %vm1779_vm10, %v1778_v41 }
 0x35e   : > { %v2044_v59 = vpop.f32.mrf.mxu0  ;;  %v5426_v50 = vsel %vm1335_vm8, 0.0, %v2229_v56 }
 0x35f   : > { %v2090_v9 = vadd.f32 %v2044_v59, %v1962_v52  ;;  %v2455_v15 = vrot.slane %v5426_v50, 2  ;;  %v2345_v41 = vrot.slane %v5426_v50, 1 }
 0x361   : > { %v2113_v53 = vadd.f32 %v5269_v28, %v2090_v9 }
 0x362   : > { %2390 = vrot.lane.b32.xlu1 %v2344_v21, %s3793_s24  ;;  %2500 = vrot.lane.b32.xlu2 %v2454_v2, %s3791_s14 }
 0x363   : > { %v2133_v51 = vmax.f32 %v2113_v53, 0.0  ;;  %v1964_v33 = vpop.f32.mrf.mxu3 }
 0x364   : > { %v1965_v61 = vadd.f32 %v1964_v33, %v5165_v46 }
 0x365   : > { %v5430_v5 = vsel %vm5406_vm15, %v2133_v51, 0.0  ;;  %vm5532_vm15 = vmand %vm2154_vm13, %vm2166_vm14  ;;  %vm2157_vm13 = vcmp.le.s32.totalorder %v5271_v43, 9  ;;  %vm2169_vm14 = vcmp.gt.s32.totalorder %v5273_v45, 9 }
 0x366   : > { %v2230_v62 = vrot.slane %v5430_v5, 7  ;;  %v2047_v0 = vpop.f32.mrf.mxu0 }
 0x367   : > { %v2091_v40 = vadd.f32 %v2047_v0, %v1965_v61 }
 0x368   : > { %v5442_v46 = vsel %vm1335_vm8, %v2229_v56, %v2230_v62  ;;  %v2293_v1 = vsel %vm1335_vm8, %v2230_v62, 0.0 }
 0x369   : > { %v2114_v7 = vadd.f32 %v5269_v28, %v2091_v40  ;;  %v2456_v48 = vrot.slane %v5442_v46, 2  ;;  %v2346_v52 = vrot.slane %v5442_v46, 1  ;;  %v2348_v21 = vrot.slane %v2293_v1, 1 }
 0x36a   : > { %2496 = vrot.lane.b32.xlu1 %v2449_v49, %s3791_s14  ;;  %v2458_v42 = vrot.slane %v2293_v1, 2 }
 0x36b   : > { %v2134_v54 = vmax.f32 %v2114_v7, 0.0  ;;  %v1967_v59 = vpop.f32.mrf.mxu3  ;;  %v2457_v9 = vsel %vm607_vm1, %v2455_v15, %v2456_v48  ;;  %v2347_v56 = vsel %vm452_vm0, %v2345_v41, %v2346_v52  ;;  %v2349_v0 = vsel %vm452_vm0, %v2346_v52, %v2348_v21 }
 0x36c   : > { %v1968_v53 = vadd.f32 %v1967_v59, %v5170_v57  ;;  %2502 = vrot.lane.b32.xlu0 %v2457_v9, %s3791_s14  ;;  %2392 = vrot.lane.b32.xlu2 %v2347_v56, %s3793_s24  ;;  %v2459_v40 = vsel %vm607_vm1, %v2456_v48, %v2458_v42 }
 0x36d   : > { %v5462_v2 = vsel %vm5451_vm7, %v2134_v54, 0.0 }
 0x36e   : > { %v2050_v51 = vpop.f32.mrf.mxu0  ;;  %v2232_v61 = vrot.slane %v5462_v2, 7 }
 0x36f   : > { %v2092_v33 = vadd.f32 %v2050_v51, %v1968_v53 }
 0x370   : > { %v5472_v15 = vsel %vm1335_vm8, 0.0, %v2232_v61 }
 0x371   : > { %v2115_v62 = vadd.f32 %v5269_v28, %v2092_v33  ;;  %v2350_v54 = vrot.slane %v5472_v15, 1 }
 0x372   : > { %2394 = vrot.lane.b32.xlu1 %v2349_v0, %s3793_s24 }
 0x373   : > { %v2135_v57 = vmax.f32 %v2115_v62, 0.0  ;;  %v1970_v4 = vpop.f32.mrf.mxu3 }
 0x374   : > { %v1971_v49 = vadd.f32 %v1970_v4, %v5184_v39  ;;  %2504 = vrot.lane.b32.xlu2 %v2459_v40, %s3791_s14  ;;  %v2460_v39 = vrot.slane %v5472_v15, 2 }
 0x375   : > { %v5476_v7 = vsel %vm5451_vm7, %v2135_v57, 0.0  ;;  %vm5583_vm7 = vmand %vm2155_vm5, %vm2167_vm6 }
 0x376   : > { %v2233_v41 = vrot.slane %v5476_v7, 7  ;;  %v2053_v52 = vpop.f32.mrf.mxu0 }
 0x377   : > { %v2093_v1 = vadd.f32 %v2053_v52, %v1971_v49 }
 0x378   : > { %v5482_v48 = vsel %vm1335_vm8, %v2232_v61, %v2233_v41  ;;  %v2294_v59 = vsel %vm1335_vm8, %v2233_v41, 0.0  ;;  %v2304_v41 = vld [vmem:[%s6131_s5 + $0x20] sm:$0xff] }
 0x379   : > { %v2116_v12 = vadd.f32 %v5269_v28, %v2093_v1  ;;  %v2461_v9 = vrot.slane %v5482_v48, 2  ;;  %v2351_v56 = vrot.slane %v5482_v48, 1  ;;  %v2353_v53 = vrot.slane %v2294_v59, 1  ;;  %2652 = vmatpush.msrb.mxu1 %v2304_v41 }
 0x37a   : > { %v2463_v49 = vrot.slane %v2294_v59, 2 }
 0x37b   : > { %v2136_v21 = vmax.f32 %v2116_v12, 0.0  ;;  %v1973_v33 = vpop.f32.mrf.mxu3  ;;  %v2462_v42 = vsel %vm607_vm1, %v2460_v39, %v2461_v9  ;;  %v2352_v61 = vsel %vm452_vm0, %v2350_v54, %v2351_v56  ;;  %v2354_v62 = vsel %vm452_vm0, %v2351_v56, %v2353_v53 }
 0x37c   : > { %v1974_v0 = vadd.f32 %v1973_v33, %v5192_v30  ;;  %2506 = vrot.lane.b32.xlu1 %v2462_v42, %s3791_s14  ;;  %2396 = vrot.lane.b32.xlu0 %v2352_v61, %s3793_s24  ;;  %v2464_v54 = vsel %vm607_vm1, %v2461_v9, %v2463_v49 }
 0x37d   : > { %2398 = vrot.lane.b32.xlu2 %v2354_v62, %s3793_s24  ;;  %v5503_v57 = vsel %vm5490_vm12, %v2136_v21, 0.0 }
 0x37e   : > { %v2056_v4 = vpop.f32.mrf.mxu0  ;;  %v2235_v52 = vrot.slane %v5503_v57, 7 }
 0x37f   : > { %v2094_v40 = vadd.f32 %v2056_v4, %v1974_v0 }
 0x380   : > { %v5514_v56 = vsel %vm1335_vm8, 0.0, %v2235_v52 }
 0x381   : > { %v2117_v30 = vadd.f32 %v5269_v28, %v2094_v40  ;;  %v2465_v61 = vrot.slane %v5514_v56, 2 }
 0x383   : > { %v2137_v1 = vmax.f32 %v2117_v30, 0.0  ;;  %v1976_v39 = vpop.f32.mrf.mxu3 }
 0x384   : > { %v1977_v12 = vadd.f32 %v1976_v39, %v5212_v60  ;;  %2508 = vrot.lane.b32.xlu0 %v2464_v54, %s3791_s14  ;;  %v2355_v60 = vrot.slane %v5514_v56, 1  ;;  %v2302_v39 = vld [vmem:[%s6131_s5 + $0x10] sm:$0xff] }
 0x385   : > { %v5518_v59 = vsel %vm5490_vm12, %v2137_v1, 0.0  ;;  %2722 = vmatpush.msrb.mxu2 %v2302_v39  ;;  %v2306_v39 = vld [vmem:[%s6131_s5 + $0x30] sm:$0xff]  ;;  %vm5625_vm12 = vmand %vm2156_vm4, %vm2168_vm11 }
 0x386   : > { %v2236_v53 = vrot.slane %v5518_v59, 7  ;;  %v2059_v21 = vpop.f32.mrf.mxu0  ;;  %2795 = vmatpush.msra.mxu3 %v2306_v39 }
 0x387   : > { %v2095_v33 = vadd.f32 %v2059_v21, %v1977_v12  ;;  %v2301_v12 = vld [vmem:[%s6131_s5 + $0x8] sm:$0xff] }
 0x388   : > { %v5524_v9 = vsel %vm1335_vm8, %v2235_v52, %v2236_v53  ;;  %v2295_v42 = vsel %vm1335_vm8, %v2236_v53, 0.0  ;;  %2723 = vmatpush.msrb.mxu2 %v2301_v12 }
 0x389   : > { %v2118_v51 = vadd.f32 %v5269_v28, %v2095_v33  ;;  %v2356_v62 = vrot.slane %v5524_v9, 1  ;;  %v2358_v0 = vrot.slane %v2295_v42, 1  ;;  %v2466_v4 = vrot.slane %v5524_v9, 2 }
 0x38b   : > { %v2138_v40 = vmax.f32 %v2118_v51, 0.0  ;;  %v1979_v41 = vpop.f32.mrf.mxu3  ;;  %v2357_v52 = vsel %vm452_vm0, %v2355_v60, %v2356_v62  ;;  %v2359_v30 = vsel %vm452_vm0, %v2356_v62, %v2358_v0  ;;  %v2467_v1 = vsel %vm607_vm1, %v2465_v61, %v2466_v4 }
 0x38c   : > { %v1980_v54 = vadd.f32 %v1979_v41, %v5220_v3  ;;  %2400 = vrot.lane.b32.xlu1 %v2357_v52, %s3793_s24  ;;  %2402 = vrot.lane.b32.xlu0 %v2359_v30, %s3793_s24  ;;  %v2468_v60 = vrot.slane %v2295_v42, 2  ;;  %v2300_v3 = vld [vmem:[%s6131_s5] sm:$0xff] }
 0x38d   : > { %2510 = vrot.lane.b32.xlu2 %v2467_v1, %s3791_s14  ;;  %v5551_v53 = vsel %vm5532_vm15, %v2138_v40, 0.0  ;;  %2724 = vmatpush.msrb.mxu2 %v2300_v3 }
 0x38e   : > { %v2062_v21 = vpop.f32.mrf.mxu0  ;;  %v2238_v61 = vrot.slane %v5551_v53, 7  ;;  %v2469_v41 = vsel %vm607_vm1, %v2466_v4, %v2468_v60 }
 0x38f   : > { %v2096_v33 = vadd.f32 %v2062_v21, %v1980_v54 }
 0x390   : > { %v5562_v42 = vsel %vm1335_vm8, 0.0, %v2238_v61 }
 0x391   : > { %v2119_v51 = vadd.f32 %v5269_v28, %v2096_v33  ;;  %v2470_v49 = vrot.slane %v5562_v42, 2  ;;  %v2360_v12 = vrot.slane %v5562_v42, 1 }
 0x393   : > { %v2139_v62 = vmax.f32 %v2119_v51, 0.0  ;;  %v1982_v0 = vpop.f32.mrf.mxu3 }
 0x394   : > { %v1983_v40 = vadd.f32 %v1982_v0, %v5226_v47  ;;  %2512 = vrot.lane.b32.xlu1 %v2469_v41, %s3791_s14 }
 0x395   : > { %v5566_v52 = vsel %vm5532_vm15, %v2139_v62, 0.0  ;;  %vm5692_vm15 = vmand %vm2157_vm13, %vm2169_vm14 }
 0x396   : > { %v2239_v30 = vrot.slane %v5566_v52, 7  ;;  %v2065_v1 = vpop.f32.mrf.mxu0 }
 0x397   : > { %v2097_v54 = vadd.f32 %v2065_v1, %v1983_v40 }
 0x398   : > { %v5575_v47 = vsel %vm1335_vm8, %v2238_v61, %v2239_v30  ;;  %v2296_v4 = vsel %vm1335_vm8, %v2239_v30, 0.0 }
 0x399   : > { %v2120_v21 = vadd.f32 %v5269_v28, %v2097_v54  ;;  %v2361_v33 = vrot.slane %v5575_v47, 1  ;;  %v2363_v60 = vrot.slane %v2296_v4, 1  ;;  %v2471_v3 = vrot.slane %v5575_v47, 2  ;;  %v2303_v54 = vld [vmem:[%s6131_s5 + $0x18] sm:$0xff] }
 0x39a   : > { %2653 = vmatpush.msrb.mxu1 %v2303_v54 }
 0x39b   : > { %v2140_v51 = vmax.f32 %v2120_v21, 0.0  ;;  %v1985_v61 = vpop.f32.mrf.mxu3  ;;  %v2364_v0 = vsel %vm452_vm0, %v2361_v33, %v2363_v60  ;;  %v2472_v41 = vsel %vm607_vm1, %v2470_v49, %v2471_v3  ;;  %v2362_v40 = vsel %vm452_vm0, %v2360_v12, %v2361_v33 }
 0x39c   : > { %v1986_v30 = vadd.f32 %v1985_v61, %v5232_v10  ;;  %2406 = vrot.lane.b32.xlu1 %v2364_v0, %s3793_s24  ;;  %2514 = vrot.lane.b32.xlu0 %v2472_v41, %s3791_s14  ;;  %v2473_v12 = vrot.slane %v2296_v4, 2 }
 0x39d   : > { %2404 = vrot.lane.b32.xlu2 %v2362_v40, %s3793_s24  ;;  %v5596_v1 = vsel %vm5583_vm7, %v2140_v51, 0.0 }
 0x39e   : > { %v2068_v39 = vpop.f32.mrf.mxu0  ;;  %v2241_v10 = vrot.slane %v5596_v1, 7  ;;  %v2474_v0 = vsel %vm607_vm1, %v2471_v3, %v2473_v12 }
 0x39f   : > { %v2098_v49 = vadd.f32 %v2068_v39, %v1986_v30  ;;  %v2381_v30 = vpop.permute.xlu2 %2380 }
 0x3a0   : > { %v5606_v51 = vsel %vm1335_vm8, 0.0, %v2241_v10 }
 0x3a1   : > { %v2121_v21 = vadd.f32 %v5269_v28, %v2098_v49  ;;  %v2475_v3 = vrot.slane %v5606_v51, 2  ;;  %v2365_v62 = vrot.slane %v5606_v51, 1 }
 0x3a3   : > { %v2141_v33 = vmax.f32 %v2121_v21, 0.0  ;;  %v1988_v60 = vpop.f32.mrf.mxu3 }
 0x3a4   : > { %v1989_v61 = vadd.f32 %v1988_v60, %v5238_v32 }
 0x3a5   : > { %v5610_v41 = vsel %vm5583_vm7, %v2141_v33, 0.0  ;;  %2516 = vrot.lane.b32.xlu2 %v2474_v0, %s3791_s14 }
 0x3a6   : > { %v2242_v4 = vrot.slane %v5610_v41, 7  ;;  %v2071_v40 = vpop.f32.mrf.mxu0 }
 0x3a7   : > { %v2099_v39 = vadd.f32 %v2071_v40, %v1989_v61 }
 0x3a8   : > { %v5617_v32 = vsel %vm1335_vm8, %v2241_v10, %v2242_v4  ;;  %v2297_v54 = vsel %vm1335_vm8, %v2242_v4, 0.0  ;;  %v2550_v4 = vsel %vm1730_vm9, %v5297_v11, %v2381_v30  ;;  %v2383_v30 = vpop.permute.xlu2 %2382 }
 0x3a9   : > { %v2122_v49 = vadd.f32 %v5269_v28, %v2099_v39  ;;  %v2476_v12 = vrot.slane %v5617_v32, 2  ;;  %v2366_v21 = vrot.slane %v5617_v32, 1  ;;  %v2368_v33 = vrot.slane %v2297_v54, 1 }
 0x3aa   : > { %v2478_v11 = vrot.slane %v2297_v54, 2 }
 0x3ab   : > { %v2142_v60 = vmax.f32 %v2122_v49, 0.0  ;;  %v1991_v10 = vpop.f32.mrf.mxu3  ;;  %v2477_v0 = vsel %vm607_vm1, %v2475_v3, %v2476_v12  ;;  %v2367_v40 = vsel %vm452_vm0, %v2365_v62, %v2366_v21  ;;  %v2369_v17 = vsel %vm452_vm0, %v2366_v21, %v2368_v33 }
 0x3ac   : > { %v1992_v39 = vadd.f32 %v1991_v10, %v5244_v31  ;;  %2518 = vrot.lane.b32.xlu1 %v2477_v0, %s3791_s14  ;;  %2408 = vrot.lane.b32.xlu0 %v2367_v40, %s3793_s24  ;;  %v2491_v49 = vpop.permute.xlu0 %2490  ;;  %v2479_v0 = vsel %vm607_vm1, %v2476_v12, %v2478_v11 }
 0x3ad   : > { %2410 = vrot.lane.b32.xlu2 %v2369_v17, %s3793_s24  ;;  %v2570_v55 = vsel %vm762_vm2, %v2550_v4, %v2491_v49  ;;  %v5641_v3 = vsel %vm5625_vm12, %v2142_v60, 0.0  ;;  %v2551_v17 = vsel %vm1730_vm9, %v5304_v36, %v2383_v30 }
 0x3ae   : > { %v2074_v62 = vpop.f32.mrf.mxu0  ;;  %3545 = vmatmul.msk.f32.vlgmr.msrb.gmra.mxu2 %vm1779_vm10, %v2570_v55  ;;  %v2244_v31 = vrot.slane %v5641_v3, 7 }
 0x3af   : > { %v2100_v21 = vadd.f32 %v2074_v62, %v1992_v39 }
 0x3b0   : > { %v5651_v40 = vsel %vm1335_vm8, 0.0, %v2244_v31 }
 0x3b1   : > { %v2123_v33 = vadd.f32 %v5269_v28, %v2100_v21  ;;  %v2370_v36 = vrot.slane %v5651_v40, 1  ;;  %v2480_v61 = vrot.slane %v5651_v40, 2 }
 0x3b3   : > { %v2143_v10 = vmax.f32 %v2123_v33, 0.0 }
 0x3b4   : > { %2520 = vrot.lane.b32.xlu0 %v2479_v0, %s3791_s14  ;;  %v2493_v60 = vpop.permute.xlu0 %2492 }
 0x3b5   : > { %v5655_v55 = vsel %vm5625_vm12, %v2143_v10, 0.0  ;;  %v2571_v54 = vsel %vm762_vm2, %v2551_v17, %v2493_v60 }
 0x3b6   : > { %v2245_v4 = vrot.slane %v5655_v55, 7  ;;  %3546 = vmatmul.msk.f32.gmra.mxu2 %vm1779_vm10, %v2571_v54 }
 0x3b8   : > { %v5661_v12 = vsel %vm1335_vm8, %v2244_v31, %v2245_v4  ;;  %v2298_v39 = vsel %vm1335_vm8, %v2245_v4, 0.0  ;;  %v2499_v4 = vpop.permute.xlu2 %2498 }
 0x3b9   : > { %v2371_v49 = vrot.slane %v5661_v12, 1  ;;  %v2373_v62 = vrot.slane %v2298_v39, 1  ;;  %v2481_v21 = vrot.slane %v5661_v12, 2  ;;  %v2483_v60 = vrot.slane %v2298_v39, 2 }
 0x3bb   : > { %v2372_v11 = vsel %vm452_vm0, %v2370_v36, %v2371_v49  ;;  %v2374_v30 = vsel %vm452_vm0, %v2371_v49, %v2373_v62  ;;  %v2482_v33 = vsel %vm607_vm1, %v2480_v61, %v2481_v21  ;;  %v2484_v54 = vsel %vm607_vm1, %v2481_v21, %v2483_v60  ;;  %v1994_v36 = vpop.f32.mrf.mxu3 }
 0x3bc   : > { %2412 = vrot.lane.b32.xlu1 %v2372_v11, %s3793_s24  ;;  %2414 = vrot.lane.b32.xlu0 %v2374_v30, %s3793_s24  ;;  %v2385_v31 = vpop.permute.xlu0 %2384  ;;  %v2495_v0 = vpop.permute.xlu1 %2494  ;;  %v1995_v61 = vadd.f32 %v1994_v36, %v5250_v16 }
 0x3bd   : > { %2522 = vrot.lane.b32.xlu2 %v2482_v33, %s3791_s14  ;;  %v2552_v10 = vsel %vm1730_vm9, %v5333_v35, %v2385_v31 }
 0x3be   : > { %v2572_v17 = vsel %vm762_vm2, %v2552_v10, %v2495_v0 }
 0x3bf   : > { %3529 = vmatmul.msk.f32.vlgmr.msrb.gmra.mxu1 %vm1779_vm10, %v2572_v17  ;;  %3547 = vmatmul.msk.f32.gmra.mxu2 %vm1779_vm10, %v2572_v17 }
 0x3c0   : > { %v2501_v11 = vpop.permute.xlu2 %2500 }
 0x3c4   : > { %2524 = vrot.lane.b32.xlu1 %v2484_v54, %s3791_s14  ;;  %v2387_v10 = vpop.permute.xlu0 %2386 }
 0x3c8   : > { %v2393_v54 = vpop.permute.xlu2 %2392 }
 0x3cc   : > { %v2389_v49 = vpop.permute.xlu1 %2388 }
 0x3cd   : > { %v2554_v62 = vsel %vm1730_vm9, %v5377_v29, %v2389_v49  ;;  %v1997_v29 = vpop.f32.mrf.mxu3 }
 0x3ce   : > { %v2574_v35 = vsel %vm762_vm2, %v2554_v62, %v2499_v4  ;;  %v1998_v43 = vadd.f32 %v1997_v29, %v5256_v13 }
 0x3cf   : > { %3561 = vmatmul.msk.f32.vlgmr.msra.gmra.mxu3 %vm1779_vm10, %v2574_v35 }
 0x3d2   : > { %v2077_v30 = vpop.f32.mrf.mxu0 }
 0x3d3   : > { %v2101_v33 = vadd.f32 %v2077_v30, %v1995_v61 }
 0x3d4   : > { %v2391_v39 = vpop.permute.xlu1 %2390 }
 0x3d5   : > { %v2124_v21 = vadd.f32 %v5269_v28, %v2101_v33  ;;  %v2555_v31 = vsel %vm1730_vm9, %v5390_v38, %v2391_v39  ;;  %v2553_v38 = vsel %vm1730_vm9, %v5344_v44, %v2387_v10 }
 0x3d6   : > { %v2575_v0 = vsel %vm762_vm2, %v2555_v31, %v2501_v11  ;;  %v2556_v11 = vsel %vm1730_vm9, %v5426_v50, %v2393_v54 }
 0x3d7   : > { %v2144_v17 = vmax.f32 %v2124_v21, 0.0  ;;  %3562 = vmatmul.msk.f32.gmra.mxu3 %vm1779_vm10, %v2575_v0 }
 0x3d9   : > { %v2198_v45 = vsel %vm5692_vm15, %v2144_v17, 0.0  ;;  %v2505_v17 = vpop.permute.xlu2 %2504 }
 0x3da   : > { %v2080_v60 = vpop.f32.mrf.mxu0  ;;  %v2247_v49 = vrot.slane %v2198_v45, 7 }
 0x3db   : > { %v2102_v4 = vadd.f32 %v2080_v60, %v1998_v43 }
 0x3dc   : > { %v2497_v36 = vpop.permute.xlu1 %2496  ;;  %v5711_v44 = vsel %vm1335_vm8, 0.0, %v2247_v49 }
 0x3dd   : > { %v2125_v62 = vadd.f32 %v5269_v28, %v2102_v4  ;;  %v2573_v61 = vsel %vm762_vm2, %v2553_v38, %v2497_v36  ;;  %v2485_v31 = vrot.slane %v5711_v44, 2  ;;  %v2375_v10 = vrot.slane %v5711_v44, 1 }
 0x3de   : > { %v2503_v30 = vpop.permute.xlu0 %2502  ;;  %3530 = vmatmul.msk.f32.gmra.mxu1 %vm1779_vm10, %v2573_v61  ;;  %3548 = vmatmul.msk.f32.gmra.mxu2 %vm1779_vm10, %v2573_v61 }
 0x3df   : > { %v2145_v13 = vmax.f32 %v2125_v62, 0.0  ;;  %v2576_v33 = vsel %vm762_vm2, %v2556_v11, %v2503_v30 }
 0x3e0   : > { %3563 = vmatmul.msk.f32.gmra.mxu3 %vm1779_vm10, %v2576_v33 }
 0x3e1   : > { %v2199_v28 = vsel %vm5692_vm15, %v2145_v13, 0.0  ;;  %v2399_v30 = vpop.permute.xlu2 %2398 }
 0x3e2   : > { %v2248_v39 = vrot.slane %v2199_v28, 7 }
 0x3e4   : > { %v2395_v21 = vpop.permute.xlu1 %2394  ;;  %v5716_v50 = vsel %vm1335_vm8, %v2247_v49, %v2248_v39  ;;  %v2299_v29 = vsel %vm1335_vm8, %v2248_v39, 0.0 }
 0x3e5   : > { %v2557_v43 = vsel %vm1730_vm9, %v5442_v46, %v2395_v21  ;;  %v2486_v45 = vrot.slane %v5716_v50, 2  ;;  %v2376_v16 = vrot.slane %v5716_v50, 1  ;;  %v2378_v60 = vrot.slane %v2299_v29, 1 }
 0x3e6   : > { %3531 = vmatmul.msk.f32.gmra.mxu1 %vm1779_vm10, %v2574_v35  ;;  %3549 = vmatmul.msk.f32.gmra.mxu2 %vm1779_vm10, %v2574_v35  ;;  %v2577_v54 = vsel %vm762_vm2, %v2557_v43, %v2505_v17  ;;  %v2488_v46 = vrot.slane %v2299_v29, 2 }
 0x3e7   : > { %v2487_v4 = vsel %vm607_vm1, %v2485_v31, %v2486_v45  ;;  %v2379_v38 = vsel %vm452_vm0, %v2376_v16, %v2378_v60  ;;  %v2377_v36 = vsel %vm452_vm0, %v2375_v10, %v2376_v16  ;;  %v6240_v10 = vld [vmem:[#allocation24_spill] sm:$0xff]  ;;  %v6242_v60 = vld [vmem:[#allocation26_spill] sm:$0xff]  ;;  %vm3129_vm0 = vcmask 326656  }
 0x3e8   : > { %2526 = vrot.lane.b32.xlu0 %v2487_v4, %s3791_s14  ;;  %2418 = vrot.lane.b32.xlu1 %v2379_v38, %s3793_s24  ;;  %v2489_v11 = vsel %vm607_vm1, %v2486_v45, %v2488_v46 }
 0x3e9   : > { %2416 = vrot.lane.b32.xlu2 %v2377_v36, %s3793_s24  ;;  %3564 = vmatmul.msk.f32.gmra.mxu3 %vm1779_vm10, %v2577_v54 }
 0x3ee   : > { %v2397_v49 = vpop.permute.xlu0 %2396  ;;  %v2507_v62 = vpop.permute.xlu1 %2506  ;;  %3532 = vmatmul.msk.f32.gmra.mxu1 %vm1779_vm10, %v2575_v0  ;;  %3550 = vmatmul.msk.f32.gmra.mxu2 %vm1779_vm10, %v2575_v0  ;;  %v2559_v0 = vsel %vm1730_vm9, %v5482_v48, %v2399_v30 }
 0x3ef   : > { %v2558_v35 = vsel %vm1730_vm9, %v5472_v15, %v2397_v49  ;;  %v2511_v48 = vpop.permute.xlu2 %2510 }
 0x3f0   : > { %v2578_v61 = vsel %vm762_vm2, %v2558_v35, %v2507_v62  ;;  %2912 = vrot.lane.b32.xlu0 %v4835_v18, %s3791_s14  ;;  %2960 = vrot.lane.b32.xlu1 %v5324_v25, %s3794_s17 }
 0x3f1   : > { %2528 = vrot.lane.b32.xlu2 %v2489_v11, %s3791_s14  ;;  %3565 = vmatmul.msk.f32.gmra.mxu3 %vm1779_vm10, %v2578_v61 }
 0x3f6   : > { %v2509_v15 = vpop.permute.xlu0 %2508  ;;  %3533 = vmatmul.msk.f32.gmra.mxu1 %vm1779_vm10, %v2576_v33  ;;  %3551 = vmatmul.msk.f32.gmra.mxu2 %vm1779_vm10, %v2576_v33 }
 0x3f7   : > { %v2579_v18 = vsel %vm762_vm2, %v2559_v0, %v2509_v15  ;;  %v6243_v15 = vld [vmem:[#allocation27_spill] sm:$0xff] }
 0x3f8   : > { %2914 = vrot.lane.b32.xlu0 %v4823_v14, %s3791_s14  ;;  %2962 = vrot.lane.b32.xlu1 %v5337_v19, %s3794_s17 }
 0x3f9   : > { %3566 = vmatmul.msk.f32.gmra.mxu3 %vm1779_vm10, %v2579_v18 }
 0x3fe   : > { %v2401_v25 = vpop.permute.xlu1 %2400  ;;  %3534 = vmatmul.msk.f32.gmra.mxu1 %vm1779_vm10, %v2577_v54  ;;  %3552 = vmatmul.msk.f32.gmra.mxu2 %vm1779_vm10, %v2577_v54  ;;  %v2403_v19 = vpop.permute.xlu0 %2402 }
 0x3ff   : > { %v2560_v13 = vsel %vm1730_vm9, %v5514_v56, %v2401_v25  ;;  %v2561_v33 = vsel %vm1730_vm9, %v5524_v9, %v2403_v19 }
 0x400   : > { %2916 = vrot.lane.b32.xlu0 %v4950_v58, %s3791_s14  ;;  %2964 = vrot.lane.b32.xlu1 %v5366_v26, %s3794_s17  ;;  %v2580_v14 = vsel %vm762_vm2, %v2560_v13, %v2511_v48  ;;  %v2405_v58 = vpop.permute.xlu2 %2404 }
 0x401   : > { %3567 = vmatmul.msk.f32.gmra.mxu3 %vm1779_vm10, %v2580_v14  ;;  %v2562_v26 = vsel %vm1730_vm9, %v5562_v42, %v2405_v58  ;;  %v3122_v58 = vld [vmem:[%s6133_s7 + $0x10] sm:$0xff] }
 0x406   : > { %v2513_v28 = vpop.permute.xlu1 %2512  ;;  %3535 = vmatmul.msk.f32.gmra.mxu1 %vm1779_vm10, %v2578_v61  ;;  %3553 = vmatmul.msk.f32.gmra.mxu2 %vm1779_vm10, %v2578_v61 }
 0x407   : > { %v2581_v56 = vsel %vm762_vm2, %v2561_v33, %v2513_v28  ;;  %v6244_v28 = vld [vmem:[#allocation28_spill] sm:$0xff] }
 0x408   : > { %2918 = vrot.lane.b32.xlu0 %v4944_v20, %s3791_s14  ;;  %2966 = vrot.lane.b32.xlu1 %v5381_v22, %s3794_s17  ;;  %v2517_v42 = vpop.permute.xlu2 %2516 }
 0x409   : > { %3568 = vmatmul.msk.f32.gmra.mxu3 %vm1779_vm10, %v2581_v56 }
 0x40e   : > { %v2515_v9 = vpop.permute.xlu0 %2514  ;;  %3536 = vmatmul.msk.f32.gmra.mxu1 %vm1779_vm10, %v2579_v18  ;;  %3554 = vmatmul.msk.f32.gmra.mxu2 %vm1779_vm10, %v2579_v18  ;;  %v2407_v20 = vpop.permute.xlu1 %2406 }
 0x40f   : > { %v2582_v39 = vsel %vm762_vm2, %v2562_v26, %v2515_v9  ;;  %v2563_v22 = vsel %vm1730_vm9, %v5575_v47, %v2407_v20 }
 0x410   : > { %2920 = vrot.lane.b32.xlu0 %v4551_v6, %s3791_s14  ;;  %2968 = vrot.lane.b32.xlu1 %v5415_v37, %s3794_s17  ;;  %v2583_v6 = vsel %vm762_vm2, %v2563_v22, %v2517_v42 }
 0x411   : > { %3569 = vmatmul.msk.f32.gmra.mxu3 %vm1779_vm10, %v2582_v39 }
 0x416   : > { %3537 = vmatmul.msk.f32.gmra.mxu1 %vm1779_vm10, %v2580_v14  ;;  %3555 = vmatmul.msk.f32.gmra.mxu2 %vm1779_vm10, %v2580_v14 }
 0x418   : > { %2922 = vrot.lane.b32.xlu0 %v4555_v8, %s3791_s14  ;;  %2970 = vrot.lane.b32.xlu1 %v5430_v5, %s3794_s17  ;;  %v2411_v8 = vpop.permute.xlu2 %2410 }
 0x419   : > { %3570 = vmatmul.msk.f32.gmra.mxu3 %vm1779_vm10, %v2583_v6  ;;  %v2565_v5 = vsel %vm1730_vm9, %v5617_v32, %v2411_v8 }
 0x41e   : > { %v2409_v37 = vpop.permute.xlu0 %2408  ;;  %v2519_v21 = vpop.permute.xlu1 %2518  ;;  %3538 = vmatmul.msk.f32.gmra.mxu1 %vm1779_vm10, %v2581_v56  ;;  %3556 = vmatmul.msk.f32.gmra.mxu2 %vm1779_vm10, %v2581_v56 }
 0x41f   : > { %v2564_v47 = vsel %vm1730_vm9, %v5606_v51, %v2409_v37 }
 0x420   : > { %v2584_v31 = vsel %vm762_vm2, %v2564_v47, %v2519_v21  ;;  %2924 = vrot.lane.b32.xlu0 %v4584_v23, %s3791_s14  ;;  %2972 = vrot.lane.b32.xlu1 %v5462_v2, %s3794_s17  ;;  %v2523_v2 = vpop.permute.xlu2 %2522 }
 0x421   : > { %3571 = vmatmul.msk.f32.gmra.mxu3 %vm1779_vm10, %v2584_v31 }
 0x426   : > { %v2521_v29 = vpop.permute.xlu0 %2520  ;;  %3539 = vmatmul.msk.f32.gmra.mxu1 %vm1779_vm10, %v2582_v39  ;;  %3557 = vmatmul.msk.f32.gmra.mxu2 %vm1779_vm10, %v2582_v39 }
 0x427   : > { %v2585_v51 = vsel %vm762_vm2, %v2565_v5, %v2521_v29 }
 0x428   : > { %2926 = vrot.lane.b32.xlu0 %v6240_v10, %s3791_s14  ;;  %2974 = vrot.lane.b32.xlu1 %v5476_v7, %s3794_s17  ;;  %v3124_v7 = vld [vmem:[%s6133_s7 + $0x20] sm:$0xff] }
 0x429   : > { %3572 = vmatmul.msk.f32.gmra.mxu3 %vm1779_vm10, %v2585_v51  ;;  %3189 = vmatpush.msra.mxu1 %v3124_v7  ;;  %v3121_v7 = vld [vmem:[%s6133_s7 + $0x8] sm:$0xff] }
 0x42e   : > { %v2413_v23 = vpop.permute.xlu1 %2412  ;;  %3540 = vmatmul.msk.f32.gmra.mxu1 %vm1779_vm10, %v2583_v6  ;;  %3558 = vmatmul.msk.f32.gmra.mxu2 %vm1779_vm10, %v2583_v6  ;;  %v2415_v43 = vpop.permute.xlu0 %2414 }
 0x42f   : > { %v2566_v32 = vsel %vm1730_vm9, %v5651_v40, %v2413_v23  ;;  %v2567_v45 = vsel %vm1730_vm9, %v5661_v12, %v2415_v43 }
 0x430   : > { %2928 = vrot.lane.b32.xlu0 %v4634_v63, %s3791_s14  ;;  %2976 = vrot.lane.b32.xlu1 %v5503_v57, %s3794_s17  ;;  %v2586_v17 = vsel %vm762_vm2, %v2566_v32, %v2523_v2  ;;  %v6241_v57 = vld [vmem:[#allocation25_spill] sm:$0xff] }
 0x431   : > { %3573 = vmatmul.msk.f32.gmra.mxu3 %vm1779_vm10, %v2586_v17  ;;  %v2726_v12 = vpop.f32.mrf.mxu2 }
 0x436   : > { %v2525_v40 = vpop.permute.xlu1 %2524  ;;  %3541 = vmatmul.msk.f32.gmra.mxu1 %vm1779_vm10, %v2584_v31  ;;  %3559 = vmatmul.msk.f32.gmra.mxu2 %vm1779_vm10, %v2584_v31 }
 0x437   : > { %v2587_v63 = vsel %vm762_vm2, %v2567_v45, %v2525_v40 }
 0x438   : > { %2930 = vrot.lane.b32.xlu0 %v6241_v57, %s3791_s14  ;;  %2978 = vrot.lane.b32.xlu1 %v5518_v59, %s3794_s17 }
 0x439   : > { %3574 = vmatmul.msk.f32.gmra.mxu3 %vm1779_vm10, %v2587_v63  ;;  %v2729_v16 = vpop.f32.mrf.mxu2 }
 0x43c   : > { %v2655_v59 = vpop.f32.mrf.mxu1 }
 0x43e   : > { %3542 = vmatmul.msk.f32.gmra.mxu1 %vm1779_vm10, %v2585_v51  ;;  %3560 = vmatmul.msk.f32.gmra.mxu2 %vm1779_vm10, %v2585_v51 }
 0x440   : > { %2932 = vrot.lane.b32.xlu0 %v4688_v24, %s3791_s14  ;;  %2980 = vrot.lane.b32.xlu1 %v5551_v53, %s3794_s17  ;;  %v2727_v24 = vadd.f32 %v2726_v12, %v2655_v59  ;;  %v5859_v53 = vld [vmem:[%s6132_s6] ss:$0 sm:$0xff] }
 0x443   : > { %v2417_v38 = vpop.permute.xlu2 %2416 }
 0x444   : > { %v2568_v46 = vsel %vm1730_vm9, %v5711_v44, %v2417_v38 }
 0x446   : > { %3543 = vmatmul.msk.f32.gmra.mxu1 %vm1779_vm10, %v2586_v17 }
 0x448   : > { %2934 = vrot.lane.b32.xlu0 %v4702_v34, %s3791_s14  ;;  %2982 = vrot.lane.b32.xlu1 %v5566_v52, %s3794_s17  ;;  %v3123_v52 = vld [vmem:[%s6133_s7 + $0x18] sm:$0xff] }
 0x449   : > { %3190 = vmatpush.msra.mxu1 %v3123_v52 }
 0x44b   : > { %v2529_v18 = vpop.permute.xlu2 %2528  ;;  %3191 = vmatpush.msra.mxu1 %v3122_v58 }
 0x44d   : > { %3192 = vmatpush.msra.mxu1 %v3121_v7 }
 0x44e   : > { %3544 = vmatmul.msk.f32.gmra.mxu1 %vm1779_vm10, %v2587_v63 }
 0x450   : > { %2936 = vrot.lane.b32.xlu0 %v6242_v60, %s3791_s14  ;;  %2984 = vrot.lane.b32.xlu1 %v5596_v1, %s3794_s17  ;;  %v2732_v1 = vpop.f32.mrf.mxu2 }
 0x452   : > { %v2797_v34 = vpop.f32.mrf.mxu3 }
 0x453   : > { %v2845_v54 = vadd.f32 %v2797_v34, %v2727_v24 }
 0x455   : > { %v2864_v4 = vadd.f32 %v5859_v53, %v2845_v54 }
 0x457   : > { %v2880_v36 = vmax.f32 %v2864_v4, 0.0 }
 0x458   : > { %2938 = vrot.lane.b32.xlu0 %v4763_v27, %s3791_s14  ;;  %2986 = vrot.lane.b32.xlu1 %v5610_v41, %s3794_s17 }
 0x459   : > { %3024 = vrot.lane.b32.xlu2 %v2880_v36, %s3792_s19 }
 0x45a   : > { %v2527_v49 = vpop.permute.xlu0 %2526  ;;  %v2800_v35 = vpop.f32.mrf.mxu3 }
 0x45b   : > { %v2588_v62 = vsel %vm762_vm2, %v2568_v46, %v2527_v49  ;;  %v2658_v61 = vpop.f32.mrf.mxu1  ;;  %v2419_v30 = vpop.permute.xlu1 %2418 }
 0x45c   : > { %v2730_v11 = vadd.f32 %v2729_v16, %v2658_v61  ;;  %3575 = vmatmul.msk.f32.gmra.mxu3 %vm1779_vm10, %v2588_v62  ;;  %v2569_v27 = vsel %vm1730_vm9, %v5716_v50, %v2419_v30  ;;  %v3120_v62 = vld [vmem:[%s6133_s7] sm:$0xff] }
 0x45d   : > { %v2589_v14 = vsel %vm762_vm2, %v2569_v27, %v2529_v18  ;;  %3193 = vmatpush.msra.mxu1 %v3120_v62 }
 0x45e   : > { %v2846_v0 = vadd.f32 %v2800_v35, %v2730_v11 }
 0x460   : > { %v2865_v41 = vadd.f32 %v5859_v53, %v2846_v0  ;;  %2940 = vrot.lane.b32.xlu0 %v6243_v15, %s3791_s14  ;;  %2988 = vrot.lane.b32.xlu1 %v5641_v3, %s3794_s17 }
 0x461   : > { %v2735_v44 = vpop.f32.mrf.mxu2 }
 0x462   : > { %v2881_v25 = vmax.f32 %v2865_v41, 0.0  ;;  %v2913_v46 = vpop.permute.xlu0 %2912 }
 0x463   : > { %v2803_v48 = vpop.f32.mrf.mxu3  ;;  %v2661_v13 = vpop.f32.mrf.mxu1 }
 0x464   : > { %v2733_v19 = vadd.f32 %v2732_v1, %v2661_v13  ;;  %3576 = vmatmul.msk.f32.gmra.mxu3 %vm1779_vm10, %v2589_v14  ;;  %3026 = vrot.lane.b32.xlu2 %v2881_v25, %s3792_s19  ;;  %v2961_v61 = vpop.permute.xlu1 %2960 }
 0x466   : > { %v2847_v50 = vadd.f32 %v2803_v48, %v2733_v19 }
 0x468   : > { %v2866_v33 = vadd.f32 %v5859_v53, %v2847_v50  ;;  %2942 = vrot.lane.b32.xlu0 %v6244_v28, %s3791_s14  ;;  %2990 = vrot.lane.b32.xlu1 %v5655_v55, %s3794_s17  ;;  %s3596_s14 = sshll.u32 %s3777_s13, 5 }
 0x469   : > { %v2738_v3 = vpop.f32.mrf.mxu2  ;;  %s3304_s17 = sadd.s32 %s3600_s18, %s3596_s14 }
 0x46a   : > { %v2882_v56 = vmax.f32 %v2866_v33, 0.0  ;;  %s3597_s21 = sshll.u32 %s3304_s17, 3 }
 0x46b   : > { %v2664_v26 = vpop.f32.mrf.mxu1  ;;  %s3306_s26 = scalar_lea.hbm %s6135_s9, %s3597_s21 }
 0x46c   : > { %v2806_v9 = vpop.f32.mrf.mxu3  ;;  %v2736_v39 = vadd.f32 %v2735_v44, %v2664_v26  ;;  %3028 = vrot.lane.b32.xlu2 %v2882_v56, %s3792_s19  ;;  %v2915_v44 = vpop.permute.xlu0 %2914  ;;  %s3309_s13 = sshll.u32 %s3306_s26, 4  ;;  %s3310_s13 = int_to_ptr.hbm [resolvable:$true] %s3309_s13 }
 0x46d   : > { %v2963_v48 = vpop.permute.xlu1 %2962  ;;  %s3709_s18 = sshra.s32 %s3310_s13, 4  ;;  %s3710_s18 = int_to_ptr.hbm [resolvable:$true] %s3709_s18 }
 0x46e   : > { %v2848_v20 = vadd.f32 %v2806_v9, %v2736_v39  ;;  %s3711_s14 = scalar_lea.hbm %s3710_s18, 128  ;;  %p3716_p2 = scmp.lt.s32.totalorder %s3710_s18, %s6135_s9 }
 0x46f   : > { %p3712_p13 = scmp.ne.s32.totalorder %s3710_s18, %s3711_s14  ;;  %p3717_p4 = scmp.lt.s32.totalorder %s3715_s25, %s3711_s14 }
 0x470   : > { %v2867_v22 = vadd.f32 %v5859_v53, %v2848_v20 }
 0x471   : > { %v2741_v42 = vpop.f32.mrf.mxu2  ;;  %p3713_p0 = pnand %p3712_p13, %p3897_p3  ;;  %p3718_p5 = por %p3717_p4, %p3716_p2 }
 0x472   : > { %v2883_v6 = vmax.f32 %v2867_v22, 0.0  ;;  %v6245_v22 = vld [vmem:[#allocation13_spill] sm:$0xff] }
 0x473   : > { %v2667_v37 = vpop.f32.mrf.mxu1  ;;  %p3714_p1 = pneg %p3713_p0 }
 0x474   : > { %v2809_v21 = vpop.f32.mrf.mxu3  ;;  %v2739_v55 = vadd.f32 %v2738_v3, %v2667_v37  ;;  %3030 = vrot.lane.b32.xlu2 %v2883_v6, %s3792_s19  ;;  %v2917_v3 = vpop.permute.xlu0 %2916 }
 0x475   : > { %v2965_v39 = vpop.permute.xlu1 %2964  ;;  %p3719_p6 = pnand %p3718_p5, %p3714_p1 }
 0x476   : > { %v2849_v47 = vadd.f32 %v2809_v21, %v2739_v55 }
 0x478   : > { %v2868_v31 = vadd.f32 %v5859_v53, %v2849_v47 }
 0x479   : > { %v2744_v8 = vpop.f32.mrf.mxu2 }
 0x47a   : > { %v2884_v5 = vmax.f32 %v2868_v31, 0.0 }
 0x47b   : > { %v2670_v29 = vpop.f32.mrf.mxu1 }
 0x47c   : > { %v2812_v51 = vpop.f32.mrf.mxu3  ;;  %v2742_v10 = vadd.f32 %v2741_v42, %v2670_v29  ;;  %3032 = vrot.lane.b32.xlu2 %v2884_v5, %s3792_s19  ;;  %v3072_v42 = vsel %vm762_vm2, %v6245_v22, %v2913_v46 }
 0x47d   : > { %v3088_v55 = vsel %vm1779_vm10, %v3072_v42, %v2961_v61 }
 0x47e   : > { %v2850_v23 = vadd.f32 %v2812_v51, %v2742_v10 }
 0x480   : > { %v2869_v2 = vadd.f32 %v5859_v53, %v2850_v23  ;;  %v2967_v23 = vpop.permute.xlu1 %2966 }
 0x481   : > { %v2747_v32 = vpop.f32.mrf.mxu2 }
 0x482   : > { %v2885_v17 = vmax.f32 %v2869_v2, 0.0 }
 0x483   : > { %v2673_v43 = vpop.f32.mrf.mxu1 }
 0x484   : > { %v2815_v45 = vpop.f32.mrf.mxu3  ;;  %v2745_v40 = vadd.f32 %v2744_v8, %v2673_v43  ;;  %3034 = vrot.lane.b32.xlu2 %v2885_v17, %s3792_s19  ;;  %v2919_v8 = vpop.permute.xlu0 %2918  ;;  %v6246_v17 = vld [vmem:[#allocation14_spill] sm:$0xff] }
 0x485   : > { %v3073_v7 = vsel %vm762_vm2, %v6246_v17, %v2915_v44 }
 0x486   : > { %v2851_v63 = vadd.f32 %v2815_v45, %v2745_v40 }
 0x488   : > { %v2870_v57 = vadd.f32 %v5859_v53, %v2851_v63 }
 0x489   : > { %v2750_v12 = vpop.f32.mrf.mxu2 }
 0x48a   : > { %v2886_v59 = vmax.f32 %v2870_v57, 0.0  ;;  %v3089_v57 = vsel %vm1779_vm10, %v3073_v7, %v2963_v48 }
 0x48b   : > { %v2676_v16 = vpop.f32.mrf.mxu1 }
 0x48c   : > { %v2818_v60 = vpop.f32.mrf.mxu3  ;;  %v2748_v24 = vadd.f32 %v2747_v32, %v2676_v16  ;;  %3036 = vrot.lane.b32.xlu2 %v2886_v59, %s3792_s19 }
 0x48e   : > { %v2852_v34 = vadd.f32 %v2818_v60, %v2748_v24 }
 0x490   : > { %v2871_v52 = vadd.f32 %v5859_v53, %v2852_v34  ;;  %v2969_v34 = vpop.permute.xlu1 %2968 }
 0x491   : > { %v2753_v4 = vpop.f32.mrf.mxu2 }
 0x492   : > { %v2887_v54 = vmax.f32 %v2871_v52, 0.0 }
 0x493   : > { %v2679_v38 = vpop.f32.mrf.mxu1 }
 0x494   : > { %v2821_v36 = vpop.f32.mrf.mxu3  ;;  %v2751_v1 = vadd.f32 %v2750_v12, %v2679_v38  ;;  %3038 = vrot.lane.b32.xlu2 %v2887_v54, %s3792_s19  ;;  %v2921_v12 = vpop.permute.xlu0 %2920  ;;  %v6247_v54 = vld [vmem:[#allocation15_spill] sm:$0xff] }
 0x496   : > { %v2853_v49 = vadd.f32 %v2821_v36, %v2751_v1 }
 0x498   : > { %v2872_v35 = vadd.f32 %v5859_v53, %v2853_v49  ;;  %v6248_v49 = vld [vmem:[#allocation18_spill] sm:$0xff] }
 0x499   : > { %v2756_v41 = vpop.f32.mrf.mxu2  ;;  %v3075_v62 = vsel %vm762_vm2, %v6248_v49, %v2919_v8 }
 0x49a   : > { %v2888_v11 = vmax.f32 %v2872_v35, 0.0  ;;  %v2971_v35 = vpop.permute.xlu1 %2970  ;;  %v3091_v61 = vsel %vm1779_vm10, %v3075_v62, %v2967_v23 }
 0x49b   : > { %v2682_v30 = vpop.f32.mrf.mxu1 }
 0x49c   : > { %v2824_v0 = vpop.f32.mrf.mxu3  ;;  %v2754_v27 = vadd.f32 %v2753_v4, %v2682_v30  ;;  %3040 = vrot.lane.b32.xlu2 %v2888_v11, %s3792_s19  ;;  %v3074_v4 = vsel %vm762_vm2, %v6247_v54, %v2917_v3  ;;  %v2923_v46 = vpop.permute.xlu0 %2922 }
 0x49d   : > { %v3090_v38 = vsel %vm1779_vm10, %v3074_v4, %v2965_v39 }
 0x49e   : > { %v2854_v15 = vadd.f32 %v2824_v0, %v2754_v27  ;;  %v6249_v27 = vld [vmem:[#allocation16_spill] sm:$0xff] }
 0x4a0   : > { %v2873_v18 = vadd.f32 %v5859_v53, %v2854_v15 }
 0x4a1   : > { %v2759_v33 = vpop.f32.mrf.mxu2 }
 0x4a2   : > { %v2889_v25 = vmax.f32 %v2873_v18, 0.0  ;;  %v2973_v15 = vpop.permute.xlu1 %2972 }
 0x4a3   : > { %v2685_v13 = vpop.f32.mrf.mxu1 }
 0x4a4   : > { %v2827_v14 = vpop.f32.mrf.mxu3  ;;  %v2757_v19 = vadd.f32 %v2756_v41, %v2685_v13  ;;  %3042 = vrot.lane.b32.xlu2 %v2889_v25, %s3792_s19  ;;  %v2925_v0 = vpop.permute.xlu0 %2924  ;;  %v3076_v41 = vsel %vm762_vm2, %v6249_v27, %v2921_v12  ;;  %v6250_v13 = vld [vmem:[#allocation17_spill] sm:$0xff] }
 0x4a5   : > { %v3092_v44 = vsel %vm1779_vm10, %v3076_v41, %v2969_v34  ;;  %v6254_v34 = vld [vmem:[#allocation23_spill] sm:$0xff]  ;;  %v6256_v41 = vld [vmem:[#allocation9_spill] sm:$0xff] }
 0x4a6   : > { %v2855_v50 = vadd.f32 %v2827_v14, %v2757_v19  ;;  %v3077_v14 = vsel %vm762_vm2, %v6250_v13, %v2923_v46  ;;  %v6255_v46 = vld [vmem:[#allocation22_spill] sm:$0xff] }
 0x4a8   : > { %v2874_v28 = vadd.f32 %v5859_v53, %v2855_v50 }
 0x4a9   : > { %v2762_v37 = vpop.f32.mrf.mxu2 }
 0x4aa   : > { %v2890_v56 = vmax.f32 %v2874_v28, 0.0 }
 0x4ab   : > { %v2688_v58 = vpop.f32.mrf.mxu1 }
 0x4ac   : > { %v2830_v26 = vpop.f32.mrf.mxu3  ;;  %v2760_v9 = vadd.f32 %v2759_v33, %v2688_v58  ;;  %3044 = vrot.lane.b32.xlu2 %v2890_v56, %s3792_s19  ;;  %v2927_v50 = vpop.permute.xlu0 %2926  ;;  %v3093_v33 = vsel %vm1779_vm10, %v3077_v14, %v2971_v35 }
 0x4ad   : > { %v2975_v56 = vpop.permute.xlu1 %2974 }
 0x4ae   : > { %v2856_v20 = vadd.f32 %v2830_v26, %v2760_v9 }
 0x4b0   : > { %v2875_v6 = vadd.f32 %v5859_v53, %v2856_v20  ;;  %v6251_v20 = vld [vmem:[#allocation21_spill] sm:$0xff] }
 0x4b1   : > { %v2765_v43 = vpop.f32.mrf.mxu2  ;;  %v3078_v42 = vsel %vm762_vm2, %v6251_v20, %v2925_v0 }
 0x4b2   : > { %v2891_v21 = vmax.f32 %v2875_v6, 0.0 }
 0x4b3   : > { %v3025_v47 = vpop.permute.xlu2 %3024  ;;  %v2691_v31 = vpop.f32.mrf.mxu1 }
 0x4b4   : > { %v2833_v5 = vpop.f32.mrf.mxu3  ;;  %v3104_v29 = vsel %vm791_vm3, %v3088_v55, %v3025_v47  ;;  %v2763_v51 = vadd.f32 %v2762_v37, %v2691_v31  ;;  %3046 = vrot.lane.b32.xlu2 %v2891_v21, %s3792_s19  ;;  %v3094_v55 = vsel %vm1779_vm10, %v3078_v42, %v2973_v15  ;;  %v2929_v47 = vpop.permute.xlu0 %2928 }
 0x4b5   : > { %3577 = vmatmul.msk.f32.vlgmr.msra.gmra.mxu1 %vm3129_vm0, %v3104_v29 }
 0x4b6   : > { %v2857_v10 = vadd.f32 %v2833_v5, %v2763_v51 }
 0x4b8   : > { %v2876_v2 = vadd.f32 %v5859_v53, %v2857_v10  ;;  %v2977_v10 = vpop.permute.xlu1 %2976 }
 0x4b9   : > { %v2768_v19 = vpop.f32.mrf.mxu2 }
 0x4ba   : > { %v2892_v32 = vmax.f32 %v2876_v2, 0.0  ;;  %v6252_v2 = vld [vmem:[#allocation19_spill] sm:$0xff] }
 0x4bb   : > { %v2694_v45 = vpop.f32.mrf.mxu1 }
 0x4bc   : > { %v2766_v40 = vadd.f32 %v2765_v43, %v2694_v45  ;;  %3048 = vrot.lane.b32.xlu2 %v2892_v32, %s3792_s19  ;;  %v2836_v63 = vpop.f32.mrf.mxu3  ;;  %v3079_v32 = vsel %vm762_vm2, %v6252_v2, %v2927_v50 }
 0x4bd   : > { %v3095_v43 = vsel %vm1779_vm10, %v3079_v32, %v2975_v56 }
 0x4be   : > { %v2858_v59 = vadd.f32 %v2836_v63, %v2766_v40  ;;  %v3027_v16 = vpop.permute.xlu2 %3026  ;;  %v2931_v63 = vpop.permute.xlu0 %2930 }
 0x4bf   : > { %v3105_v60 = vsel %vm791_vm3, %v3089_v57, %v3027_v16  ;;  %v6253_v57 = vld [vmem:[#allocation20_spill] sm:$0xff] }
 0x4c0   : > { %v2877_v24 = vadd.f32 %v5859_v53, %v2858_v59  ;;  %3578 = vmatmul.msk.f32.gmra.mxu1 %vm3129_vm0, %v3105_v60  ;;  %v3080_v12 = vsel %vm762_vm2, %v6253_v57, %v2929_v47  ;;  %v2979_v59 = vpop.permute.xlu1 %2978 }
 0x4c1   : > { %v2771_v21 = vpop.f32.mrf.mxu2 }
 0x4c2   : > { %v2893_v52 = vmax.f32 %v2877_v24, 0.0 }
 0x4c3   : > { %v2697_v48 = vpop.f32.mrf.mxu1 }
 0x4c4   : > { %3050 = vrot.lane.b32.xlu2 %v2893_v52, %s3792_s19  ;;  %v2769_v28 = vadd.f32 %v2768_v19, %v2697_v48  ;;  %v3081_v52 = vsel %vm762_vm2, %v6254_v34, %v2931_v63  ;;  %v6257_v19 = vld [vmem:[#allocation8_spill] sm:$0xff] }
 0x4c5   : > { %v6260_v63 = vld [vmem:[#allocation12_spill] sm:$0xff] }
 0x4c6   : > { %v3029_v36 = vpop.permute.xlu2 %3028  ;;  %v2933_v24 = vpop.permute.xlu0 %2932 }
 0x4c7   : > { %v3106_v1 = vsel %vm791_vm3, %v3090_v38, %v3029_v36  ;;  %v3097_v38 = vsel %vm1779_vm10, %v3081_v52, %v2979_v59  ;;  %v3082_v62 = vsel %vm762_vm2, %v6255_v46, %v2933_v24 }
 0x4c8   : > { %3579 = vmatmul.msk.f32.gmra.mxu1 %vm3129_vm0, %v3106_v1  ;;  %v2981_v4 = vpop.permute.xlu1 %2980 }
 0x4cb   : > { %v2700_v6 = vpop.f32.mrf.mxu1 }
 0x4cc   : > { %v2772_v31 = vadd.f32 %v2771_v21, %v2700_v6 }
 0x4ce   : > { %v3031_v11 = vpop.permute.xlu2 %3030  ;;  %v2935_v35 = vpop.permute.xlu0 %2934 }
 0x4cf   : > { %v3107_v30 = vsel %vm791_vm3, %v3091_v61, %v3031_v11  ;;  %v3098_v61 = vsel %vm1779_vm10, %v3082_v62, %v2981_v4  ;;  %v3083_v15 = vsel %vm762_vm2, %v6256_v41, %v2935_v35 }
 0x4d0   : > { %3580 = vmatmul.msk.f32.gmra.mxu1 %vm3129_vm0, %v3107_v30  ;;  %v2983_v30 = vpop.permute.xlu1 %2982 }
 0x4d6   : > { %v3033_v18 = vpop.permute.xlu2 %3032 }
 0x4d7   : > { %v3108_v25 = vsel %vm791_vm3, %v3092_v44, %v3033_v18  ;;  %v3099_v44 = vsel %vm1779_vm10, %v3083_v15, %v2983_v30  ;;  %v2937_v18 = vpop.permute.xlu0 %2936 }
 0x4d8   : > { %3581 = vmatmul.msk.f32.gmra.mxu1 %vm3129_vm0, %v3108_v25  ;;  %v2985_v14 = vpop.permute.xlu1 %2984  ;;  %v3084_v50 = vsel %vm762_vm2, %v6257_v19, %v2937_v18 }
 0x4de   : > { %v3035_v3 = vpop.permute.xlu2 %3034 }
 0x4df   : > { %v3109_v58 = vsel %vm791_vm3, %v3093_v33, %v3035_v3  ;;  %v2839_v26 = vpop.f32.mrf.mxu3  ;;  %v3100_v33 = vsel %vm1779_vm10, %v3084_v50, %v2985_v14  ;;  %v2939_v56 = vpop.permute.xlu0 %2938 }
 0x4e0   : > { %v2859_v9 = vadd.f32 %v2839_v26, %v2769_v28  ;;  %3582 = vmatmul.msk.f32.gmra.mxu1 %vm3129_vm0, %v3109_v58  ;;  %v6258_v58 = vld [vmem:[#allocation10_spill] sm:$0xff] }
 0x4e1   : > { %v3085_v26 = vsel %vm762_vm2, %v6258_v58, %v2939_v56 }
 0x4e2   : > { %v2878_v39 = vadd.f32 %v5859_v53, %v2859_v9  ;;  %v2987_v9 = vpop.permute.xlu1 %2986 }
 0x4e4   : > { %v2894_v37 = vmax.f32 %v2878_v39, 0.0  ;;  %v3101_v39 = vsel %vm1779_vm10, %v3085_v26, %v2987_v9 }
 0x4e6   : > { %3052 = vrot.lane.b32.xlu2 %v2894_v37, %s3792_s19  ;;  %v3037_v8 = vpop.permute.xlu2 %3036  ;;  %v5998_v37 = vld [vmem:[%s6134_s8] ss:$0 sm:$0xff] }
 0x4e7   : > { %v3110_v5 = vsel %vm791_vm3, %v3094_v55, %v3037_v8  ;;  %v2842_v29 = vpop.f32.mrf.mxu3  ;;  %v2941_v8 = vpop.permute.xlu0 %2940 }
 0x4e8   : > { %v2860_v51 = vadd.f32 %v2842_v29, %v2772_v31  ;;  %3583 = vmatmul.msk.f32.gmra.mxu1 %vm3129_vm0, %v3110_v5  ;;  %v6259_v29 = vld [vmem:[#allocation11_spill] sm:$0xff] }
 0x4ea   : > { %v2879_v23 = vadd.f32 %v5859_v53, %v2860_v51  ;;  %v3096_v53 = vsel %vm1779_vm10, %v3080_v12, %v2977_v10  ;;  %v2989_v5 = vpop.permute.xlu1 %2988  ;;  %v3086_v51 = vsel %vm762_vm2, %v6259_v29, %v2941_v8 }
 0x4eb   : > { %v3102_v32 = vsel %vm1779_vm10, %v3086_v51, %v2989_v5 }
 0x4ec   : > { %v2895_v7 = vmax.f32 %v2879_v23, 0.0 }
 0x4ee   : > { %3054 = vrot.lane.b32.xlu2 %v2895_v7, %s3792_s19  ;;  %v3039_v45 = vpop.permute.xlu2 %3038 }
 0x4ef   : > { %v3111_v40 = vsel %vm791_vm3, %v3095_v43, %v3039_v45  ;;  %v2943_v45 = vpop.permute.xlu0 %2942 }
 0x4f0   : > { %3584 = vmatmul.msk.f32.gmra.mxu1 %vm3129_vm0, %v3111_v40  ;;  %v3087_v12 = vsel %vm762_vm2, %v6260_v63, %v2943_v45 }
 0x4f2   : > { %v2991_v59 = vpop.permute.xlu1 %2990 }
 0x4f6   : > { %v3041_v16 = vpop.permute.xlu2 %3040 }
 0x4f7   : > { %v3112_v60 = vsel %vm791_vm3, %v3096_v53, %v3041_v16 }
 0x4f8   : > { %3585 = vmatmul.msk.f32.gmra.mxu1 %vm3129_vm0, %v3112_v60  ;;  %v3103_v60 = vsel %vm1779_vm10, %v3087_v12, %v2991_v59 }
 0x4fe   : > { %v3043_v36 = vpop.permute.xlu2 %3042 }
 0x4ff   : > { %v3113_v1 = vsel %vm791_vm3, %v3097_v38, %v3043_v36 }
 0x500   : > { %3586 = vmatmul.msk.f32.gmra.mxu1 %vm3129_vm0, %v3113_v1 }
 0x506   : > { %v3045_v11 = vpop.permute.xlu2 %3044 }
 0x507   : > { %v3114_v0 = vsel %vm791_vm3, %v3098_v61, %v3045_v11 }
 0x508   : > { %3587 = vmatmul.msk.f32.gmra.mxu1 %vm3129_vm0, %v3114_v0 }
 0x50e   : > { %v3047_v25 = vpop.permute.xlu2 %3046 }
 0x50f   : > { %v3115_v48 = vsel %vm791_vm3, %v3099_v44, %v3047_v25 }
 0x510   : > { %3588 = vmatmul.msk.f32.gmra.mxu1 %vm3129_vm0, %v3115_v48 }
 0x516   : > { %v3049_v28 = vpop.permute.xlu2 %3048 }
 0x517   : > { %v3116_v3 = vsel %vm791_vm3, %v3100_v33, %v3049_v28 }
 0x518   : > { %3589 = vmatmul.msk.f32.gmra.mxu1 %vm3129_vm0, %v3116_v3 }
 0x51e   : > { %v3051_v42 = vpop.permute.xlu2 %3050 }
 0x51f   : > { %v3117_v6 = vsel %vm791_vm3, %v3101_v39, %v3051_v42 }
 0x520   : > { %3590 = vmatmul.msk.f32.gmra.mxu1 %vm3129_vm0, %v3117_v6 }
 0x532   : > { %v3195_v21 = vpop.f32.mrf.mxu1 }
 0x533   : > { %v3196_v55 = vadd.f32 %v5998_v37, %v3195_v21 }
 0x535   : > { %v3243_v47 = vmax.f32 %v3196_v55, 0.0 }
 0x537   : > { %v3259_v31 = vadd.f32 %v3243_v47, %v6245_v22 }
 0x539   : > { %3275 = vst.msk [vmem:[%s6005_s29] sm:$0xff] %vm762_vm2, %v3259_v31 }
 0x53d   : > { %v3198_v10 = vpop.f32.mrf.mxu1 }
 0x53e   : > { %v3199_v23 = vadd.f32 %v5998_v37, %v3198_v10 }
 0x540   : > { %v3244_v7 = vmax.f32 %v3199_v23, 0.0  ;;  %v3053_v43 = vpop.permute.xlu2 %3052 }
 0x541   : > { %v3118_v22 = vsel %vm791_vm3, %v3102_v32, %v3053_v43 }
 0x542   : > { %v3260_v40 = vadd.f32 %v3244_v7, %v6246_v17  ;;  %3591 = vmatmul.msk.f32.gmra.mxu1 %vm3129_vm0, %v3118_v22 }
 0x544   : > { %3276 = vst.msk [vmem:[%s6005_s29 + $0x8] sm:$0xff] %vm762_vm2, %v3260_v40 }
 0x545   : > { %v3201_v53 = vpop.f32.mrf.mxu1 }
 0x546   : > { %v3202_v16 = vadd.f32 %v5998_v37, %v3201_v53 }
 0x548   : > { %v3245_v24 = vmax.f32 %v3202_v16, 0.0  ;;  %v3055_v52 = vpop.permute.xlu2 %3054 }
 0x549   : > { %v3119_v4 = vsel %vm791_vm3, %v3103_v60, %v3055_v52 }
 0x54a   : > { %v3261_v17 = vadd.f32 %v3245_v24, %v6247_v54  ;;  %3592 = vmatmul.msk.f32.gmra.mxu1 %vm3129_vm0, %v3119_v4 }
 0x54c   : > { %3277 = vst.msk [vmem:[%s6005_s29 + $0x10] sm:$0xff] %vm762_vm2, %v3261_v17 }
 0x54d   : > { %v3204_v38 = vpop.f32.mrf.mxu1 }
 0x54e   : > { %v3205_v36 = vadd.f32 %v5998_v37, %v3204_v38 }
 0x550   : > { %v3246_v1 = vmax.f32 %v3205_v36, 0.0 }
 0x552   : > { %v3262_v62 = vadd.f32 %v3246_v1, %v6248_v49 }
 0x554   : > { %3278 = vst.msk [vmem:[%s6005_s29 + $0x18] sm:$0xff] %vm762_vm2, %v3262_v62 }
 0x555   : > { %v3207_v35 = vpop.f32.mrf.mxu1 }
 0x556   : > { %v3208_v61 = vadd.f32 %v5998_v37, %v3207_v35 }
 0x558   : > { %v3247_v11 = vmax.f32 %v3208_v61, 0.0 }
 0x55a   : > { %v3263_v54 = vadd.f32 %v3247_v11, %v6249_v27 }
 0x55c   : > { %3279 = vst.msk [vmem:[%s6005_s29 + $0x20] sm:$0xff] %vm762_vm2, %v3263_v54 }
 0x55d   : > { %v3210_v30 = vpop.f32.mrf.mxu1 }
 0x55e   : > { %v3211_v0 = vadd.f32 %v5998_v37, %v3210_v30 }
 0x560   : > { %v3248_v15 = vmax.f32 %v3211_v0, 0.0 }
 0x562   : > { %v3264_v44 = vadd.f32 %v3248_v15, %v6250_v13 }
 0x564   : > { %3280 = vst.msk [vmem:[%s6005_s29 + $0x28] sm:$0xff] %vm762_vm2, %v3264_v44 }
 0x565   : > { %v3213_v49 = vpop.f32.mrf.mxu1 }
 0x566   : > { %v3214_v18 = vadd.f32 %v5998_v37, %v3213_v49 }
 0x568   : > { %v3249_v25 = vmax.f32 %v3214_v18, 0.0 }
 0x56a   : > { %v3265_v48 = vadd.f32 %v3249_v25, %v6251_v20 }
 0x56c   : > { %3281 = vst.msk [vmem:[%s6005_s29 + $0x30] sm:$0xff] %vm762_vm2, %v3265_v48 }
 0x56d   : > { %v3216_v27 = vpop.f32.mrf.mxu1 }
 0x56e   : > { %v3217_v14 = vadd.f32 %v5998_v37, %v3216_v27 }
 0x570   : > { %v3250_v50 = vmax.f32 %v3217_v14, 0.0 }
 0x572   : > { %v3266_v33 = vadd.f32 %v3250_v50, %v6252_v2 }
 0x574   : > { %3282 = vst.msk [vmem:[%s6005_s29 + $0x38] sm:$0xff] %vm762_vm2, %v3266_v33 }
 0x575   : > { %v3219_v13 = vpop.f32.mrf.mxu1 }
 0x576   : > { %v3220_v28 = vadd.f32 %v5998_v37, %v3219_v13 }
 0x578   : > { %v3251_v3 = vmax.f32 %v3220_v28, 0.0 }
 0x57a   : > { %v3267_v56 = vadd.f32 %v3251_v3, %v6253_v57 }
 0x57c   : > { %3283 = vst.msk [vmem:[%s6005_s29 + $0x40] sm:$0xff] %vm762_vm2, %v3267_v56 }
 0x57d   : > { %v3222_v20 = vpop.f32.mrf.mxu1 }
 0x57e   : > { %v3223_v26 = vadd.f32 %v5998_v37, %v3222_v20 }
 0x580   : > { %v3252_v9 = vmax.f32 %v3223_v26, 0.0 }
 0x582   : > { %v3268_v39 = vadd.f32 %v3252_v9, %v6254_v34 }
 0x584   : > { %3284 = vst.msk [vmem:[%s6005_s29 + $0x48] sm:$0xff] %vm762_vm2, %v3268_v39 }
 0x585   : > { %v3225_v2 = vpop.f32.mrf.mxu1 }
 0x586   : > { %v3226_v42 = vadd.f32 %v5998_v37, %v3225_v2 }
 0x588   : > { %v3253_v6 = vmax.f32 %v3226_v42, 0.0 }
 0x58a   : > { %v3269_v21 = vadd.f32 %v3253_v6, %v6255_v46 }
 0x58c   : > { %3285 = vst.msk [vmem:[%s6005_s29 + $0x50] sm:$0xff] %vm762_vm2, %v3269_v21 }
 0x58d   : > { %v3228_v57 = vpop.f32.mrf.mxu1 }
 0x58e   : > { %v3229_v55 = vadd.f32 %v5998_v37, %v3228_v57 }
 0x590   : > { %v3254_v47 = vmax.f32 %v3229_v55, 0.0 }
 0x592   : > { %v3270_v34 = vadd.f32 %v3254_v47, %v6256_v41 }
 0x594   : > { %3286 = vst.msk [vmem:[%s6005_s29 + $0x58] sm:$0xff] %vm762_vm2, %v3270_v34 }
 0x595   : > { %v3231_v31 = vpop.f32.mrf.mxu1 }
 0x596   : > { %v3232_v8 = vadd.f32 %v5998_v37, %v3231_v31 }
 0x598   : > { %v3255_v5 = vmax.f32 %v3232_v8, 0.0 }
 0x59a   : > { %v3271_v46 = vadd.f32 %v3255_v5, %v6257_v19 }
 0x59c   : > { %3287 = vst.msk [vmem:[%s6005_s29 + $0x60] sm:$0xff] %vm762_vm2, %v3271_v46 }
 0x59d   : > { %v3234_v51 = vpop.f32.mrf.mxu1 }
 0x59e   : > { %v3235_v10 = vadd.f32 %v5998_v37, %v3234_v51 }
 0x5a0   : > { %v3256_v23 = vmax.f32 %v3235_v10, 0.0 }
 0x5a2   : > { %v3272_v32 = vadd.f32 %v3256_v23, %v6258_v58 }
 0x5a4   : > { %3288 = vst.msk [vmem:[%s6005_s29 + $0x68] sm:$0xff] %vm762_vm2, %v3272_v32 }
 0x5bf   : > { %v3237_v41 = vpop.f32.mrf.mxu1 }
 0x5c0   : > { %v3238_v7 = vadd.f32 %v5998_v37, %v3237_v41 }
 0x5c2   : > { %v3257_v19 = vmax.f32 %v3238_v7, 0.0 }
 0x5c4   : > { %v3273_v43 = vadd.f32 %v3257_v19, %v6259_v29 }
 0x5c6   : > { %3289 = vst.msk [vmem:[%s6005_s29 + $0x70] sm:$0xff] %vm762_vm2, %v3273_v43 }
 0x5c7   : > { %v3240_v58 = vpop.f32.mrf.mxu1 }
 0x5c8   : > { %v3241_v22 = vadd.f32 %v5998_v37, %v3240_v58 }
 0x5ca   : > { %v3258_v45 = vmax.f32 %v3241_v22, 0.0 }
 0x5cc   : > { %v3274_v40 = vadd.f32 %v3258_v45, %v6260_v63 }
 0x5ce   : > { %3290 = vst.msk [vmem:[%s6005_s29 + $0x78] sm:$0xff] %vm762_vm2, %v3274_v40 }
 0x5cf   : > { %3722 = shalt.err (!%p3719_p6)
}
 0x5d0   : > { %s3795_s23 = smov 128  }
 0x5d1   : > { %3614 = dma.vmem_to_hbm [thread:$0]  (%p3897_p3), %s3308_s12, 2048, %s3310_s13, %s3292_s28, %s3795_s23, %s3795_s23, %s3793_s24  }
 0x5d2 PF: > { %p3620_p7 = scmp.ge.s32.totalorder %s3789_s16, 2  ;;  %s3324_s17 = sand.u32 1, %s3761_s30  }
 0x5d3   : > { %s3325_s21 = scalar_lea.sflag [#allocation3], %s3324_s17 }
 0x5d4   : > { %p3617_p9 = pnand %p3620_p7, %p3906_p8 }
 0x5d6   : > { %p3618_p10 = pneg %p3617_p9 }
 0x5d8   : > { %3756 = dma.done.wait (%p3618_p10), %s3325_s21, 2048  }
 0x5d9   : > { %3758 = vsyncadd (%p3618_p10), %s3325_s21, 4294965248  ;;  %s22_s16 = sadd.s32 1, %s3789_s16   ;;  %s6262_s12 = sld [smem:[#allocation5_spill]] }
 0x5da   : > { %p19_p11 = scmp.ge.s32.totalorder %s22_s16, 6   ;;  %s6263_s14 = sld [smem:[#allocation6_spill]] }
 0x5db   : > { %s6264_s30 = smov %s3765_s10  ;;  %s6265_s10 = smov %s3769_s11 }
 0x5dc   : > { %s6266_s11 = smov %s3915_s27  ;;  %s6267_s13 = smov %s3785_s15 }
 0x5dd   : > { %s6268_s15 = smov %s6274_s20  ;;  %21 = sbr.rel (!%p19_p11) target bundleno = 5 (0x5), region = 92 }
 0x5e2   :  { %3331 = vsyncpa [#allocation3], 1 }
 0x5e3   :  { %3333 = vsyncpa [#allocation3 + $0x1], 1 }

</bundles_post_ra>
